<compile_context>
chip_gen: v6e
topology: v6e:2x2x1
jax: 0.10.0
libtpu: 0.0.40
codegen_flags: <defaults>
</compile_context>

<pallas_src>
import functools

import jax
import jax.numpy as jnp
import numpy as np
from jax.experimental import pallas as pl
from jax.experimental.pallas import tpu as pltpu

EPS = 1e-5


def _vmem_spec():
    return pl.BlockSpec(memory_space=pltpu.MemorySpace.VMEM)


# ---------------------------------------------------------------------------
# Fused kernel: bn1 -> conv1(5x5)+ReLU -> bn2 -> conv2(3x3)+ReLU -> softmax
# All activations are (C, H*W): channels on sublanes, spatial on lanes.
# ---------------------------------------------------------------------------
def fused_cnn2d_kernel(x_ref, g1_ref, bt1_ref, w1_ref, b1_ref,
                       g2_ref, bt2_ref, w2_ref, b2_ref,
                       o_ref, *, H, W, k1, k2):
    """All refs live in VMEM.

    x_ref  : (Cin, H*W)            input, channels-on-sublane / spatial-on-lane
    g1/bt1 : (Cin, 1)              bn1 affine
    w1_ref : (Chid, k1*k1*Cin)     conv1 weights, column block t = tap (dy,dx)
    b1_ref : (Chid, 1)             conv1 bias
    g2/bt2 : (Chid, 1)             bn2 affine
    w2_ref : (Cout, k2*k2*Chid)    conv2 weights
    b2_ref : (Cout, 1)             conv2 bias
    o_ref  : (Cout, H*W)           softmax output (classes on sublanes)
    """
    HW = H * W
    Chid = w1_ref.shape[0]
    Cout = w2_ref.shape[0]

    # x-position of each lane within its spatial row (static W).
    x_pos = jax.lax.broadcasted_iota(jnp.int32, (1, HW), 1) % W

    def bn_train(h, g_ref, b_ref):
        # BatchNorm2d in training mode: biased batch stats over the spatial (lane) axis.
        mu = jnp.mean(h, axis=1, keepdims=True)
        var = jnp.mean((h - mu) * (h - mu), axis=1, keepdims=True)
        return (h - mu) * jax.lax.rsqrt(var + EPS) * g_ref[...] + b_ref[...]

    def conv_same(h, w_ref_, b_ref_, k, n_out):
        # "SAME" conv as a sum over k*k taps of (n_out, C) @ (C, HW) MXU matmuls.
        # Padding is done once in value space on the flattened spatial axis: the left/right
        # zero halo of width p*W+p makes every vertical out-of-range read a zero read, so
        # only the horizontal (per-dx) boundary needs an explicit lane mask.
        C = h.shape[0]
        p = (k - 1) // 2
        pad = p * W + p
        hp = jnp.concatenate(
            [jnp.zeros((C, pad), h.dtype), h, jnp.zeros((C, pad), h.dtype)], axis=1)

        # Per-dx lane masks (hoisted out of the dy loop); dx == p needs no mask.
        dx_masks = []
        for dx in range(k):
            lo, hi = p - dx, W + p - dx        # valid iff lo <= x < hi
            if lo > 0 and hi < W:
                dx_masks.append((x_pos >= lo) & (x_pos < hi))
            elif lo > 0:
                dx_masks.append(x_pos >= lo)
            elif hi < W:
                dx_masks.append(x_pos < hi)
            else:
                dx_masks.append(None)

        acc = jnp.zeros((n_out, HW), jnp.float32)
        for dy in range(k):
            for dx in range(k):
                t = dy * k + dx
                s = (dy - p) * W + (dx - p)
                win = hp[:, pad + s: pad + s + HW]          # (C, HW), lane-dense
                if dx_masks[dx] is not None:
                    win = jnp.where(dx_masks[dx], win, 0.0)
                w_tap = w_ref_[:, t * C:(t + 1) * C]        # (n_out, C)
                acc = acc + jnp.dot(w_tap, win, preferred_element_type=jnp.float32)
        return acc + b_ref_[...]

    h = bn_train(x_ref[...], g1_ref, bt1_ref)
    h = jnp.maximum(conv_same(h, w1_ref, b1_ref, k1, Chid), 0.0)
    h = bn_train(h, g2_ref, bt2_ref)
    h = jnp.maximum(conv_same(h, w2_ref, b2_ref, k2, Cout), 0.0)

    # Softmax over the class (sublane) axis; spatial stays 128-lane dense.
    m = jnp.max(h, axis=0, keepdims=True)
    e = jnp.exp(h - m)
    denom = jnp.sum(e, axis=0, keepdims=True)
    o_ref[...] = e * pl.reciprocal(denom, approx=False)


# ---------------------------------------------------------------------------
# Parameters (deterministic, PyTorch-default-style init)
# ---------------------------------------------------------------------------
def init_params(key, input_dim, hidden_dim, num_class):
    ka, kb, kc, kd = jax.random.split(key, 4)
    fan_in1 = input_dim * 5 * 5
    bound1 = 1.0 / np.sqrt(fan_in1)
    w1 = jax.random.uniform(ka, (5, 5, input_dim, hidden_dim), jnp.float32, -bound1, bound1)
    b1 = jax.random.uniform(kb, (hidden_dim,), jnp.float32, -bound1, bound1)

    fan_in2 = hidden_dim * 3 * 3
    bound2 = 1.0 / np.sqrt(fan_in2)
    w2 = jax.random.uniform(kc, (3, 3, hidden_dim, num_class), jnp.float32, -bound2, bound2)
    b2 = jax.random.uniform(kd, (num_class,), jnp.float32, -bound2, bound2)

    # BatchNorm2d default init: weight=1, bias=0.
    return dict(w1=w1, b1=b1, w2=w2, b2=b2,
                g1=jnp.ones((input_dim,), jnp.float32),
                bt1=jnp.zeros((input_dim,), jnp.float32),
                g2=jnp.ones((hidden_dim,), jnp.float32),
                bt2=jnp.zeros((hidden_dim,), jnp.float32))


def pack_params(params):
    """One-time repack into the (out_channels, k*k*in_channels) matmul layout;
    per-channel vectors become (C, 1) columns (broadcast along the lane axis)."""
    kk1, _, Cin, Chid = params["w1"].shape
    w1m = jnp.transpose(params["w1"], (3, 0, 1, 2)).reshape(Chid, kk1 * kk1 * Cin)
    kk2, _, _, Cout = params["w2"].shape
    w2m = jnp.transpose(params["w2"], (3, 0, 1, 2)).reshape(Cout, kk2 * kk2 * Chid)
    col = lambda v: v.reshape(-1, 1)
    return {"w1m": w1m, "b1": col(params["b1"]), "w2m": w2m, "b2": col(params["b2"]),
            "g1": col(params["g1"]), "bt1": col(params["bt1"]),
            "g2": col(params["g2"]), "bt2": col(params["bt2"])}


# ---------------------------------------------------------------------------
# Forward: ONE fused pallas_call, channels-on-sublane / spatial-on-lane
# ---------------------------------------------------------------------------
@jax.jit
def cnn2d_forward(x, p):
    H, W, Cin = x.shape
    Chid, K1 = p["w1m"].shape
    Cout, K2 = p["w2m"].shape
    HW = H * W
    ks1, ks2 = 5, 3  # kernel sizes fixed by the module spec

    # One transpose in the wrapper; the kernel works spatially-flattened on lanes.
    x_t = jnp.transpose(x, (2, 0, 1)).reshape(Cin, HW)

    flops = int(2 * HW * (K1 * Chid + K2 * Cout))
    transcendentals = int(HW * Cout + HW + Cin + Chid)          # exp + recip + 2x rsqrt
    bytes_accessed = int(4 * (HW * Cin + Chid * K1 + Cout * K2
                              + 2 * Cin + 3 * Chid + Cout + HW * Cout))

    kernel = functools.partial(fused_cnn2d_kernel, H=H, W=W, k1=ks1, k2=ks2)
    out_t = pl.pallas_call(
        kernel,
        out_shape=jax.ShapeDtypeStruct((Cout, HW), jnp.float32),
        in_specs=[_vmem_spec()] * 9,
        out_specs=_vmem_spec(),
        compiler_params=pltpu.CompilerParams(vmem_limit_bytes=4 * 1024 * 1024),
        cost_estimate=pl.CostEstimate(flops=flops, transcendentals=transcendentals,
                                      bytes_accessed=bytes_accessed),
    )(x_t, p["g1"], p["bt1"], p["w1m"], p["b1"],
      p["g2"], p["bt2"], p["w2m"], p["b2"])

    return out_t.T  # (H*W, num_class), matching torch's permute+reshape order


# ---------------------------------------------------------------------------
# Pure-JAX reference (mirrors the PyTorch forward)
# ---------------------------------------------------------------------------
def reference_forward(x, params):
    H, W, _ = x.shape

    def bn(v, g, b):
        mean = jnp.mean(v, axis=(0, 1), keepdims=True)
        var = jnp.mean((v - mean) ** 2, axis=(0, 1), keepdims=True)
        return (v - mean) * jax.lax.rsqrt(var + EPS) * g + b

    def conv(v, w, b):
        y = jax.lax.conv_general_dilated(
            v[None], w, window_strides=(1, 1), padding="SAME",
            dimension_numbers=("NHWC", "HWIO", "NHWC"))[0]
        return y + b.reshape(1, 1, -1)

    h = bn(x, params["g1"].reshape(1, 1, -1), params["bt1"].reshape(1, 1, -1))
    h = jnp.maximum(conv(h, params["w1"], params["b1"]), 0.0)
    h = bn(h, params["g2"].reshape(1, 1, -1), params["bt2"].reshape(1, 1, -1))
    h = jnp.maximum(conv(h, params["w2"], params["b2"]), 0.0)
    return jax.nn.softmax(h.reshape(H * W, -1), axis=-1)


if __name__ == "__main__":
    key = jax.random.PRNGKey(0)
    kx, kp = jax.random.split(key)

    H, W = 16, 16
    input_dim, hidden_dim, num_class = 4, 32, 8

    x = jax.random.normal(kx, (H, W, input_dim), jnp.float32)
    params = init_params(kp, input_dim, hidden_dim, num_class)
    kparams = pack_params(params)

    out = jax.block_until_ready(cnn2d_forward(x, kparams))
    ref = reference_forward(x, params)

    assert out.shape == (H * W, num_class)
    np.testing.assert_allclose(np.asarray(out), np.asarray(ref), atol=1e-4, rtol=1e-3)
    np.testing.assert_allclose(np.asarray(out).sum(-1), 1.0, atol=1e-5)

    print("KERNEL_OK")
</pallas_src>

<mosaic_0001>
module attributes {stable_mosaic.version = 11 : i64} {
  func.func @fused_cnn2d_kernel(%arg0: memref<4x256xf32, #tpu.memory_space<vmem>>, %arg1: memref<4x1xf32, #tpu.memory_space<vmem>>, %arg2: memref<4x1xf32, #tpu.memory_space<vmem>>, %arg3: memref<32x100xf32, #tpu.memory_space<vmem>>, %arg4: memref<32x1xf32, #tpu.memory_space<vmem>>, %arg5: memref<32x1xf32, #tpu.memory_space<vmem>>, %arg6: memref<32x1xf32, #tpu.memory_space<vmem>>, %arg7: memref<8x288xf32, #tpu.memory_space<vmem>>, %arg8: memref<8x1xf32, #tpu.memory_space<vmem>>, %arg9: memref<8x256xf32, #tpu.memory_space<vmem>>) attributes {dimension_semantics = [], scalar_prefetch = 0 : i64, scratch_operands = 0 : i64, tpu.core_type = #tpu.core_type<tc>} {
    %0 = tpu.iota {dimensions = array<i32: 1>} : vector<1x256xi32>
    %c16_i32 = arith.constant 16 : i32
    %c0_i32 = arith.constant 0 : i32
    %1 = arith.cmpi eq, %c16_i32, %c0_i32 : i32
    %c1_i32 = arith.constant 1 : i32
    %2 = arith.select %1, %c1_i32, %c16_i32 : i32
    %3 = vector.broadcast %2 : i32 to vector<1x256xi32>
    %4 = arith.remsi %0, %3 : vector<1x256xi32>
    %c0_i32_0 = arith.constant 0 : i32
    %5 = vector.broadcast %c0_i32_0 : i32 to vector<1x256xi32>
    %6 = arith.cmpi ne, %4, %5 : vector<1x256xi32>
    %c0_i32_1 = arith.constant 0 : i32
    %7 = vector.broadcast %c0_i32_1 : i32 to vector<1x256xi32>
    %8 = arith.cmpi slt, %4, %7 : vector<1x256xi32>
    %c0_i32_2 = arith.constant 0 : i32
    %9 = arith.cmpi slt, %2, %c0_i32_2 : i32
    %10 = vector.broadcast %9 : i1 to vector<1x256xi1>
    %11 = vector.broadcast %10 : vector<1x256xi1> to vector<1x256xi1>
    %12 = arith.xori %8, %11 : vector<1x256xi1>
    %13 = arith.andi %12, %6 : vector<1x256xi1>
    %14 = vector.broadcast %2 : i32 to vector<1x256xi32>
    %15 = arith.addi %4, %14 : vector<1x256xi32>
    %16 = arith.select %13, %15, %4 : vector<1x256xi1>, vector<1x256xi32>
    %c0 = arith.constant 0 : index
    %c0_3 = arith.constant 0 : index
    %17 = vector.load %arg0[%c0, %c0_3] : memref<4x256xf32, #tpu.memory_space<vmem>>, vector<4x256xf32>
    %cst = arith.constant dense<0.000000e+00> : vector<4xf32>
    %18 = vector.multi_reduction <add>, %17, %cst [1] : vector<4x256xf32> to vector<4xf32>
    %19 = vector.shape_cast %18 : vector<4xf32> to vector<4x1xf32>
    %cst_4 = arith.constant 2.560000e+02 : f32
    %20 = vector.broadcast %cst_4 : f32 to vector<4x1xf32>
    %21 = arith.divf %19, %20 : vector<4x1xf32>
    %22 = vector.broadcast %21 : vector<4x1xf32> to vector<4x256xf32>
    %23 = arith.subf %17, %22 : vector<4x256xf32>
    %24 = vector.broadcast %21 : vector<4x1xf32> to vector<4x256xf32>
    %25 = arith.subf %17, %24 : vector<4x256xf32>
    %26 = arith.mulf %23, %25 : vector<4x256xf32>
    %cst_5 = arith.constant dense<0.000000e+00> : vector<4xf32>
    %27 = vector.multi_reduction <add>, %26, %cst_5 [1] : vector<4x256xf32> to vector<4xf32>
    %28 = vector.shape_cast %27 : vector<4xf32> to vector<4x1xf32>
    %cst_6 = arith.constant 2.560000e+02 : f32
    %29 = vector.broadcast %cst_6 : f32 to vector<4x1xf32>
    %30 = arith.divf %28, %29 : vector<4x1xf32>
    %31 = vector.broadcast %21 : vector<4x1xf32> to vector<4x256xf32>
    %32 = arith.subf %17, %31 : vector<4x256xf32>
    %cst_7 = arith.constant 9.99999974E-6 : f32
    %33 = vector.broadcast %cst_7 : f32 to vector<4x1xf32>
    %34 = arith.addf %30, %33 : vector<4x1xf32>
    %35 = math.rsqrt %34 : vector<4x1xf32>
    %36 = vector.broadcast %35 : vector<4x1xf32> to vector<4x256xf32>
    %37 = arith.mulf %32, %36 : vector<4x256xf32>
    %c0_8 = arith.constant 0 : index
    %c0_9 = arith.constant 0 : index
    %38 = vector.load %arg1[%c0_8, %c0_9] : memref<4x1xf32, #tpu.memory_space<vmem>>, vector<4x1xf32>
    %39 = vector.broadcast %38 : vector<4x1xf32> to vector<4x256xf32>
    %40 = arith.mulf %37, %39 : vector<4x256xf32>
    %c0_10 = arith.constant 0 : index
    %c0_11 = arith.constant 0 : index
    %41 = vector.load %arg2[%c0_10, %c0_11] : memref<4x1xf32, #tpu.memory_space<vmem>>, vector<4x1xf32>
    %42 = vector.broadcast %41 : vector<4x1xf32> to vector<4x256xf32>
    %43 = arith.addf %40, %42 : vector<4x256xf32>
    %cst_12 = arith.constant 0.000000e+00 : f32
    %44 = vector.broadcast %cst_12 : f32 to vector<4x34xf32>
    %cst_13 = arith.constant 0.000000e+00 : f32
    %45 = vector.broadcast %cst_13 : f32 to vector<4x34xf32>
    %46 = tpu.concatenate %44, %43, %45 in 1 : vector<4x34xf32>, vector<4x256xf32>, vector<4x34xf32> -> vector<4x324xf32>
    %c2_i32 = arith.constant 2 : i32
    %47 = vector.broadcast %c2_i32 : i32 to vector<1x256xi32>
    %48 = arith.cmpi sge, %16, %47 : vector<1x256xi32>
    %c1_i32_14 = arith.constant 1 : i32
    %49 = vector.broadcast %c1_i32_14 : i32 to vector<1x256xi32>
    %50 = arith.cmpi sge, %16, %49 : vector<1x256xi32>
    %c15_i32 = arith.constant 15 : i32
    %51 = vector.broadcast %c15_i32 : i32 to vector<1x256xi32>
    %52 = arith.cmpi slt, %16, %51 : vector<1x256xi32>
    %c14_i32 = arith.constant 14 : i32
    %53 = vector.broadcast %c14_i32 : i32 to vector<1x256xi32>
    %54 = arith.cmpi slt, %16, %53 : vector<1x256xi32>
    %cst_15 = arith.constant 0.000000e+00 : f32
    %55 = vector.broadcast %cst_15 : f32 to vector<32x256xf32>
    %56 = vector.extract_strided_slice %46 {offsets = [0, 0], sizes = [4, 256], strides = [1, 1]} : vector<4x324xf32> to vector<4x256xf32>
    %cst_16 = arith.constant 0.000000e+00 : f32
    %57 = vector.shape_cast %48 : vector<1x256xi1> to vector<1x256xi1>
    %58 = vector.broadcast %57 : vector<1x256xi1> to vector<4x256xi1>
    %59 = vector.broadcast %cst_16 : f32 to vector<4x256xf32>
    %60 = arith.select %58, %56, %59 : vector<4x256xi1>, vector<4x256xf32>
    %c0_17 = arith.constant 0 : index
    %c0_18 = arith.constant 0 : index
    %61 = vector.load %arg3[%c0_17, %c0_18] : memref<32x100xf32, #tpu.memory_space<vmem>>, vector<32x4xf32>
    %cst_19 = arith.constant dense<0.000000e+00> : vector<32x256xf32>
    %62 = tpu.matmul %61, %60, %cst_19 {dimension_numbers = #tpu.dot_dimension_numbers<[1], [0], [0], [1], [0, 0, 1, 1], [], []>} : vector<32x4xf32>, vector<4x256xf32>, vector<32x256xf32> -> vector<32x256xf32>
    %63 = arith.addf %55, %62 : vector<32x256xf32>
    %64 = vector.extract_strided_slice %46 {offsets = [0, 1], sizes = [4, 256], strides = [1, 1]} : vector<4x324xf32> to vector<4x256xf32>
    %cst_20 = arith.constant 0.000000e+00 : f32
    %65 = vector.shape_cast %50 : vector<1x256xi1> to vector<1x256xi1>
    %66 = vector.broadcast %65 : vector<1x256xi1> to vector<4x256xi1>
    %67 = vector.broadcast %cst_20 : f32 to vector<4x256xf32>
    %68 = arith.select %66, %64, %67 : vector<4x256xi1>, vector<4x256xf32>
    %c0_21 = arith.constant 0 : index
    %c4 = arith.constant 4 : index
    %69 = vector.load %arg3[%c0_21, %c4] : memref<32x100xf32, #tpu.memory_space<vmem>>, vector<32x4xf32>
    %cst_22 = arith.constant dense<0.000000e+00> : vector<32x256xf32>
    %70 = tpu.matmul %69, %68, %cst_22 {dimension_numbers = #tpu.dot_dimension_numbers<[1], [0], [0], [1], [0, 0, 1, 1], [], []>} : vector<32x4xf32>, vector<4x256xf32>, vector<32x256xf32> -> vector<32x256xf32>
    %71 = arith.addf %63, %70 : vector<32x256xf32>
    %72 = vector.extract_strided_slice %46 {offsets = [0, 2], sizes = [4, 256], strides = [1, 1]} : vector<4x324xf32> to vector<4x256xf32>
    %c0_23 = arith.constant 0 : index
    %c8 = arith.constant 8 : index
    %73 = vector.load %arg3[%c0_23, %c8] : memref<32x100xf32, #tpu.memory_space<vmem>>, vector<32x4xf32>
    %cst_24 = arith.constant dense<0.000000e+00> : vector<32x256xf32>
    %74 = tpu.matmul %73, %72, %cst_24 {dimension_numbers = #tpu.dot_dimension_numbers<[1], [0], [0], [1], [0, 0, 1, 1], [], []>} : vector<32x4xf32>, vector<4x256xf32>, vector<32x256xf32> -> vector<32x256xf32>
    %75 = arith.addf %71, %74 : vector<32x256xf32>
    %76 = vector.extract_strided_slice %46 {offsets = [0, 3], sizes = [4, 256], strides = [1, 1]} : vector<4x324xf32> to vector<4x256xf32>
    %cst_25 = arith.constant 0.000000e+00 : f32
    %77 = vector.shape_cast %52 : vector<1x256xi1> to vector<1x256xi1>
    %78 = vector.broadcast %77 : vector<1x256xi1> to vector<4x256xi1>
    %79 = vector.broadcast %cst_25 : f32 to vector<4x256xf32>
    %80 = arith.select %78, %76, %79 : vector<4x256xi1>, vector<4x256xf32>
    %c0_26 = arith.constant 0 : index
    %c12 = arith.constant 12 : index
    %81 = vector.load %arg3[%c0_26, %c12] : memref<32x100xf32, #tpu.memory_space<vmem>>, vector<32x4xf32>
    %cst_27 = arith.constant dense<0.000000e+00> : vector<32x256xf32>
    %82 = tpu.matmul %81, %80, %cst_27 {dimension_numbers = #tpu.dot_dimension_numbers<[1], [0], [0], [1], [0, 0, 1, 1], [], []>} : vector<32x4xf32>, vector<4x256xf32>, vector<32x256xf32> -> vector<32x256xf32>
    %83 = arith.addf %75, %82 : vector<32x256xf32>
    %84 = vector.extract_strided_slice %46 {offsets = [0, 4], sizes = [4, 256], strides = [1, 1]} : vector<4x324xf32> to vector<4x256xf32>
    %cst_28 = arith.constant 0.000000e+00 : f32
    %85 = vector.shape_cast %54 : vector<1x256xi1> to vector<1x256xi1>
    %86 = vector.broadcast %85 : vector<1x256xi1> to vector<4x256xi1>
    %87 = vector.broadcast %cst_28 : f32 to vector<4x256xf32>
    %88 = arith.select %86, %84, %87 : vector<4x256xi1>, vector<4x256xf32>
    %c0_29 = arith.constant 0 : index
    %c16 = arith.constant 16 : index
    %89 = vector.load %arg3[%c0_29, %c16] : memref<32x100xf32, #tpu.memory_space<vmem>>, vector<32x4xf32>
    %cst_30 = arith.constant dense<0.000000e+00> : vector<32x256xf32>
    %90 = tpu.matmul %89, %88, %cst_30 {dimension_numbers = #tpu.dot_dimension_numbers<[1], [0], [0], [1], [0, 0, 1, 1], [], []>} : vector<32x4xf32>, vector<4x256xf32>, vector<32x256xf32> -> vector<32x256xf32>
    %91 = arith.addf %83, %90 : vector<32x256xf32>
    %92 = vector.extract_strided_slice %46 {offsets = [0, 16], sizes = [4, 256], strides = [1, 1]} : vector<4x324xf32> to vector<4x256xf32>
    %cst_31 = arith.constant 0.000000e+00 : f32
    %93 = vector.shape_cast %48 : vector<1x256xi1> to vector<1x256xi1>
    %94 = vector.broadcast %93 : vector<1x256xi1> to vector<4x256xi1>
    %95 = vector.broadcast %cst_31 : f32 to vector<4x256xf32>
    %96 = arith.select %94, %92, %95 : vector<4x256xi1>, vector<4x256xf32>
    %c0_32 = arith.constant 0 : index
    %c20 = arith.constant 20 : index
    %97 = vector.load %arg3[%c0_32, %c20] : memref<32x100xf32, #tpu.memory_space<vmem>>, vector<32x4xf32>
    %cst_33 = arith.constant dense<0.000000e+00> : vector<32x256xf32>
    %98 = tpu.matmul %97, %96, %cst_33 {dimension_numbers = #tpu.dot_dimension_numbers<[1], [0], [0], [1], [0, 0, 1, 1], [], []>} : vector<32x4xf32>, vector<4x256xf32>, vector<32x256xf32> -> vector<32x256xf32>
    %99 = arith.addf %91, %98 : vector<32x256xf32>
    %100 = vector.extract_strided_slice %46 {offsets = [0, 17], sizes = [4, 256], strides = [1, 1]} : vector<4x324xf32> to vector<4x256xf32>
    %cst_34 = arith.constant 0.000000e+00 : f32
    %101 = vector.shape_cast %50 : vector<1x256xi1> to vector<1x256xi1>
    %102 = vector.broadcast %101 : vector<1x256xi1> to vector<4x256xi1>
    %103 = vector.broadcast %cst_34 : f32 to vector<4x256xf32>
    %104 = arith.select %102, %100, %103 : vector<4x256xi1>, vector<4x256xf32>
    %c0_35 = arith.constant 0 : index
    %c24 = arith.constant 24 : index
    %105 = vector.load %arg3[%c0_35, %c24] : memref<32x100xf32, #tpu.memory_space<vmem>>, vector<32x4xf32>
    %cst_36 = arith.constant dense<0.000000e+00> : vector<32x256xf32>
    %106 = tpu.matmul %105, %104, %cst_36 {dimension_numbers = #tpu.dot_dimension_numbers<[1], [0], [0], [1], [0, 0, 1, 1], [], []>} : vector<32x4xf32>, vector<4x256xf32>, vector<32x256xf32> -> vector<32x256xf32>
    %107 = arith.addf %99, %106 : vector<32x256xf32>
    %108 = vector.extract_strided_slice %46 {offsets = [0, 18], sizes = [4, 256], strides = [1, 1]} : vector<4x324xf32> to vector<4x256xf32>
    %c0_37 = arith.constant 0 : index
    %c28 = arith.constant 28 : index
    %109 = vector.load %arg3[%c0_37, %c28] : memref<32x100xf32, #tpu.memory_space<vmem>>, vector<32x4xf32>
    %cst_38 = arith.constant dense<0.000000e+00> : vector<32x256xf32>
    %110 = tpu.matmul %109, %108, %cst_38 {dimension_numbers = #tpu.dot_dimension_numbers<[1], [0], [0], [1], [0, 0, 1, 1], [], []>} : vector<32x4xf32>, vector<4x256xf32>, vector<32x256xf32> -> vector<32x256xf32>
    %111 = arith.addf %107, %110 : vector<32x256xf32>
    %112 = vector.extract_strided_slice %46 {offsets = [0, 19], sizes = [4, 256], strides = [1, 1]} : vector<4x324xf32> to vector<4x256xf32>
    %cst_39 = arith.constant 0.000000e+00 : f32
    %113 = vector.shape_cast %52 : vector<1x256xi1> to vector<1x256xi1>
    %114 = vector.broadcast %113 : vector<1x256xi1> to vector<4x256xi1>
    %115 = vector.broadcast %cst_39 : f32 to vector<4x256xf32>
    %116 = arith.select %114, %112, %115 : vector<4x256xi1>, vector<4x256xf32>
    %c0_40 = arith.constant 0 : index
    %c32 = arith.constant 32 : index
    %117 = vector.load %arg3[%c0_40, %c32] : memref<32x100xf32, #tpu.memory_space<vmem>>, vector<32x4xf32>
    %cst_41 = arith.constant dense<0.000000e+00> : vector<32x256xf32>
    %118 = tpu.matmul %117, %116, %cst_41 {dimension_numbers = #tpu.dot_dimension_numbers<[1], [0], [0], [1], [0, 0, 1, 1], [], []>} : vector<32x4xf32>, vector<4x256xf32>, vector<32x256xf32> -> vector<32x256xf32>
    %119 = arith.addf %111, %118 : vector<32x256xf32>
    %120 = vector.extract_strided_slice %46 {offsets = [0, 20], sizes = [4, 256], strides = [1, 1]} : vector<4x324xf32> to vector<4x256xf32>
    %cst_42 = arith.constant 0.000000e+00 : f32
    %121 = vector.shape_cast %54 : vector<1x256xi1> to vector<1x256xi1>
    %122 = vector.broadcast %121 : vector<1x256xi1> to vector<4x256xi1>
    %123 = vector.broadcast %cst_42 : f32 to vector<4x256xf32>
    %124 = arith.select %122, %120, %123 : vector<4x256xi1>, vector<4x256xf32>
    %c0_43 = arith.constant 0 : index
    %c36 = arith.constant 36 : index
    %125 = vector.load %arg3[%c0_43, %c36] : memref<32x100xf32, #tpu.memory_space<vmem>>, vector<32x4xf32>
    %cst_44 = arith.constant dense<0.000000e+00> : vector<32x256xf32>
    %126 = tpu.matmul %125, %124, %cst_44 {dimension_numbers = #tpu.dot_dimension_numbers<[1], [0], [0], [1], [0, 0, 1, 1], [], []>} : vector<32x4xf32>, vector<4x256xf32>, vector<32x256xf32> -> vector<32x256xf32>
    %127 = arith.addf %119, %126 : vector<32x256xf32>
    %128 = vector.extract_strided_slice %46 {offsets = [0, 32], sizes = [4, 256], strides = [1, 1]} : vector<4x324xf32> to vector<4x256xf32>
    %cst_45 = arith.constant 0.000000e+00 : f32
    %129 = vector.shape_cast %48 : vector<1x256xi1> to vector<1x256xi1>
    %130 = vector.broadcast %129 : vector<1x256xi1> to vector<4x256xi1>
    %131 = vector.broadcast %cst_45 : f32 to vector<4x256xf32>
    %132 = arith.select %130, %128, %131 : vector<4x256xi1>, vector<4x256xf32>
    %c0_46 = arith.constant 0 : index
    %c40 = arith.constant 40 : index
    %133 = vector.load %arg3[%c0_46, %c40] : memref<32x100xf32, #tpu.memory_space<vmem>>, vector<32x4xf32>
    %cst_47 = arith.constant dense<0.000000e+00> : vector<32x256xf32>
    %134 = tpu.matmul %133, %132, %cst_47 {dimension_numbers = #tpu.dot_dimension_numbers<[1], [0], [0], [1], [0, 0, 1, 1], [], []>} : vector<32x4xf32>, vector<4x256xf32>, vector<32x256xf32> -> vector<32x256xf32>
    %135 = arith.addf %127, %134 : vector<32x256xf32>
    %136 = vector.extract_strided_slice %46 {offsets = [0, 33], sizes = [4, 256], strides = [1, 1]} : vector<4x324xf32> to vector<4x256xf32>
    %cst_48 = arith.constant 0.000000e+00 : f32
    %137 = vector.shape_cast %50 : vector<1x256xi1> to vector<1x256xi1>
    %138 = vector.broadcast %137 : vector<1x256xi1> to vector<4x256xi1>
    %139 = vector.broadcast %cst_48 : f32 to vector<4x256xf32>
    %140 = arith.select %138, %136, %139 : vector<4x256xi1>, vector<4x256xf32>
    %c0_49 = arith.constant 0 : index
    %c44 = arith.constant 44 : index
    %141 = vector.load %arg3[%c0_49, %c44] : memref<32x100xf32, #tpu.memory_space<vmem>>, vector<32x4xf32>
    %cst_50 = arith.constant dense<0.000000e+00> : vector<32x256xf32>
    %142 = tpu.matmul %141, %140, %cst_50 {dimension_numbers = #tpu.dot_dimension_numbers<[1], [0], [0], [1], [0, 0, 1, 1], [], []>} : vector<32x4xf32>, vector<4x256xf32>, vector<32x256xf32> -> vector<32x256xf32>
    %143 = arith.addf %135, %142 : vector<32x256xf32>
    %144 = vector.extract_strided_slice %46 {offsets = [0, 34], sizes = [4, 256], strides = [1, 1]} : vector<4x324xf32> to vector<4x256xf32>
    %c0_51 = arith.constant 0 : index
    %c48 = arith.constant 48 : index
    %145 = vector.load %arg3[%c0_51, %c48] : memref<32x100xf32, #tpu.memory_space<vmem>>, vector<32x4xf32>
    %cst_52 = arith.constant dense<0.000000e+00> : vector<32x256xf32>
    %146 = tpu.matmul %145, %144, %cst_52 {dimension_numbers = #tpu.dot_dimension_numbers<[1], [0], [0], [1], [0, 0, 1, 1], [], []>} : vector<32x4xf32>, vector<4x256xf32>, vector<32x256xf32> -> vector<32x256xf32>
    %147 = arith.addf %143, %146 : vector<32x256xf32>
    %148 = vector.extract_strided_slice %46 {offsets = [0, 35], sizes = [4, 256], strides = [1, 1]} : vector<4x324xf32> to vector<4x256xf32>
    %cst_53 = arith.constant 0.000000e+00 : f32
    %149 = vector.shape_cast %52 : vector<1x256xi1> to vector<1x256xi1>
    %150 = vector.broadcast %149 : vector<1x256xi1> to vector<4x256xi1>
    %151 = vector.broadcast %cst_53 : f32 to vector<4x256xf32>
    %152 = arith.select %150, %148, %151 : vector<4x256xi1>, vector<4x256xf32>
    %c0_54 = arith.constant 0 : index
    %c52 = arith.constant 52 : index
    %153 = vector.load %arg3[%c0_54, %c52] : memref<32x100xf32, #tpu.memory_space<vmem>>, vector<32x4xf32>
    %cst_55 = arith.constant dense<0.000000e+00> : vector<32x256xf32>
    %154 = tpu.matmul %153, %152, %cst_55 {dimension_numbers = #tpu.dot_dimension_numbers<[1], [0], [0], [1], [0, 0, 1, 1], [], []>} : vector<32x4xf32>, vector<4x256xf32>, vector<32x256xf32> -> vector<32x256xf32>
    %155 = arith.addf %147, %154 : vector<32x256xf32>
    %156 = vector.extract_strided_slice %46 {offsets = [0, 36], sizes = [4, 256], strides = [1, 1]} : vector<4x324xf32> to vector<4x256xf32>
    %cst_56 = arith.constant 0.000000e+00 : f32
    %157 = vector.shape_cast %54 : vector<1x256xi1> to vector<1x256xi1>
    %158 = vector.broadcast %157 : vector<1x256xi1> to vector<4x256xi1>
    %159 = vector.broadcast %cst_56 : f32 to vector<4x256xf32>
    %160 = arith.select %158, %156, %159 : vector<4x256xi1>, vector<4x256xf32>
    %c0_57 = arith.constant 0 : index
    %c56 = arith.constant 56 : index
    %161 = vector.load %arg3[%c0_57, %c56] : memref<32x100xf32, #tpu.memory_space<vmem>>, vector<32x4xf32>
    %cst_58 = arith.constant dense<0.000000e+00> : vector<32x256xf32>
    %162 = tpu.matmul %161, %160, %cst_58 {dimension_numbers = #tpu.dot_dimension_numbers<[1], [0], [0], [1], [0, 0, 1, 1], [], []>} : vector<32x4xf32>, vector<4x256xf32>, vector<32x256xf32> -> vector<32x256xf32>
    %163 = arith.addf %155, %162 : vector<32x256xf32>
    %164 = vector.extract_strided_slice %46 {offsets = [0, 48], sizes = [4, 256], strides = [1, 1]} : vector<4x324xf32> to vector<4x256xf32>
    %cst_59 = arith.constant 0.000000e+00 : f32
    %165 = vector.shape_cast %48 : vector<1x256xi1> to vector<1x256xi1>
    %166 = vector.broadcast %165 : vector<1x256xi1> to vector<4x256xi1>
    %167 = vector.broadcast %cst_59 : f32 to vector<4x256xf32>
    %168 = arith.select %166, %164, %167 : vector<4x256xi1>, vector<4x256xf32>
    %c0_60 = arith.constant 0 : index
    %c60 = arith.constant 60 : index
    %169 = vector.load %arg3[%c0_60, %c60] : memref<32x100xf32, #tpu.memory_space<vmem>>, vector<32x4xf32>
    %cst_61 = arith.constant dense<0.000000e+00> : vector<32x256xf32>
    %170 = tpu.matmul %169, %168, %cst_61 {dimension_numbers = #tpu.dot_dimension_numbers<[1], [0], [0], [1], [0, 0, 1, 1], [], []>} : vector<32x4xf32>, vector<4x256xf32>, vector<32x256xf32> -> vector<32x256xf32>
    %171 = arith.addf %163, %170 : vector<32x256xf32>
    %172 = vector.extract_strided_slice %46 {offsets = [0, 49], sizes = [4, 256], strides = [1, 1]} : vector<4x324xf32> to vector<4x256xf32>
    %cst_62 = arith.constant 0.000000e+00 : f32
    %173 = vector.shape_cast %50 : vector<1x256xi1> to vector<1x256xi1>
    %174 = vector.broadcast %173 : vector<1x256xi1> to vector<4x256xi1>
    %175 = vector.broadcast %cst_62 : f32 to vector<4x256xf32>
    %176 = arith.select %174, %172, %175 : vector<4x256xi1>, vector<4x256xf32>
    %c0_63 = arith.constant 0 : index
    %c64 = arith.constant 64 : index
    %177 = vector.load %arg3[%c0_63, %c64] : memref<32x100xf32, #tpu.memory_space<vmem>>, vector<32x4xf32>
    %cst_64 = arith.constant dense<0.000000e+00> : vector<32x256xf32>
    %178 = tpu.matmul %177, %176, %cst_64 {dimension_numbers = #tpu.dot_dimension_numbers<[1], [0], [0], [1], [0, 0, 1, 1], [], []>} : vector<32x4xf32>, vector<4x256xf32>, vector<32x256xf32> -> vector<32x256xf32>
    %179 = arith.addf %171, %178 : vector<32x256xf32>
    %180 = vector.extract_strided_slice %46 {offsets = [0, 50], sizes = [4, 256], strides = [1, 1]} : vector<4x324xf32> to vector<4x256xf32>
    %c0_65 = arith.constant 0 : index
    %c68 = arith.constant 68 : index
    %181 = vector.load %arg3[%c0_65, %c68] : memref<32x100xf32, #tpu.memory_space<vmem>>, vector<32x4xf32>
    %cst_66 = arith.constant dense<0.000000e+00> : vector<32x256xf32>
    %182 = tpu.matmul %181, %180, %cst_66 {dimension_numbers = #tpu.dot_dimension_numbers<[1], [0], [0], [1], [0, 0, 1, 1], [], []>} : vector<32x4xf32>, vector<4x256xf32>, vector<32x256xf32> -> vector<32x256xf32>
    %183 = arith.addf %179, %182 : vector<32x256xf32>
    %184 = vector.extract_strided_slice %46 {offsets = [0, 51], sizes = [4, 256], strides = [1, 1]} : vector<4x324xf32> to vector<4x256xf32>
    %cst_67 = arith.constant 0.000000e+00 : f32
    %185 = vector.shape_cast %52 : vector<1x256xi1> to vector<1x256xi1>
    %186 = vector.broadcast %185 : vector<1x256xi1> to vector<4x256xi1>
    %187 = vector.broadcast %cst_67 : f32 to vector<4x256xf32>
    %188 = arith.select %186, %184, %187 : vector<4x256xi1>, vector<4x256xf32>
    %c0_68 = arith.constant 0 : index
    %c72 = arith.constant 72 : index
    %189 = vector.load %arg3[%c0_68, %c72] : memref<32x100xf32, #tpu.memory_space<vmem>>, vector<32x4xf32>
    %cst_69 = arith.constant dense<0.000000e+00> : vector<32x256xf32>
    %190 = tpu.matmul %189, %188, %cst_69 {dimension_numbers = #tpu.dot_dimension_numbers<[1], [0], [0], [1], [0, 0, 1, 1], [], []>} : vector<32x4xf32>, vector<4x256xf32>, vector<32x256xf32> -> vector<32x256xf32>
    %191 = arith.addf %183, %190 : vector<32x256xf32>
    %192 = vector.extract_strided_slice %46 {offsets = [0, 52], sizes = [4, 256], strides = [1, 1]} : vector<4x324xf32> to vector<4x256xf32>
    %cst_70 = arith.constant 0.000000e+00 : f32
    %193 = vector.shape_cast %54 : vector<1x256xi1> to vector<1x256xi1>
    %194 = vector.broadcast %193 : vector<1x256xi1> to vector<4x256xi1>
    %195 = vector.broadcast %cst_70 : f32 to vector<4x256xf32>
    %196 = arith.select %194, %192, %195 : vector<4x256xi1>, vector<4x256xf32>
    %c0_71 = arith.constant 0 : index
    %c76 = arith.constant 76 : index
    %197 = vector.load %arg3[%c0_71, %c76] : memref<32x100xf32, #tpu.memory_space<vmem>>, vector<32x4xf32>
    %cst_72 = arith.constant dense<0.000000e+00> : vector<32x256xf32>
    %198 = tpu.matmul %197, %196, %cst_72 {dimension_numbers = #tpu.dot_dimension_numbers<[1], [0], [0], [1], [0, 0, 1, 1], [], []>} : vector<32x4xf32>, vector<4x256xf32>, vector<32x256xf32> -> vector<32x256xf32>
    %199 = arith.addf %191, %198 : vector<32x256xf32>
    %200 = vector.extract_strided_slice %46 {offsets = [0, 64], sizes = [4, 256], strides = [1, 1]} : vector<4x324xf32> to vector<4x256xf32>
    %cst_73 = arith.constant 0.000000e+00 : f32
    %201 = vector.shape_cast %48 : vector<1x256xi1> to vector<1x256xi1>
    %202 = vector.broadcast %201 : vector<1x256xi1> to vector<4x256xi1>
    %203 = vector.broadcast %cst_73 : f32 to vector<4x256xf32>
    %204 = arith.select %202, %200, %203 : vector<4x256xi1>, vector<4x256xf32>
    %c0_74 = arith.constant 0 : index
    %c80 = arith.constant 80 : index
    %205 = vector.load %arg3[%c0_74, %c80] : memref<32x100xf32, #tpu.memory_space<vmem>>, vector<32x4xf32>
    %cst_75 = arith.constant dense<0.000000e+00> : vector<32x256xf32>
    %206 = tpu.matmul %205, %204, %cst_75 {dimension_numbers = #tpu.dot_dimension_numbers<[1], [0], [0], [1], [0, 0, 1, 1], [], []>} : vector<32x4xf32>, vector<4x256xf32>, vector<32x256xf32> -> vector<32x256xf32>
    %207 = arith.addf %199, %206 : vector<32x256xf32>
    %208 = vector.extract_strided_slice %46 {offsets = [0, 65], sizes = [4, 256], strides = [1, 1]} : vector<4x324xf32> to vector<4x256xf32>
    %cst_76 = arith.constant 0.000000e+00 : f32
    %209 = vector.shape_cast %50 : vector<1x256xi1> to vector<1x256xi1>
    %210 = vector.broadcast %209 : vector<1x256xi1> to vector<4x256xi1>
    %211 = vector.broadcast %cst_76 : f32 to vector<4x256xf32>
    %212 = arith.select %210, %208, %211 : vector<4x256xi1>, vector<4x256xf32>
    %c0_77 = arith.constant 0 : index
    %c84 = arith.constant 84 : index
    %213 = vector.load %arg3[%c0_77, %c84] : memref<32x100xf32, #tpu.memory_space<vmem>>, vector<32x4xf32>
    %cst_78 = arith.constant dense<0.000000e+00> : vector<32x256xf32>
    %214 = tpu.matmul %213, %212, %cst_78 {dimension_numbers = #tpu.dot_dimension_numbers<[1], [0], [0], [1], [0, 0, 1, 1], [], []>} : vector<32x4xf32>, vector<4x256xf32>, vector<32x256xf32> -> vector<32x256xf32>
    %215 = arith.addf %207, %214 : vector<32x256xf32>
    %216 = vector.extract_strided_slice %46 {offsets = [0, 66], sizes = [4, 256], strides = [1, 1]} : vector<4x324xf32> to vector<4x256xf32>
    %c0_79 = arith.constant 0 : index
    %c88 = arith.constant 88 : index
    %217 = vector.load %arg3[%c0_79, %c88] : memref<32x100xf32, #tpu.memory_space<vmem>>, vector<32x4xf32>
    %cst_80 = arith.constant dense<0.000000e+00> : vector<32x256xf32>
    %218 = tpu.matmul %217, %216, %cst_80 {dimension_numbers = #tpu.dot_dimension_numbers<[1], [0], [0], [1], [0, 0, 1, 1], [], []>} : vector<32x4xf32>, vector<4x256xf32>, vector<32x256xf32> -> vector<32x256xf32>
    %219 = arith.addf %215, %218 : vector<32x256xf32>
    %220 = vector.extract_strided_slice %46 {offsets = [0, 67], sizes = [4, 256], strides = [1, 1]} : vector<4x324xf32> to vector<4x256xf32>
    %cst_81 = arith.constant 0.000000e+00 : f32
    %221 = vector.shape_cast %52 : vector<1x256xi1> to vector<1x256xi1>
    %222 = vector.broadcast %221 : vector<1x256xi1> to vector<4x256xi1>
    %223 = vector.broadcast %cst_81 : f32 to vector<4x256xf32>
    %224 = arith.select %222, %220, %223 : vector<4x256xi1>, vector<4x256xf32>
    %c0_82 = arith.constant 0 : index
    %c92 = arith.constant 92 : index
    %225 = vector.load %arg3[%c0_82, %c92] : memref<32x100xf32, #tpu.memory_space<vmem>>, vector<32x4xf32>
    %cst_83 = arith.constant dense<0.000000e+00> : vector<32x256xf32>
    %226 = tpu.matmul %225, %224, %cst_83 {dimension_numbers = #tpu.dot_dimension_numbers<[1], [0], [0], [1], [0, 0, 1, 1], [], []>} : vector<32x4xf32>, vector<4x256xf32>, vector<32x256xf32> -> vector<32x256xf32>
    %227 = arith.addf %219, %226 : vector<32x256xf32>
    %228 = vector.extract_strided_slice %46 {offsets = [0, 68], sizes = [4, 256], strides = [1, 1]} : vector<4x324xf32> to vector<4x256xf32>
    %cst_84 = arith.constant 0.000000e+00 : f32
    %229 = vector.shape_cast %54 : vector<1x256xi1> to vector<1x256xi1>
    %230 = vector.broadcast %229 : vector<1x256xi1> to vector<4x256xi1>
    %231 = vector.broadcast %cst_84 : f32 to vector<4x256xf32>
    %232 = arith.select %230, %228, %231 : vector<4x256xi1>, vector<4x256xf32>
    %c0_85 = arith.constant 0 : index
    %c96 = arith.constant 96 : index
    %233 = vector.load %arg3[%c0_85, %c96] : memref<32x100xf32, #tpu.memory_space<vmem>>, vector<32x4xf32>
    %cst_86 = arith.constant dense<0.000000e+00> : vector<32x256xf32>
    %234 = tpu.matmul %233, %232, %cst_86 {dimension_numbers = #tpu.dot_dimension_numbers<[1], [0], [0], [1], [0, 0, 1, 1], [], []>} : vector<32x4xf32>, vector<4x256xf32>, vector<32x256xf32> -> vector<32x256xf32>
    %235 = arith.addf %227, %234 : vector<32x256xf32>
    %c0_87 = arith.constant 0 : index
    %c0_88 = arith.constant 0 : index
    %236 = vector.load %arg4[%c0_87, %c0_88] : memref<32x1xf32, #tpu.memory_space<vmem>>, vector<32x1xf32>
    %237 = vector.broadcast %236 : vector<32x1xf32> to vector<32x256xf32>
    %238 = arith.addf %235, %237 : vector<32x256xf32>
    %cst_89 = arith.constant 0.000000e+00 : f32
    %239 = vector.broadcast %cst_89 : f32 to vector<32x256xf32>
    %240 = arith.maximumf %238, %239 : vector<32x256xf32>
    %cst_90 = arith.constant dense<0.000000e+00> : vector<32xf32>
    %241 = vector.multi_reduction <add>, %240, %cst_90 [1] : vector<32x256xf32> to vector<32xf32>
    %242 = vector.shape_cast %241 : vector<32xf32> to vector<32x1xf32>
    %cst_91 = arith.constant 2.560000e+02 : f32
    %243 = vector.broadcast %cst_91 : f32 to vector<32x1xf32>
    %244 = arith.divf %242, %243 : vector<32x1xf32>
    %245 = vector.broadcast %244 : vector<32x1xf32> to vector<32x256xf32>
    %246 = arith.subf %240, %245 : vector<32x256xf32>
    %247 = vector.broadcast %244 : vector<32x1xf32> to vector<32x256xf32>
    %248 = arith.subf %240, %247 : vector<32x256xf32>
    %249 = arith.mulf %246, %248 : vector<32x256xf32>
    %cst_92 = arith.constant dense<0.000000e+00> : vector<32xf32>
    %250 = vector.multi_reduction <add>, %249, %cst_92 [1] : vector<32x256xf32> to vector<32xf32>
    %251 = vector.shape_cast %250 : vector<32xf32> to vector<32x1xf32>
    %cst_93 = arith.constant 2.560000e+02 : f32
    %252 = vector.broadcast %cst_93 : f32 to vector<32x1xf32>
    %253 = arith.divf %251, %252 : vector<32x1xf32>
    %254 = vector.broadcast %244 : vector<32x1xf32> to vector<32x256xf32>
    %255 = arith.subf %240, %254 : vector<32x256xf32>
    %cst_94 = arith.constant 9.99999974E-6 : f32
    %256 = vector.broadcast %cst_94 : f32 to vector<32x1xf32>
    %257 = arith.addf %253, %256 : vector<32x1xf32>
    %258 = math.rsqrt %257 : vector<32x1xf32>
    %259 = vector.broadcast %258 : vector<32x1xf32> to vector<32x256xf32>
    %260 = arith.mulf %255, %259 : vector<32x256xf32>
    %c0_95 = arith.constant 0 : index
    %c0_96 = arith.constant 0 : index
    %261 = vector.load %arg5[%c0_95, %c0_96] : memref<32x1xf32, #tpu.memory_space<vmem>>, vector<32x1xf32>
    %262 = vector.broadcast %261 : vector<32x1xf32> to vector<32x256xf32>
    %263 = arith.mulf %260, %262 : vector<32x256xf32>
    %c0_97 = arith.constant 0 : index
    %c0_98 = arith.constant 0 : index
    %264 = vector.load %arg6[%c0_97, %c0_98] : memref<32x1xf32, #tpu.memory_space<vmem>>, vector<32x1xf32>
    %265 = vector.broadcast %264 : vector<32x1xf32> to vector<32x256xf32>
    %266 = arith.addf %263, %265 : vector<32x256xf32>
    %cst_99 = arith.constant 0.000000e+00 : f32
    %267 = vector.broadcast %cst_99 : f32 to vector<32x17xf32>
    %cst_100 = arith.constant 0.000000e+00 : f32
    %268 = vector.broadcast %cst_100 : f32 to vector<32x17xf32>
    %269 = tpu.concatenate %267, %266, %268 in 1 : vector<32x17xf32>, vector<32x256xf32>, vector<32x17xf32> -> vector<32x290xf32>
    %c1_i32_101 = arith.constant 1 : i32
    %270 = vector.broadcast %c1_i32_101 : i32 to vector<1x256xi32>
    %271 = arith.cmpi sge, %16, %270 : vector<1x256xi32>
    %c15_i32_102 = arith.constant 15 : i32
    %272 = vector.broadcast %c15_i32_102 : i32 to vector<1x256xi32>
    %273 = arith.cmpi slt, %16, %272 : vector<1x256xi32>
    %cst_103 = arith.constant 0.000000e+00 : f32
    %274 = vector.broadcast %cst_103 : f32 to vector<8x256xf32>
    %275 = vector.extract_strided_slice %269 {offsets = [0, 0], sizes = [32, 256], strides = [1, 1]} : vector<32x290xf32> to vector<32x256xf32>
    %cst_104 = arith.constant 0.000000e+00 : f32
    %276 = vector.shape_cast %271 : vector<1x256xi1> to vector<1x256xi1>
    %277 = vector.broadcast %276 : vector<1x256xi1> to vector<32x256xi1>
    %278 = vector.broadcast %cst_104 : f32 to vector<32x256xf32>
    %279 = arith.select %277, %275, %278 : vector<32x256xi1>, vector<32x256xf32>
    %c0_105 = arith.constant 0 : index
    %c0_106 = arith.constant 0 : index
    %280 = vector.load %arg7[%c0_105, %c0_106] : memref<8x288xf32, #tpu.memory_space<vmem>>, vector<8x32xf32>
    %cst_107 = arith.constant dense<0.000000e+00> : vector<8x256xf32>
    %281 = tpu.matmul %280, %279, %cst_107 {dimension_numbers = #tpu.dot_dimension_numbers<[1], [0], [0], [1], [0, 0, 1, 1], [], []>} : vector<8x32xf32>, vector<32x256xf32>, vector<8x256xf32> -> vector<8x256xf32>
    %282 = arith.addf %274, %281 : vector<8x256xf32>
    %283 = vector.extract_strided_slice %269 {offsets = [0, 1], sizes = [32, 256], strides = [1, 1]} : vector<32x290xf32> to vector<32x256xf32>
    %c0_108 = arith.constant 0 : index
    %c32_109 = arith.constant 32 : index
    %284 = vector.load %arg7[%c0_108, %c32_109] : memref<8x288xf32, #tpu.memory_space<vmem>>, vector<8x32xf32>
    %cst_110 = arith.constant dense<0.000000e+00> : vector<8x256xf32>
    %285 = tpu.matmul %284, %283, %cst_110 {dimension_numbers = #tpu.dot_dimension_numbers<[1], [0], [0], [1], [0, 0, 1, 1], [], []>} : vector<8x32xf32>, vector<32x256xf32>, vector<8x256xf32> -> vector<8x256xf32>
    %286 = arith.addf %282, %285 : vector<8x256xf32>
    %287 = vector.extract_strided_slice %269 {offsets = [0, 2], sizes = [32, 256], strides = [1, 1]} : vector<32x290xf32> to vector<32x256xf32>
    %cst_111 = arith.constant 0.000000e+00 : f32
    %288 = vector.shape_cast %273 : vector<1x256xi1> to vector<1x256xi1>
    %289 = vector.broadcast %288 : vector<1x256xi1> to vector<32x256xi1>
    %290 = vector.broadcast %cst_111 : f32 to vector<32x256xf32>
    %291 = arith.select %289, %287, %290 : vector<32x256xi1>, vector<32x256xf32>
    %c0_112 = arith.constant 0 : index
    %c64_113 = arith.constant 64 : index
    %292 = vector.load %arg7[%c0_112, %c64_113] : memref<8x288xf32, #tpu.memory_space<vmem>>, vector<8x32xf32>
    %cst_114 = arith.constant dense<0.000000e+00> : vector<8x256xf32>
    %293 = tpu.matmul %292, %291, %cst_114 {dimension_numbers = #tpu.dot_dimension_numbers<[1], [0], [0], [1], [0, 0, 1, 1], [], []>} : vector<8x32xf32>, vector<32x256xf32>, vector<8x256xf32> -> vector<8x256xf32>
    %294 = arith.addf %286, %293 : vector<8x256xf32>
    %295 = vector.extract_strided_slice %269 {offsets = [0, 16], sizes = [32, 256], strides = [1, 1]} : vector<32x290xf32> to vector<32x256xf32>
    %cst_115 = arith.constant 0.000000e+00 : f32
    %296 = vector.shape_cast %271 : vector<1x256xi1> to vector<1x256xi1>
    %297 = vector.broadcast %296 : vector<1x256xi1> to vector<32x256xi1>
    %298 = vector.broadcast %cst_115 : f32 to vector<32x256xf32>
    %299 = arith.select %297, %295, %298 : vector<32x256xi1>, vector<32x256xf32>
    %c0_116 = arith.constant 0 : index
    %c96_117 = arith.constant 96 : index
    %300 = vector.load %arg7[%c0_116, %c96_117] : memref<8x288xf32, #tpu.memory_space<vmem>>, vector<8x32xf32>
    %cst_118 = arith.constant dense<0.000000e+00> : vector<8x256xf32>
    %301 = tpu.matmul %300, %299, %cst_118 {dimension_numbers = #tpu.dot_dimension_numbers<[1], [0], [0], [1], [0, 0, 1, 1], [], []>} : vector<8x32xf32>, vector<32x256xf32>, vector<8x256xf32> -> vector<8x256xf32>
    %302 = arith.addf %294, %301 : vector<8x256xf32>
    %303 = vector.extract_strided_slice %269 {offsets = [0, 17], sizes = [32, 256], strides = [1, 1]} : vector<32x290xf32> to vector<32x256xf32>
    %c0_119 = arith.constant 0 : index
    %c128 = arith.constant 128 : index
    %304 = vector.load %arg7[%c0_119, %c128] : memref<8x288xf32, #tpu.memory_space<vmem>>, vector<8x32xf32>
    %cst_120 = arith.constant dense<0.000000e+00> : vector<8x256xf32>
    %305 = tpu.matmul %304, %303, %cst_120 {dimension_numbers = #tpu.dot_dimension_numbers<[1], [0], [0], [1], [0, 0, 1, 1], [], []>} : vector<8x32xf32>, vector<32x256xf32>, vector<8x256xf32> -> vector<8x256xf32>
    %306 = arith.addf %302, %305 : vector<8x256xf32>
    %307 = vector.extract_strided_slice %269 {offsets = [0, 18], sizes = [32, 256], strides = [1, 1]} : vector<32x290xf32> to vector<32x256xf32>
    %cst_121 = arith.constant 0.000000e+00 : f32
    %308 = vector.shape_cast %273 : vector<1x256xi1> to vector<1x256xi1>
    %309 = vector.broadcast %308 : vector<1x256xi1> to vector<32x256xi1>
    %310 = vector.broadcast %cst_121 : f32 to vector<32x256xf32>
    %311 = arith.select %309, %307, %310 : vector<32x256xi1>, vector<32x256xf32>
    %c0_122 = arith.constant 0 : index
    %c160 = arith.constant 160 : index
    %312 = vector.load %arg7[%c0_122, %c160] : memref<8x288xf32, #tpu.memory_space<vmem>>, vector<8x32xf32>
    %cst_123 = arith.constant dense<0.000000e+00> : vector<8x256xf32>
    %313 = tpu.matmul %312, %311, %cst_123 {dimension_numbers = #tpu.dot_dimension_numbers<[1], [0], [0], [1], [0, 0, 1, 1], [], []>} : vector<8x32xf32>, vector<32x256xf32>, vector<8x256xf32> -> vector<8x256xf32>
    %314 = arith.addf %306, %313 : vector<8x256xf32>
    %315 = vector.extract_strided_slice %269 {offsets = [0, 32], sizes = [32, 256], strides = [1, 1]} : vector<32x290xf32> to vector<32x256xf32>
    %cst_124 = arith.constant 0.000000e+00 : f32
    %316 = vector.shape_cast %271 : vector<1x256xi1> to vector<1x256xi1>
    %317 = vector.broadcast %316 : vector<1x256xi1> to vector<32x256xi1>
    %318 = vector.broadcast %cst_124 : f32 to vector<32x256xf32>
    %319 = arith.select %317, %315, %318 : vector<32x256xi1>, vector<32x256xf32>
    %c0_125 = arith.constant 0 : index
    %c192 = arith.constant 192 : index
    %320 = vector.load %arg7[%c0_125, %c192] : memref<8x288xf32, #tpu.memory_space<vmem>>, vector<8x32xf32>
    %cst_126 = arith.constant dense<0.000000e+00> : vector<8x256xf32>
    %321 = tpu.matmul %320, %319, %cst_126 {dimension_numbers = #tpu.dot_dimension_numbers<[1], [0], [0], [1], [0, 0, 1, 1], [], []>} : vector<8x32xf32>, vector<32x256xf32>, vector<8x256xf32> -> vector<8x256xf32>
    %322 = arith.addf %314, %321 : vector<8x256xf32>
    %323 = vector.extract_strided_slice %269 {offsets = [0, 33], sizes = [32, 256], strides = [1, 1]} : vector<32x290xf32> to vector<32x256xf32>
    %c0_127 = arith.constant 0 : index
    %c224 = arith.constant 224 : index
    %324 = vector.load %arg7[%c0_127, %c224] : memref<8x288xf32, #tpu.memory_space<vmem>>, vector<8x32xf32>
    %cst_128 = arith.constant dense<0.000000e+00> : vector<8x256xf32>
    %325 = tpu.matmul %324, %323, %cst_128 {dimension_numbers = #tpu.dot_dimension_numbers<[1], [0], [0], [1], [0, 0, 1, 1], [], []>} : vector<8x32xf32>, vector<32x256xf32>, vector<8x256xf32> -> vector<8x256xf32>
    %326 = arith.addf %322, %325 : vector<8x256xf32>
    %327 = vector.extract_strided_slice %269 {offsets = [0, 34], sizes = [32, 256], strides = [1, 1]} : vector<32x290xf32> to vector<32x256xf32>
    %cst_129 = arith.constant 0.000000e+00 : f32
    %328 = vector.shape_cast %273 : vector<1x256xi1> to vector<1x256xi1>
    %329 = vector.broadcast %328 : vector<1x256xi1> to vector<32x256xi1>
    %330 = vector.broadcast %cst_129 : f32 to vector<32x256xf32>
    %331 = arith.select %329, %327, %330 : vector<32x256xi1>, vector<32x256xf32>
    %c0_130 = arith.constant 0 : index
    %c256 = arith.constant 256 : index
    %332 = vector.load %arg7[%c0_130, %c256] : memref<8x288xf32, #tpu.memory_space<vmem>>, vector<8x32xf32>
    %cst_131 = arith.constant dense<0.000000e+00> : vector<8x256xf32>
    %333 = tpu.matmul %332, %331, %cst_131 {dimension_numbers = #tpu.dot_dimension_numbers<[1], [0], [0], [1], [0, 0, 1, 1], [], []>} : vector<8x32xf32>, vector<32x256xf32>, vector<8x256xf32> -> vector<8x256xf32>
    %334 = arith.addf %326, %333 : vector<8x256xf32>
    %c0_132 = arith.constant 0 : index
    %c0_133 = arith.constant 0 : index
    %335 = vector.load %arg8[%c0_132, %c0_133] : memref<8x1xf32, #tpu.memory_space<vmem>>, vector<8x1xf32>
    %336 = vector.broadcast %335 : vector<8x1xf32> to vector<8x256xf32>
    %337 = arith.addf %334, %336 : vector<8x256xf32>
    %cst_134 = arith.constant 0.000000e+00 : f32
    %338 = vector.broadcast %cst_134 : f32 to vector<8x256xf32>
    %339 = arith.maximumf %337, %338 : vector<8x256xf32>
    %cst_135 = arith.constant dense<0xFF800000> : vector<256xf32>
    %340 = vector.multi_reduction <maximumf>, %339, %cst_135 [0] : vector<8x256xf32> to vector<256xf32>
    %341 = vector.shape_cast %340 : vector<256xf32> to vector<1x256xf32>
    %342 = vector.broadcast %341 : vector<1x256xf32> to vector<8x256xf32>
    %343 = arith.subf %339, %342 : vector<8x256xf32>
    %344 = math.exp %343 : vector<8x256xf32>
    %cst_136 = arith.constant dense<0.000000e+00> : vector<256xf32>
    %345 = vector.multi_reduction <add>, %344, %cst_136 [0] : vector<8x256xf32> to vector<256xf32>
    %346 = vector.shape_cast %345 : vector<256xf32> to vector<1x256xf32>
    %347 = tpu.reciprocal %346 : vector<1x256xf32> -> vector<1x256xf32>
    %348 = vector.broadcast %347 : vector<1x256xf32> to vector<8x256xf32>
    %349 = arith.mulf %344, %348 : vector<8x256xf32>
    %c0_137 = arith.constant 0 : index
    %c0_138 = arith.constant 0 : index
    %350 = vector.load %arg9[%c0_137, %c0_138] : memref<8x256xf32, #tpu.memory_space<vmem>>, vector<8x256xf32>
    tpu.vector_store %arg9[%c0_137, %c0_138], %349 {strides = array<i32>} : memref<8x256xf32, #tpu.memory_space<vmem>>, vector<8x256xf32>,
    return
  }
}

</mosaic_0001>

<bundles_post_ra>
// kernel: cnn2d_forward.1
= control target key start
LH: loop header
LB: loop body
LE: loop exit
PB: predicated region body
PF: predicated region fallthrough
CT: control target
= control target key end

     0   :  { %vm64_vm0 = vcmask 1043456   ;;  %s7102_s0 = inlined_call_operand.vmem [shape: f32[4,256], index: 0, kind: input, shape index: {}]   ;;  %s7103_s1 = inlined_call_operand.vmem [shape: f32[4,1], index: 1, kind: input, shape index: {}]   ;;  %s7104_s2 = inlined_call_operand.vmem [shape: f32[4,1], index: 2, kind: input, shape index: {}]   ;;  %s7105_s3 = inlined_call_operand.vmem [shape: f32[32,100], index: 3, kind: input, shape index: {}]   ;;  %s7106_s4 = inlined_call_operand.vmem [shape: f32[32,1], index: 4, kind: input, shape index: {}]   ;;  %s7107_s5 = inlined_call_operand.vmem [shape: f32[32,1], index: 5, kind: input, shape index: {}]   ;;  %s7108_s6 = inlined_call_operand.vmem [shape: f32[32,1], index: 6, kind: input, shape index: {}]   ;;  %s7109_s7 = inlined_call_operand.vmem [shape: f32[8,288], index: 7, kind: input, shape index: {}]   ;;  %s7110_s8 = inlined_call_operand.vmem [shape: f32[8,1], index: 8, kind: input, shape index: {}]   ;;  %s7111_s9 = inlined_call_operand.hbm [shape: f32[8,256], index: 9, kind: output, shape index: {}]  }
   0x1   :  { %v60_v0 = vld [vmem:[%s7102_s0] sm:$0xff] }
   0x2   :  { %14 = vsyncpa [#allocation3], 0  ;;  %v62_v1 = vcombine.high %v60_v0, %v60_v0  ;;  %v65_v2 = vsel %vm64_vm0, %v60_v0, 0.0  ;;  %v104_v5 = vld [vmem:[%s7103_s1] sm:$0xf]  ;;  %v5060_v6 = vmov 0   ;;  %v33_v14 = vlaneseq }
   0x3   :  { %5012 = vset.pattern.permute.xlu1 %v5060_v6  ;;  %5013 = vset.pattern.permute.xlu0 %v5060_v6  ;;  %v118_v7 = vld [vmem:[%s7104_s2] sm:$0xf]  ;;  %s5061_s16 = smov 124   ;;  %v5176_v9 = vld [vmem:[%s7105_s3 + $0x8] sm:$0xff]  ;;  %v5183_v10 = vld [vmem:[%s7105_s3 + $0x10] sm:$0xff]  ;;  %s5062_s19 = smov 120  }
   0x4   :  { %v66_v3 = vsel %vm64_vm0, %v62_v1, 0.0  ;;  %107 = vperm.xlu1 %5012, %v104_v5   ;;  %v5169_v8 = vld [vmem:[%s7105_s3] sm:$0xff]  ;;  %v5194_v11 = vld [vmem:[%s7105_s3 + $0x18] sm:$0xff]  ;;  %s5063_s22 = smov 116   ;;  %s5064_s23 = smov 112   ;;  %v77_v16 = vshrl.u32 %v33_v14, 7 }
   0x5   :  { %v67_v4 = vadd.f32 %v66_v3, %v65_v2  ;;  %s5065_s24 = smov 108   ;;  %v5066_v12 = vmov 839922192   ;;  %s5067_s25 = smov 100   ;;  %vm138_vm1 = vcmask 277504   ;;  %vm175_vm2 = vcmask 1039360  }
   0x6   :  { %v74_v13 = vunpack.c.l.s4 %v5066_v12  ;;  %s5068_s26 = smov 96   ;;  %s5069_s27 = smov 104   ;;  %vm194_vm5 = vcmask 31744   ;;  %vm415_vm8 = vcmask 1031168   ;;  %vm537_vm9 = vcmask 1022976  }
   0x7   :  { %68 = vadd.xlane.f32.xlu0 %v67_v4  ;;  %s5070_s28 = smov 34   ;;  %s5071_s29 = smov 88   ;;  %vm673_vm12 = vcmask 1014784   ;;  %vm805_vm15 = vcmask 916480  }
   0x8   :  { %121 = vperm.xlu1 %5012, %v118_v7   ;;  %v75_v15 = vunpack.c.0.s8 %v74_v13  ;;  %s5072_s30 = smov 92   ;;  %s5073_s10 = smov 84  }
   0x9   :  { %s5074_s11 = smov 80   ;;  %s5075_s12 = smov 72  }
   0xa   :  { %v78_v17 = vsub.s32 %v75_v15, %v77_v16  ;;  %s5076_s13 = smov 76   ;;  %s5077_s14 = smov 126   ;;  %v7112_v15 = vmov 0.0  }
   0xb   :  { %s5078_s0 = smov 127   ;;  %s5079_s15 = smov 125   ;;  %273 = vmatprep.mubr.f32.mxu0 %v7112_v15  ;;  %291 = vmatprep.mubr.f32.mxu1 %v7112_v15 }
   0xc   :  { %186 = vrot.lane.b32.xlu1 %v5169_v8, %s5061_s16  ;;  %s5080_s17 = smov 110   ;;  %s5082_s1 = smov 94  }
   0xd   :  { %s5083_s18 = smov 111   ;;  %s5084_s2 = smov 109  }
   0xe   :  { %s5086_s20 = smov 93   ;;  %s5087_s21 = smov 68  }
  0x10   :  { %188 = vrot.lane.b32.xlu1 %v5176_v9, %s5061_s16 }
  0x14   :  { %190 = vrot.lane.b32.xlu1 %v5183_v10, %s5061_s16 }
  0x18   :  { %401 = vrot.lane.b32.xlu1 %v5169_v8, %s5062_s19 }
  0x1c   :  { %405 = vrot.lane.b32.xlu1 %v5183_v10, %s5062_s19 }
  0x20   :  { %407 = vrot.lane.b32.xlu1 %v5194_v11, %s5062_s19 }
  0x24   :  { %544 = vrot.lane.b32.xlu1 %v5169_v8, %s5063_s22 }
  0x28   :  { %546 = vrot.lane.b32.xlu1 %v5176_v9, %s5063_s22 }
  0x2c   :  { %548 = vrot.lane.b32.xlu1 %v5183_v10, %s5063_s22 }
  0x30   :  { %550 = vrot.lane.b32.xlu1 %v5194_v11, %s5063_s22  ;;  %s5088_s22 = smov 79  }
  0x34   :  { %686 = vrot.lane.b32.xlu1 %v5194_v11, %s5064_s23 }
  0x38   :  { %812 = vrot.lane.b32.xlu1 %v5169_v8, %s5065_s24 }
  0x3c   :  { %814 = vrot.lane.b32.xlu1 %v5176_v9, %s5065_s24 }
  0x40   :  { %816 = vrot.lane.b32.xlu1 %v5183_v10, %s5065_s24 }
  0x44   :  { %818 = vrot.lane.b32.xlu1 %v5194_v11, %s5065_s24 }
  0x48   :  { %1063 = vrot.lane.b32.xlu1 %v5169_v8, %s5067_s25 }
  0x4c   :  { %1065 = vrot.lane.b32.xlu1 %v5176_v9, %s5067_s25 }
  0x50   :  { %1067 = vrot.lane.b32.xlu1 %v5183_v10, %s5067_s25 }
  0x54   :  { %1069 = vrot.lane.b32.xlu1 %v5194_v11, %s5067_s25  ;;  %s5089_s25 = smov 64  }
  0x58   :  { %1208 = vrot.lane.b32.xlu1 %v5194_v11, %s5068_s26 }
  0x7f   :  { %v108_v30 = vpop.permute.xlu1 %107 }
  0x80   :  { %v115_v35 = vrot.slane %v108_v30, %v78_v17 }
  0x83   :  { %v122_v33 = vpop.permute.xlu1 %121 }
  0x84   :  { %v129_v37 = vrot.slane %v122_v33, %v78_v17 }
  0x87   :  { %v5241_v40 = vpop.permute.xlu1 %186 }
  0x8b   :  { %v5247_v41 = vpop.permute.xlu1 %188 }
  0x8f   :  { %v5254_v42 = vpop.permute.xlu1 %190 }
  0x90   :  { %v69_v18 = vpop.xlane.xlu0 %68 }
  0x91   :  { %v71_v19 = vmul.f32 0.00390625, %v69_v18 }
  0x93   :  { %v79_v20 = vrot.slane %v71_v19, %v78_v17  ;;  %v5261_v43 = vpop.permute.xlu1 %401 }
  0x95   :  { %v81_v21 = vsub.f32 %v60_v0, %v79_v20 }
  0x97   :  { %v82_v22 = vmul.f32 %v81_v21, %v81_v21  ;;  %v5267_v44 = vpop.permute.xlu1 %405 }
  0x99   :  { %v84_v23 = vcombine.high %v82_v22, %v82_v22  ;;  %v86_v24 = vsel %vm64_vm0, %v82_v22, 0.0 }
  0x9b   :  { %v87_v25 = vsel %vm64_vm0, %v84_v23, 0.0  ;;  %v5274_v45 = vpop.permute.xlu1 %407 }
  0x9c   :  { %v88_v26 = vadd.f32 %v87_v25, %v86_v24 }
  0x9e   :  { %89 = vadd.xlane.f32.xlu0 %v88_v26 }
  0x9f   :  { %v5279_v46 = vpop.permute.xlu1 %544 }
  0xa3   :  { %v5285_v48 = vpop.permute.xlu1 %546 }
  0xa7   :  { %v5289_v50 = vpop.permute.xlu1 %548 }
  0xab   :  { %v5293_v52 = vpop.permute.xlu1 %550 }
  0xaf   :  { %v5297_v54 = vpop.permute.xlu1 %686 }
  0xb3   :  { %v5301_v56 = vpop.permute.xlu1 %812 }
  0xb4   :  { %192 = vrot.lane.b32.xlu0 %v5194_v11, %s5061_s16 }
  0xb7   :  { %v5305_v58 = vpop.permute.xlu1 %814 }
  0xb8   :  { %403 = vrot.lane.b32.xlu0 %v5176_v9, %s5062_s19  ;;  %s5085_s19 = smov 95  }
  0xbb   :  { %v5309_v60 = vpop.permute.xlu1 %816 }
  0xbc   :  { %680 = vrot.lane.b32.xlu0 %v5169_v8, %s5064_s23 }
  0xbf   :  { %v5313_v62 = vpop.permute.xlu1 %818 }
  0xc0   :  { %682 = vrot.lane.b32.xlu0 %v5176_v9, %s5064_s23 }
  0xc3   :  { %v5317_v0 = vpop.permute.xlu1 %1063 }
  0xc4   :  { %684 = vrot.lane.b32.xlu0 %v5183_v10, %s5064_s23 }
  0xc7   :  { %v5321_v2 = vpop.permute.xlu1 %1065 }
  0xc8   :  { %944 = vrot.lane.b32.xlu0 %v5169_v8, %s5069_s27 }
  0xcb   :  { %v5325_v4 = vpop.permute.xlu1 %1067 }
  0xcc   :  { %946 = vrot.lane.b32.xlu0 %v5176_v9, %s5069_s27 }
  0xcf   :  { %v5329_v6 = vpop.permute.xlu1 %1069 }
  0xd0   :  { %948 = vrot.lane.b32.xlu0 %v5183_v10, %s5069_s27 }
  0xd3   :  { %v5338_v13 = vpop.permute.xlu1 %1208 }
  0xd4   :  { %950 = vrot.lane.b32.xlu0 %v5194_v11, %s5069_s27  ;;  %s5091_s27 = smov 60  }
  0xd8   :  { %1202 = vrot.lane.b32.xlu0 %v5169_v8, %s5068_s26 }
  0xdc   :  { %1204 = vrot.lane.b32.xlu0 %v5176_v9, %s5068_s26 }
  0xe0   :  { %1206 = vrot.lane.b32.xlu0 %v5183_v10, %s5068_s26 }
 0x127   :  { %v90_v27 = vpop.xlane.xlu0 %89 }
 0x128   :  { %v91_v28 = vmul.f32 0.00390625, %v90_v27 }
 0x12a   :  { %v92_v29 = vadd.f32 1e-05, %v91_v28 }
 0x12b   :  { %v5281_v47 = vpop.permute.xlu0 %192 }
 0x12c   :  { %5015 = vrsqrt.f32 %v92_v29 }
 0x12f   :  { %v5287_v49 = vpop.permute.xlu0 %403 }
 0x133   :  { %v5291_v51 = vpop.permute.xlu0 %680 }
 0x137   :  { %v5295_v53 = vpop.permute.xlu0 %682 }
 0x139   :  { %v5016_v31 = vpop.eup %5015 }
 0x13a   :  { %v101_v32 = vrot.slane %v5016_v31, %v78_v17 }
 0x13b   :  { %v5299_v55 = vpop.permute.xlu0 %684 }
 0x13c   :  { %v103_v34 = vmul.f32 %v101_v32, %v81_v21 }
 0x13e   :  { %v117_v36 = vmul.f32 %v115_v35, %v103_v34 }
 0x13f   :  { %v5303_v57 = vpop.permute.xlu0 %944 }
 0x140   :  { %v131_v38 = vadd.f32 %v129_v37, %v117_v36 }
 0x142   :  { %134 = vrot.lane.b32.xlu0 %v131_v38, %s5070_s28  ;;  %v133_v39 = vcombine.high %v131_v38, %v131_v38 }
 0x143   :  { %v5307_v59 = vpop.permute.xlu0 %946 }
 0x144   :  { %136 = vrot.lane.b32.xlu1 %v133_v39, %s5070_s28  ;;  %s5092_s28 = smov 77  }
 0x146   :  { %1466 = vrot.lane.b32.xlu0 %v5169_v8, %s5071_s29 }
 0x147   :  { %v5311_v61 = vpop.permute.xlu0 %948 }
 0x148   :  { %1334 = vrot.lane.b32.xlu1 %v5169_v8, %s5072_s30 }
 0x14a   :  { %1468 = vrot.lane.b32.xlu0 %v5176_v9, %s5071_s29 }
 0x14b   :  { %v5315_v63 = vpop.permute.xlu0 %950 }
 0x14c   :  { %1336 = vrot.lane.b32.xlu1 %v5176_v9, %s5072_s30 }
 0x14e   :  { %1470 = vrot.lane.b32.xlu0 %v5183_v10, %s5071_s29 }
 0x14f   :  { %v5319_v1 = vpop.permute.xlu0 %1202 }
 0x150   :  { %1338 = vrot.lane.b32.xlu1 %v5183_v10, %s5072_s30 }
 0x152   :  { %1598 = vrot.lane.b32.xlu0 %v5169_v8, %s5073_s10 }
 0x153   :  { %v5323_v3 = vpop.permute.xlu0 %1204 }
 0x154   :  { %1340 = vrot.lane.b32.xlu1 %v5194_v11, %s5072_s30 }
 0x156   :  { %1717 = vrot.lane.b32.xlu0 %v5169_v8, %s5074_s11 }
 0x157   :  { %v5327_v5 = vpop.permute.xlu0 %1206 }
 0x158   :  { %1472 = vrot.lane.b32.xlu1 %v5194_v11, %s5071_s29  ;;  %s5093_s29 = smov 56  }
 0x15a   :  { %1719 = vrot.lane.b32.xlu0 %v5176_v9, %s5074_s11 }
 0x15c   :  { %1600 = vrot.lane.b32.xlu1 %v5176_v9, %s5073_s10 }
 0x15e   :  { %1721 = vrot.lane.b32.xlu0 %v5183_v10, %s5074_s11 }
 0x160   :  { %1602 = vrot.lane.b32.xlu1 %v5183_v10, %s5073_s10 }
 0x162   :  { %1988 = vrot.lane.b32.xlu0 %v5169_v8, %s5075_s12 }
 0x164   :  { %1604 = vrot.lane.b32.xlu1 %v5194_v11, %s5073_s10  ;;  %s5095_s10 = smov 48  }
 0x168   :  { %1723 = vrot.lane.b32.xlu1 %v5194_v11, %s5074_s11 }
 0x16c   :  { %1856 = vrot.lane.b32.xlu1 %v5169_v8, %s5076_s13 }
 0x1b4   :  { %v135_v7 = vpop.permute.xlu0 %134 }
 0x1b5   :  { %v5332_v12 = vsel %vm138_vm1, 0.0, %v135_v7 }
 0x1b6   :  { %409 = vrot.lane.b32.xlu0 %v5332_v12, %s5077_s14  ;;  %169 = vrot.lane.b32.xlu1 %v5332_v12, %s5078_s0  ;;  %v137_v16 = vpop.permute.xlu1 %136 }
 0x1b7   :  { %v5351_v17 = vsel %vm138_vm1, %v135_v7, %v137_v16  ;;  %v5358_v18 = vsel %vm138_vm1, %v137_v16, 0.0  ;;  %v34_v16 = vand.u32 127, %v33_v14  ;;  %vm937_vm1 = vcmask 908288  }
 0x1b8   :  { %v5415_v22 = vpop.permute.xlu0 %1466 }
 0x1b9   :  { %v5515_v14 = vand.u32 15, %v34_v16 }
 0x1ba   :  { %531 = vrot.lane.b32.xlu0 %v5332_v12, %s5079_s15  ;;  %1071 = vrot.lane.b32.xlu1 %v5332_v12, %s5080_s17  ;;  %v5398_v19 = vpop.permute.xlu1 %1334 }
 0x1bb   :  { %7138 = vst [vmem:[#allocation18_spill] sm:$0xff] %v5515_v14  ;;  %vm147_vm4 = vcmp.ge.s32.totalorder %v5515_v14, 1  ;;  %vm145_vm7 = vcmp.ge.s32.totalorder %v5515_v14, 2  ;;  %vm149_vm10 = vcmp.lt.s32.totalorder %v5515_v14, 15  ;;  %vm151_vm13 = vcmp.lt.s32.totalorder %v5515_v14, 14 }
 0x1bc   :  { %v5426_v24 = vpop.permute.xlu0 %1468 }
 0x1be   :  { %667 = vrot.lane.b32.xlu0 %v5332_v12, %s5061_s16  ;;  %1725 = vrot.lane.b32.xlu1 %v5332_v12, %s5082_s1  ;;  %v5408_v20 = vpop.permute.xlu1 %1336 }
 0x1c0   :  { %v5434_v26 = vpop.permute.xlu0 %1470 }
 0x1c2   :  { %799 = vrot.lane.b32.xlu0 %v5332_v12, %s5064_s23  ;;  %171 = vrot.lane.b32.xlu1 %v5351_v17, %s5078_s0  ;;  %v5413_v21 = vpop.permute.xlu1 %1338 }
 0x1c4   :  { %v5446_v28 = vpop.permute.xlu0 %1598 }
 0x1c5   :  { %7127 = vst [vmem:[#allocation7_spill] sm:$0xff] %v5446_v28 }
 0x1c6   :  { %931 = vrot.lane.b32.xlu0 %v5332_v12, %s5083_s18  ;;  %173 = vrot.lane.b32.xlu1 %v5358_v18, %s5078_s0  ;;  %v5424_v23 = vpop.permute.xlu1 %1340 }
 0x1c8   :  { %v5454_v30 = vpop.permute.xlu0 %1717 }
 0x1c9   :  { %7129 = vst [vmem:[#allocation9_spill] sm:$0xff] %v5454_v30 }
 0x1ca   :  { %1189 = vrot.lane.b32.xlu0 %v5332_v12, %s5084_s2  ;;  %1858 = vrot.lane.b32.xlu1 %v5176_v9, %s5076_s13  ;;  %v5432_v25 = vpop.permute.xlu1 %1472 }
 0x1cb   :  { %7125 = vst [vmem:[#allocation5_spill] sm:$0xff] %v5432_v25 }
 0x1cc   :  { %v5466_v32 = vpop.permute.xlu0 %1719 }
 0x1cd   :  { %7131 = vst [vmem:[#allocation11_spill] sm:$0xff] %v5466_v32 }
 0x1ce   :  { %1321 = vrot.lane.b32.xlu0 %v5332_v12, %s5065_s24  ;;  %1860 = vrot.lane.b32.xlu1 %v5183_v10, %s5076_s13  ;;  %v5444_v27 = vpop.permute.xlu1 %1600 }
 0x1cf   :  { %7126 = vst [vmem:[#allocation6_spill] sm:$0xff] %v5444_v27 }
 0x1d0   :  { %v5474_v34 = vpop.permute.xlu0 %1721 }
 0x1d1   :  { %7133 = vst [vmem:[#allocation13_spill] sm:$0xff] %v5474_v34 }
 0x1d2   :  { %1453 = vrot.lane.b32.xlu0 %v5332_v12, %s5068_s26  ;;  %413 = vrot.lane.b32.xlu1 %v5358_v18, %s5077_s14  ;;  %v5452_v29 = vpop.permute.xlu1 %1602 }
 0x1d3   :  { %7128 = vst [vmem:[#allocation8_spill] sm:$0xff] %v5452_v29 }
 0x1d4   :  { %v5485_v36 = vpop.permute.xlu0 %1988 }
 0x1d5   :  { %7135 = vst [vmem:[#allocation15_spill] sm:$0xff] %v5485_v36 }
 0x1d6   :  { %1585 = vrot.lane.b32.xlu0 %v5332_v12, %s5085_s19  ;;  %1862 = vrot.lane.b32.xlu1 %v5194_v11, %s5076_s13  ;;  %v5464_v31 = vpop.permute.xlu1 %1604 }
 0x1d7   :  { %7130 = vst [vmem:[#allocation10_spill] sm:$0xff] %v5464_v31 }
 0x1da   :  { %1843 = vrot.lane.b32.xlu0 %v5332_v12, %s5086_s20  ;;  %1994 = vrot.lane.b32.xlu1 %v5194_v11, %s5075_s12  ;;  %v5472_v33 = vpop.permute.xlu1 %1723 }
 0x1db   :  { %7132 = vst [vmem:[#allocation12_spill] sm:$0xff] %v5472_v33 }
 0x1de   :  { %1975 = vrot.lane.b32.xlu0 %v5332_v12, %s5072_s30  ;;  %535 = vrot.lane.b32.xlu1 %v5358_v18, %s5079_s15  ;;  %v5483_v35 = vpop.permute.xlu1 %1856 }
 0x1df   :  { %7134 = vst [vmem:[#allocation14_spill] sm:$0xff] %v5483_v35  ;;  %v35_v35 = vadd.s32 128, %v34_v16 }
 0x1e1   :  { %v5513_v31 = vand.u32 15, %v35_v35 }
 0x1e2   :  { %1990 = vrot.lane.b32.xlu0 %v5176_v9, %s5075_s12  ;;  %671 = vrot.lane.b32.xlu1 %v5358_v18, %s5061_s16 }
 0x1e3   :  { %7137 = vst [vmem:[#allocation17_spill] sm:$0xff] %v5513_v31  ;;  %vm148_vm3 = vcmp.ge.s32.totalorder %v5513_v31, 1  ;;  %vm146_vm6 = vcmp.ge.s32.totalorder %v5513_v31, 2  ;;  %vm150_vm11 = vcmp.lt.s32.totalorder %v5513_v31, 15  ;;  %vm152_vm14 = vcmp.lt.s32.totalorder %v5513_v31, 14 }
 0x1e6   :  { %1992 = vrot.lane.b32.xlu0 %v5183_v10, %s5075_s12  ;;  %2120 = vrot.lane.b32.xlu1 %v5169_v8, %s5087_s21  ;;  %s5098_s12 = smov 44  }
 0x1ea   :  { %411 = vrot.lane.b32.xlu0 %v5351_v17, %s5077_s14  ;;  %2122 = vrot.lane.b32.xlu1 %v5176_v9, %s5087_s21 }
 0x1ee   :  { %2107 = vrot.lane.b32.xlu0 %v5332_v12, %s5074_s11  ;;  %803 = vrot.lane.b32.xlu1 %v5358_v18, %s5064_s23 }
 0x1f2   :  { %2239 = vrot.lane.b32.xlu0 %v5332_v12, %s5088_s22  ;;  %935 = vrot.lane.b32.xlu1 %v5358_v18, %s5083_s18 }
 0x1f6   :  { %533 = vrot.lane.b32.xlu0 %v5351_v17, %s5079_s15  ;;  %2124 = vrot.lane.b32.xlu1 %v5183_v10, %s5087_s21  ;;  %s5099_s15 = smov 40  }
 0x1fa   :  { %669 = vrot.lane.b32.xlu0 %v5351_v17, %s5061_s16  ;;  %2126 = vrot.lane.b32.xlu1 %v5194_v11, %s5087_s21  ;;  %s5090_s16 = smov 78  }
 0x1fe   :  { %2252 = vrot.lane.b32.xlu0 %v5169_v8, %s5089_s25  ;;  %1075 = vrot.lane.b32.xlu1 %v5358_v18, %s5080_s17 }
 0x202   :  { %2254 = vrot.lane.b32.xlu0 %v5176_v9, %s5089_s25  ;;  %1193 = vrot.lane.b32.xlu1 %v5358_v18, %s5084_s2 }
 0x206   :  { %801 = vrot.lane.b32.xlu0 %v5351_v17, %s5064_s23  ;;  %2379 = vrot.lane.b32.xlu1 %v5332_v12, %s5090_s16 }
 0x20a   :  { %933 = vrot.lane.b32.xlu0 %v5351_v17, %s5083_s18  ;;  %2371 = vrot.lane.b32.xlu1 %v5169_v8, %s5091_s27 }
 0x20e   :  { %2256 = vrot.lane.b32.xlu0 %v5183_v10, %s5089_s25  ;;  %1325 = vrot.lane.b32.xlu1 %v5358_v18, %s5065_s24 }
 0x212   :  { %2258 = vrot.lane.b32.xlu0 %v5194_v11, %s5089_s25  ;;  %1457 = vrot.lane.b32.xlu1 %v5358_v18, %s5068_s26 }
 0x216   :  { %1073 = vrot.lane.b32.xlu0 %v5351_v17, %s5080_s17  ;;  %2373 = vrot.lane.b32.xlu1 %v5176_v9, %s5091_s27 }
 0x21a   :  { %1191 = vrot.lane.b32.xlu0 %v5351_v17, %s5084_s2  ;;  %2375 = vrot.lane.b32.xlu1 %v5183_v10, %s5091_s27  ;;  %s5101_s2 = smov 36  }
 0x21e   :  { %2497 = vrot.lane.b32.xlu0 %v5332_v12, %s5092_s28  ;;  %1589 = vrot.lane.b32.xlu1 %v5358_v18, %s5085_s19 }
 0x222   :  { %2510 = vrot.lane.b32.xlu0 %v5169_v8, %s5093_s29  ;;  %1729 = vrot.lane.b32.xlu1 %v5358_v18, %s5082_s1 }
 0x226   :  { %1323 = vrot.lane.b32.xlu0 %v5351_v17, %s5065_s24  ;;  %2377 = vrot.lane.b32.xlu1 %v5194_v11, %s5091_s27  ;;  %s5094_s24 = smov 52  }
 0x228   :  { %v170_v37 = vpop.permute.xlu1 %169  ;;  %v5491_v38 = vpop.permute.xlu0 %409 }
 0x22a   :  { %1455 = vrot.lane.b32.xlu0 %v5351_v17, %s5068_s26  ;;  %2516 = vrot.lane.b32.xlu1 %v5194_v11, %s5093_s29 }
 0x22c   :  { %v5496_v39 = vpop.permute.xlu1 %1071  ;;  %v5498_v7 = vpop.permute.xlu0 %531 }
 0x22e   :  { %2512 = vrot.lane.b32.xlu0 %v5176_v9, %s5093_s29  ;;  %1847 = vrot.lane.b32.xlu1 %v5358_v18, %s5086_s20 }
 0x230   :  { %v5504_v15 = vpop.permute.xlu1 %1725  ;;  %v5506_v36 = vpop.permute.xlu0 %667 }
 0x231   :  { %7136 = vst [vmem:[#allocation16_spill] sm:$0xff] %v5504_v15 }
 0x232   :  { %2514 = vrot.lane.b32.xlu0 %v5183_v10, %s5093_s29  ;;  %1979 = vrot.lane.b32.xlu1 %v5358_v18, %s5072_s30 }
 0x234   :  { %v172_v33 = vpop.permute.xlu1 %171  ;;  %v5511_v34 = vpop.permute.xlu0 %799 }
 0x235   :  { %v176_v35 = vsel %vm175_vm2, %v170_v37, %v172_v33 }
 0x236   :  { %1587 = vrot.lane.b32.xlu0 %v5351_v17, %s5085_s19  ;;  %2642 = vrot.lane.b32.xlu1 %v5169_v8, %s5094_s24  ;;  %v180_v37 = vsel %vm147_vm4, %v176_v35, 0.0  ;;  %v157_v35 = vsel %vm145_vm7, %v5332_v12, 0.0 }
 0x238   :  { %v174_v32 = vpop.permute.xlu1 %173  ;;  %v5523_v29 = vpop.permute.xlu0 %931 }
 0x239   :  { %v177_v30 = vsel %vm175_vm2, %v172_v33, %v174_v32 }
 0x23a   :  { %1727 = vrot.lane.b32.xlu0 %v5351_v17, %s5082_s1  ;;  %2644 = vrot.lane.b32.xlu1 %v5176_v9, %s5094_s24  ;;  %v181_v16 = vsel %vm148_vm3, %v177_v30, 0.0  ;;  %v158_v30 = vsel %vm146_vm6, %v5351_v17, 0.0 }
 0x23b   :  { %4758 = vmatprep.subr.msk.mxu0 %vm64_vm0, %v181_v16  ;;  %4965 = vmatprep.subr.msk.mxu1 %vm64_vm0, %v181_v16  ;;  %v7141_v16 = vmov 0.0  }
 0x23c   :  { %v5539_v32 = vpop.permute.xlu1 %1858  ;;  %v5541_v33 = vpop.permute.xlu0 %1189  ;;  %4759 = vmatpush1.msk.msra.mxu0 %vm64_vm0, %v180_v37  ;;  %4966 = vmatpush1.msk.msra.mxu1 %vm64_vm0, %v180_v37 }
 0x23d   :  { %7139 = vst [vmem:[#allocation19_spill] sm:$0xff] %v5539_v32  ;;  %4760 = vmatmul.mubr.msk.f32.vlgmr.msra.gmra.mxu0 %vm194_vm5, %v5241_v40  ;;  %4763 = vmatmul.mubr.msk.f32.vlgmr.msra.gmra.mxu1 %vm194_vm5, %v5281_v47 }
 0x23e   :  { %4764 = vmatprep.subr.msk.mxu1 %vm64_vm0, %v158_v30  ;;  %2629 = vrot.lane.b32.xlu0 %v5332_v12, %s5076_s13 }
 0x23f   :  { %2111 = vrot.lane.b32.xlu1 %v5358_v18, %s5074_s11  ;;  %4765 = vmatpush1.msk.msra.mxu1 %vm64_vm0, %v157_v35 }
 0x240   :  { %v5561_v40 = vpop.permute.xlu1 %1860  ;;  %v5563_v47 = vpop.permute.xlu0 %1321  ;;  %279 = vmatprep.mubr.f32.mxu0 %v7141_v16  ;;  %376 = vmatprep.mubr.f32.mxu1 %v7141_v16 }
 0x241   :  { %7140 = vst [vmem:[#allocation20_spill] sm:$0xff] %v5561_v40  ;;  %4761 = vmatmul.mubr.msk.f32.gmra.mxu0 %vm194_vm5, %v5247_v41  ;;  %4766 = vmatmul.mubr.msk.f32.vlgmr.msra.gmra.mxu1 %vm194_vm5, %v5169_v8 }
 0x242   :  { %2761 = vrot.lane.b32.xlu0 %v5332_v12, %s5089_s25  ;;  %285 = vmatprep.mubr.f32.mxu0 %v7141_v16 }
 0x243   :  { %2243 = vrot.lane.b32.xlu1 %v5358_v18, %s5088_s22  ;;  %382 = vmatprep.mubr.f32.mxu1 %v7141_v16 }
 0x244   :  { %v414_v37 = vpop.permute.xlu1 %413  ;;  %v5577_v30 = vpop.permute.xlu0 %1453 }
 0x245   :  { %4762 = vmatmul.mubr.msk.f32.gmra.mxu0 %vm194_vm5, %v5254_v42  ;;  %4767 = vmatmul.mubr.msk.f32.gmra.mxu1 %vm194_vm5, %v5176_v9 }
 0x246   :  { %1845 = vrot.lane.b32.xlu0 %v5351_v17, %s5086_s20  ;;  %388 = vmatprep.mubr.f32.mxu1 %v7141_v16 }
 0x247   :  { %2646 = vrot.lane.b32.xlu1 %v5183_v10, %s5094_s24  ;;  %494 = vmatprep.mubr.f32.mxu0 %v7141_v16 }
 0x248   :  { %v5589_v41 = vpop.permute.xlu1 %1862  ;;  %v5591_v35 = vpop.permute.xlu0 %1585 }
 0x249   :  { %7142 = vst [vmem:[#allocation21_spill] sm:$0xff] %v5589_v41  ;;  %4768 = vmatmul.mubr.msk.f32.gmra.mxu1 %vm194_vm5, %v5183_v10 }
 0x24a   :  { %1977 = vrot.lane.b32.xlu0 %v5351_v17, %s5072_s30  ;;  %394 = vmatprep.mubr.f32.mxu1 %v7141_v16  ;;  %s5096_s30 = smov 62  }
 0x24b   :  { %2648 = vrot.lane.b32.xlu1 %v5194_v11, %s5094_s24 }
 0x24c   :  { %v5600_v42 = vpop.permute.xlu1 %1994  ;;  %v5602_v40 = vpop.permute.xlu0 %1843 }
 0x24d   :  { %7143 = vst [vmem:[#allocation22_spill] sm:$0xff] %v5600_v42  ;;  %7144 = vst [vmem:[#allocation23_spill] sm:$0xff] %v5602_v40  ;;  %4769 = vmatmul.mubr.msk.f32.gmra.mxu1 %vm194_vm5, %v5194_v11 }
 0x24e   :  { %2774 = vrot.lane.b32.xlu0 %v5169_v8, %s5095_s10  ;;  %630 = vmatprep.mubr.f32.mxu1 %v7141_v16 }
 0x24f   :  { %2383 = vrot.lane.b32.xlu1 %v5358_v18, %s5090_s16 }
 0x250   :  { %v536_v41 = vpop.permute.xlu1 %535  ;;  %v5610_v32 = vpop.permute.xlu0 %1975 }
 0x251   :  { %7145 = vst [vmem:[#allocation24_spill] sm:$0xff] %v5610_v32 }
 0x252   :  { %2776 = vrot.lane.b32.xlu0 %v5176_v9, %s5095_s10 }
 0x253   :  { %2501 = vrot.lane.b32.xlu1 %v5358_v18, %s5092_s28 }
 0x254   :  { %v672_v42 = vpop.permute.xlu1 %671  ;;  %v5615_v40 = vpop.permute.xlu0 %1990 }
 0x255   :  { %7146 = vst [vmem:[#allocation25_spill] sm:$0xff] %v5615_v40 }
 0x256   :  { %2109 = vrot.lane.b32.xlu0 %v5351_v17, %s5074_s11  ;;  %s5097_s11 = smov 63  }
 0x257   :  { %2780 = vrot.lane.b32.xlu1 %v5194_v11, %s5095_s10 }
 0x258   :  { %v5620_v27 = vpop.permute.xlu1 %2120  ;;  %v5622_v28 = vpop.permute.xlu0 %1992 }
 0x259   :  { %7147 = vst [vmem:[#allocation26_spill] sm:$0xff] %v5620_v27  ;;  %7148 = vst [vmem:[#allocation27_spill] sm:$0xff] %v5622_v28 }
 0x25a   :  { %2241 = vrot.lane.b32.xlu0 %v5351_v17, %s5088_s22 }
 0x25b   :  { %3033 = vrot.lane.b32.xlu1 %v5332_v12, %s5096_s30 }
 0x25c   :  { %v5628_v32 = vpop.permute.xlu1 %2122  ;;  %v412_v40 = vpop.permute.xlu0 %411 }
 0x25d   :  { %7149 = vst [vmem:[#allocation28_spill] sm:$0xff] %v5628_v32  ;;  %v416_v25 = vsel %vm415_vm8, %v5491_v38, %v412_v40  ;;  %v417_v15 = vsel %vm415_vm8, %v412_v40, %v414_v37 }
 0x25e   :  { %2778 = vrot.lane.b32.xlu0 %v5183_v10, %s5095_s10  ;;  %4770 = vmatprep.subr.msk.mxu0 %vm64_vm0, %v417_v15  ;;  %s5102_s10 = smov 32  }
 0x25f   :  { %2633 = vrot.lane.b32.xlu1 %v5358_v18, %s5076_s13  ;;  %4771 = vmatpush1.msk.msra.mxu0 %vm64_vm0, %v416_v25 }
 0x260   :  { %v5638_v27 = vpop.permute.xlu1 %803  ;;  %v5640_v28 = vpop.permute.xlu0 %2107  ;;  %4772 = vmatmul.mubr.msk.f32.vlgmr.msra.gmra.mxu0 %vm194_vm5, %v5261_v43 }
 0x261   :  { %500 = vmatprep.mubr.f32.mxu0 %v7141_v16 }
 0x262   :  { %2893 = vrot.lane.b32.xlu0 %v5332_v12, %s5097_s11 }
 0x263   :  { %2765 = vrot.lane.b32.xlu1 %v5358_v18, %s5089_s25 }
 0x264   :  { %v5649_v15 = vpop.permute.xlu1 %935  ;;  %v5651_v38 = vpop.permute.xlu0 %2239  ;;  %4773 = vmatmul.mubr.msk.f32.gmra.mxu0 %vm194_vm5, %v5287_v49 }
 0x265   :  { %506 = vmatprep.mubr.f32.mxu0 %v7141_v16 }
 0x266   :  { %2381 = vrot.lane.b32.xlu0 %v5351_v17, %s5090_s16 }
 0x267   :  { %2908 = vrot.lane.b32.xlu1 %v5176_v9, %s5098_s12 }
 0x268   :  { %v5662_v43 = vpop.permute.xlu1 %2124  ;;  %v534_v25 = vpop.permute.xlu0 %533  ;;  %4774 = vmatmul.mubr.msk.f32.gmra.mxu0 %vm194_vm5, %v5267_v44 }
 0x269   :  { %v538_v49 = vsel %vm537_vm9, %v5498_v7, %v534_v25  ;;  %v539_v40 = vsel %vm537_vm9, %v534_v25, %v536_v41  ;;  %512 = vmatprep.mubr.f32.mxu0 %v7141_v16  ;;  %vm7114_vm9 = vcmask 900096  }
 0x26a   :  { %v542_v37 = vsel %vm149_vm10, %v538_v49, 0.0  ;;  %2499 = vrot.lane.b32.xlu0 %v5351_v17, %s5092_s28  ;;  %v543_v32 = vsel %vm150_vm11, %v539_v40, 0.0 }
 0x26b   :  { %2910 = vrot.lane.b32.xlu1 %v5183_v10, %s5098_s12  ;;  %4776 = vmatprep.subr.msk.mxu1 %vm64_vm0, %v543_v32 }
 0x26c   :  { %v5679_v44 = vpop.permute.xlu1 %2126  ;;  %v670_v7 = vpop.permute.xlu0 %669  ;;  %4775 = vmatmul.mubr.msk.f32.gmra.mxu0 %vm194_vm5, %v5274_v45  ;;  %4777 = vmatpush1.msk.msra.mxu1 %vm64_vm0, %v542_v37 }
 0x26d   :  { %v674_v41 = vsel %vm673_vm12, %v5506_v36, %v670_v7  ;;  %v675_v25 = vsel %vm673_vm12, %v670_v7, %v672_v42  ;;  %4778 = vmatmul.mubr.msk.f32.vlgmr.msra.gmra.mxu1 %vm194_vm5, %v5279_v46  ;;  %766 = vmatprep.mubr.f32.mxu0 %v7141_v16  ;;  %vm1195_vm12 = vcmask 891904  }
 0x26e   :  { %v678_v32 = vsel %vm151_vm13, %v674_v41, 0.0  ;;  %2906 = vrot.lane.b32.xlu0 %v5169_v8, %s5098_s12  ;;  %v679_v49 = vsel %vm152_vm14, %v675_v25, 0.0  ;;  %636 = vmatprep.mubr.f32.mxu1 %v7141_v16 }
 0x26f   :  { %2897 = vrot.lane.b32.xlu1 %v5358_v18, %s5097_s11  ;;  %4782 = vmatprep.subr.msk.mxu0 %vm64_vm0, %v679_v49 }
 0x270   :  { %v5698_v45 = vpop.permute.xlu1 %1075  ;;  %v5700_v46 = vpop.permute.xlu0 %2252  ;;  %4783 = vmatpush1.msk.msra.mxu0 %vm64_vm0, %v678_v32 }
 0x271   :  { %4779 = vmatmul.mubr.msk.f32.gmra.mxu1 %vm194_vm5, %v5285_v48  ;;  %4784 = vmatmul.mubr.msk.f32.vlgmr.msra.gmra.mxu0 %vm194_vm5, %v5291_v51 }
 0x272   :  { %3025 = vrot.lane.b32.xlu0 %v5169_v8, %s5099_s15  ;;  %642 = vmatprep.mubr.f32.mxu1 %v7141_v16 }
 0x273   :  { %3037 = vrot.lane.b32.xlu1 %v5358_v18, %s5096_s30  ;;  %772 = vmatprep.mubr.f32.mxu0 %v7141_v16 }
 0x274   :  { %v5713_v36 = vpop.permute.xlu1 %1193  ;;  %v5715_v42 = vpop.permute.xlu0 %2254 }
 0x275   :  { %4780 = vmatmul.mubr.msk.f32.gmra.mxu1 %vm194_vm5, %v5289_v50  ;;  %4785 = vmatmul.mubr.msk.f32.gmra.mxu0 %vm194_vm5, %v5295_v53 }
 0x276   :  { %2631 = vrot.lane.b32.xlu0 %v5351_v17, %s5076_s13  ;;  %648 = vmatprep.mubr.f32.mxu1 %v7141_v16  ;;  %s5100_s13 = smov 61  }
 0x277   :  { %2912 = vrot.lane.b32.xlu1 %v5194_v11, %s5098_s12  ;;  %778 = vmatprep.mubr.f32.mxu0 %v7141_v16 }
 0x278   :  { %v5727_v48 = vpop.permute.xlu1 %2379  ;;  %v802_v51 = vpop.permute.xlu0 %801 }
 0x279   :  { %v806_v50 = vsel %vm805_vm15, %v5511_v34, %v802_v51  ;;  %v807_v53 = vsel %vm805_vm15, %v802_v51, %v5638_v27  ;;  %4781 = vmatmul.mubr.msk.f32.gmra.mxu1 %vm194_vm5, %v5293_v52  ;;  %4786 = vmatmul.mubr.msk.f32.gmra.mxu0 %vm194_vm5, %v5299_v55  ;;  %v3522_v51 = vld [vmem:[%s7107_s5 + $0x18] sm:$0xff] }
 0x27a   :  { %v810_v40 = vsel %vm145_vm7, %v806_v50, 0.0  ;;  %2763 = vrot.lane.b32.xlu0 %v5351_v17, %s5089_s25  ;;  %v811_v37 = vsel %vm146_vm6, %v807_v53, 0.0  ;;  %784 = vmatprep.mubr.f32.mxu0 %v7141_v16  ;;  %v5034_v50 = vld [vmem:[%s7105_s3 + $0x8] sm:$0xff] }
 0x27b   :  { %3031 = vrot.lane.b32.xlu1 %v5194_v11, %s5099_s15  ;;  %4788 = vmatprep.subr.msk.mxu1 %vm64_vm0, %v811_v37 }
 0x27c   :  { %v5747_v52 = vpop.permute.xlu1 %2371  ;;  %v934_v55 = vpop.permute.xlu0 %933  ;;  %4789 = vmatpush1.msk.msra.mxu1 %vm64_vm0, %v810_v40  ;;  %898 = vmatprep.mubr.f32.mxu1 %v7141_v16 }
 0x27d   :  { %v938_v27 = vsel %vm937_vm1, %v5523_v29, %v934_v55  ;;  %v939_v34 = vsel %vm937_vm1, %v934_v55, %v5649_v15  ;;  %4787 = vmatmul.mubr.msk.f32.gmra.mxu0 %vm194_vm5, %v5297_v54  ;;  %4790 = vmatmul.mubr.msk.f32.vlgmr.msra.gmra.mxu1 %vm194_vm5, %v5301_v56 }
 0x27e   :  { %v942_v7 = vsel %vm147_vm4, %v938_v27, 0.0  ;;  %3027 = vrot.lane.b32.xlu0 %v5176_v9, %s5099_s15  ;;  %v943_v41 = vsel %vm148_vm3, %v939_v34, 0.0  ;;  %904 = vmatprep.mubr.f32.mxu1 %v7141_v16 }
 0x27f   :  { %3155 = vrot.lane.b32.xlu1 %v5358_v18, %s5100_s13  ;;  %4794 = vmatprep.subr.msk.mxu0 %vm64_vm0, %v943_v41  ;;  %v3519_v41 = vld [vmem:[%s7107_s5] sm:$0xff] }
 0x280   :  { %v5769_v54 = vpop.permute.xlu1 %1325  ;;  %v5771_v56 = vpop.permute.xlu0 %2256  ;;  %4795 = vmatpush1.msk.msra.mxu0 %vm64_vm0, %v942_v7  ;;  %1030 = vmatprep.mubr.f32.mxu0 %v7141_v16  ;;  %v5036_v7 = vld [vmem:[%s7105_s3 + $0x18] sm:$0xff] }
 0x281   :  { %4791 = vmatmul.mubr.msk.f32.gmra.mxu1 %vm194_vm5, %v5305_v58  ;;  %4796 = vmatmul.mubr.msk.f32.vlgmr.msra.gmra.mxu0 %vm194_vm5, %v5303_v57 }
 0x282   :  { %3029 = vrot.lane.b32.xlu0 %v5183_v10, %s5099_s15  ;;  %910 = vmatprep.mubr.f32.mxu1 %v7141_v16 }
 0x283   :  { %3287 = vrot.lane.b32.xlu1 %v5358_v18, %s5091_s27  ;;  %1036 = vmatprep.mubr.f32.mxu0 %v7141_v16 }
 0x284   :  { %v5785_v29 = vpop.permute.xlu1 %1457  ;;  %v5787_v15 = vpop.permute.xlu0 %2258 }
 0x285   :  { %4792 = vmatmul.mubr.msk.f32.gmra.mxu1 %vm194_vm5, %v5309_v60  ;;  %4797 = vmatmul.mubr.msk.f32.gmra.mxu0 %vm194_vm5, %v5307_v59 }
 0x286   :  { %2895 = vrot.lane.b32.xlu0 %v5351_v17, %s5097_s11  ;;  %916 = vmatprep.mubr.f32.mxu1 %v7141_v16 }
 0x287   :  { %3164 = vrot.lane.b32.xlu1 %v5169_v8, %s5101_s2  ;;  %1042 = vmatprep.mubr.f32.mxu0 %v7141_v16 }
 0x288   :  { %v5799_v57 = vpop.permute.xlu1 %2373  ;;  %v1074_v58 = vpop.permute.xlu0 %1073 }
 0x289   :  { %v1078_v60 = vsel %vm7114_vm9, %v5496_v39, %v1074_v58  ;;  %4793 = vmatmul.mubr.msk.f32.gmra.mxu1 %vm194_vm5, %v5313_v62  ;;  %4798 = vmatmul.mubr.msk.f32.gmra.mxu0 %vm194_vm5, %v5311_v61  ;;  %v1079_v59 = vsel %vm7114_vm9, %v1074_v58, %v5698_v45  ;;  %vm7115_vm9 = vcmask 785408   ;;  %v7151_v58 = vld [vmem:[#allocation5_spill] sm:$0xff] }
 0x28a   :  { %3035 = vrot.lane.b32.xlu0 %v5351_v17, %s5096_s30  ;;  %4800 = vmatprep.subr.msk.mxu1 %vm64_vm0, %v1079_v59 }
 0x28b   :  { %3166 = vrot.lane.b32.xlu1 %v5176_v9, %s5101_s2  ;;  %4801 = vmatpush1.msk.msra.mxu1 %vm64_vm0, %v1078_v60  ;;  %v7152_v60 = vld [vmem:[#allocation7_spill] sm:$0xff] }
 0x28c   :  { %v5815_v8 = vpop.permute.xlu1 %2375  ;;  %v1192_v62 = vpop.permute.xlu0 %1191  ;;  %1048 = vmatprep.mubr.f32.mxu0 %v7141_v16  ;;  %1156 = vmatprep.mubr.f32.mxu1 %v7141_v16 }
 0x28d   :  { %v1196_v61 = vsel %vm1195_vm12, %v5541_v33, %v1192_v62  ;;  %v1197_v18 = vsel %vm1195_vm12, %v1192_v62, %v5713_v36  ;;  %4799 = vmatmul.mubr.msk.f32.gmra.mxu0 %vm194_vm5, %v5315_v63  ;;  %4802 = vmatmul.mubr.msk.f32.vlgmr.msra.gmra.mxu1 %vm194_vm5, %v5317_v0  ;;  %vm1327_vm12 = vcmask 883712   ;;  %v5033_v36 = vld [vmem:[%s7105_s3] sm:$0xff] }
 0x28e   :  { %v1200_v9 = vsel %vm149_vm10, %v1196_v61, 0.0  ;;  %3151 = vrot.lane.b32.xlu0 %v5332_v12, %s5100_s13  ;;  %v1201_v39 = vsel %vm150_vm11, %v1197_v18, 0.0  ;;  %1162 = vmatprep.mubr.f32.mxu1 %v7141_v16  ;;  %v3551_v61 = vld [vmem:[%s7108_s6] sm:$0xff] }
 0x28f   :  { %3168 = vrot.lane.b32.xlu1 %v5183_v10, %s5101_s2  ;;  %4806 = vmatprep.subr.msk.mxu0 %vm64_vm0, %v1201_v39  ;;  %v7154_v39 = vld [vmem:[#allocation9_spill] sm:$0xff] }
 0x290   :  { %v5835_v63 = vpop.permute.xlu1 %1589  ;;  %v5837_v33 = vpop.permute.xlu0 %2497  ;;  %4807 = vmatpush1.msk.msra.mxu0 %vm64_vm0, %v1200_v9  ;;  %1288 = vmatprep.mubr.f32.mxu0 %v7141_v16  ;;  %v7153_v9 = vld [vmem:[#allocation6_spill] sm:$0xff] }
 0x291   :  { %4803 = vmatmul.mubr.msk.f32.gmra.mxu1 %vm194_vm5, %v5321_v2  ;;  %4808 = vmatmul.mubr.msk.f32.vlgmr.msra.gmra.mxu0 %vm194_vm5, %v5319_v1  ;;  %v3418_v2 = vld [vmem:[%s7106_s4 + $0x18] sm:$0xff] }
 0x292   :  { %3283 = vrot.lane.b32.xlu0 %v5332_v12, %s5091_s27  ;;  %1168 = vmatprep.mubr.f32.mxu1 %v7141_v16  ;;  %v3416_v12 = vld [vmem:[%s7106_s4 + $0x8] sm:$0xff] }
 0x293   :  { %3170 = vrot.lane.b32.xlu1 %v5194_v11, %s5101_s2  ;;  %1294 = vmatprep.mubr.f32.mxu0 %v7141_v16 }
 0x294   :  { %v5851_v10 = vpop.permute.xlu1 %1729  ;;  %v5853_v0 = vpop.permute.xlu0 %2510 }
 0x295   :  { %4804 = vmatmul.mubr.msk.f32.gmra.mxu1 %vm194_vm5, %v5325_v4  ;;  %4809 = vmatmul.mubr.msk.f32.gmra.mxu0 %vm194_vm5, %v5323_v3 }
 0x296   :  { %3153 = vrot.lane.b32.xlu0 %v5351_v17, %s5100_s13  ;;  %1174 = vmatprep.mubr.f32.mxu1 %v7141_v16 }
 0x297   :  { %3436 = vperm.xlu1 %5012, %v3418_v2   ;;  %1300 = vmatprep.mubr.f32.mxu0 %v7141_v16  ;;  %v7155_v2 = vld [vmem:[#allocation8_spill] sm:$0xff] }
 0x298   :  { %v5866_v11 = vpop.permute.xlu1 %2377  ;;  %v1324_v1 = vpop.permute.xlu0 %1323 }
 0x299   :  { %v1328_v4 = vsel %vm1327_vm12, %v5563_v47, %v1324_v1  ;;  %v1329_v3 = vsel %vm1327_vm12, %v1324_v1, %v5769_v54  ;;  %4805 = vmatmul.mubr.msk.f32.gmra.mxu1 %vm194_vm5, %v5329_v6  ;;  %4810 = vmatmul.mubr.msk.f32.gmra.mxu0 %vm194_vm5, %v5327_v5  ;;  %v3415_v5 = vld [vmem:[%s7106_s4] sm:$0xff]  ;;  %vm7117_vm12 = vcmask 777216   ;;  %v7150_v54 = vld [vmem:[#allocation16_spill] sm:$0xff] }
 0x29a   :  { %v1332_v25 = vsel %vm151_vm13, %v1328_v4, 0.0  ;;  %3285 = vrot.lane.b32.xlu0 %v5351_v17, %s5091_s27  ;;  %v1333_v32 = vsel %vm152_vm14, %v1329_v3, 0.0  ;;  %1306 = vmatprep.mubr.f32.mxu0 %v7141_v16  ;;  %v7156_v1 = vld [vmem:[#allocation11_spill] sm:$0xff] }
 0x29b   :  { %3426 = vperm.xlu1 %5012, %v3416_v12   ;;  %4812 = vmatprep.subr.msk.mxu1 %vm64_vm0, %v1333_v32  ;;  %v7157_v3 = vld [vmem:[#allocation23_spill] sm:$0xff] }
 0x29c   :  { %v5885_v47 = vpop.permute.xlu1 %2516  ;;  %v1456_v6 = vpop.permute.xlu0 %1455  ;;  %4813 = vmatpush1.msk.msra.mxu1 %vm64_vm0, %v1332_v25  ;;  %1420 = vmatprep.mubr.f32.mxu1 %v7141_v16 }
 0x29d   :  { %v1460_v17 = vsel %vm7115_vm9, %v5577_v30, %v1456_v6  ;;  %v1461_v49 = vsel %vm7115_vm9, %v1456_v6, %v5785_v29  ;;  %4811 = vmatmul.mubr.msk.f32.gmra.mxu0 %vm194_vm5, %v5338_v13  ;;  %4814 = vmatmul.mubr.msk.f32.vlgmr.msra.gmra.mxu1 %vm194_vm5, %v5398_v19  ;;  %vm7116_vm9 = vcmask 769024   ;;  %v7158_v6 = vld [vmem:[#allocation10_spill] sm:$0xff] }
 0x29e   :  { %v1464_v45 = vsel %vm145_vm7, %v1460_v17, 0.0  ;;  %3296 = vrot.lane.b32.xlu0 %v5033_v36, %s5102_s10  ;;  %v1465_v30 = vsel %vm146_vm6, %v1461_v49, 0.0  ;;  %1426 = vmatprep.mubr.f32.mxu1 %v7141_v16 }
 0x29f   :  { %3421 = vperm.xlu1 %5012, %v3415_v5   ;;  %4818 = vmatprep.subr.msk.mxu0 %vm64_vm0, %v1465_v30  ;;  %v7159_v5 = vld [vmem:[#allocation13_spill] sm:$0xff]  ;;  %v7160_v30 = vld [vmem:[#allocation24_spill] sm:$0xff] }
 0x2a0   :  { %v5910_v13 = vpop.permute.xlu1 %1847  ;;  %v5912_v19 = vpop.permute.xlu0 %2512  ;;  %4819 = vmatpush1.msk.msra.mxu0 %vm64_vm0, %v1464_v45  ;;  %1552 = vmatprep.mubr.f32.mxu0 %v7141_v16 }
 0x2a1   :  { %4815 = vmatmul.mubr.msk.f32.gmra.mxu1 %vm194_vm5, %v5408_v20  ;;  %4820 = vmatmul.mubr.msk.f32.vlgmr.msra.gmra.mxu0 %vm194_vm5, %v5415_v22  ;;  %v3554_v20 = vld [vmem:[%s7108_s6 + $0x18] sm:$0xff]  ;;  %v5035_v22 = vld [vmem:[%s7105_s3 + $0x10] sm:$0xff] }
 0x2a2   :  { %3298 = vrot.lane.b32.xlu0 %v5034_v50, %s5102_s10  ;;  %1432 = vmatprep.mubr.f32.mxu1 %v7141_v16  ;;  %v7161_v50 = vld [vmem:[#allocation12_spill] sm:$0xff] }
 0x2a3   :  { %3540 = vperm.xlu1 %5012, %v3522_v51   ;;  %1558 = vmatprep.mubr.f32.mxu0 %v7141_v16 }
 0x2a4   :  { %v5929_v53 = vpop.permute.xlu1 %1979  ;;  %v5931_v40 = vpop.permute.xlu0 %2514 }
 0x2a5   :  { %4816 = vmatmul.mubr.msk.f32.gmra.mxu1 %vm194_vm5, %v5413_v21  ;;  %4821 = vmatmul.mubr.msk.f32.gmra.mxu0 %vm194_vm5, %v5426_v24  ;;  %v3520_v21 = vld [vmem:[%s7107_s5 + $0x8] sm:$0xff] }
 0x2a6   :  { %3300 = vrot.lane.b32.xlu0 %v5035_v22, %s5102_s10  ;;  %1438 = vmatprep.mubr.f32.mxu1 %v7141_v16 }
 0x2a7   :  { %3572 = vperm.xlu1 %5012, %v3554_v20   ;;  %1564 = vmatprep.mubr.f32.mxu0 %v7141_v16  ;;  %v7162_v20 = vld [vmem:[#allocation14_spill] sm:$0xff] }
 0x2a8   :  { %v5946_v37 = vpop.permute.xlu1 %2642  ;;  %v1588_v55 = vpop.permute.xlu0 %1587 }
 0x2a9   :  { %v1592_v24 = vsel %vm7117_vm12, %v5591_v35, %v1588_v55  ;;  %v1593_v27 = vsel %vm7117_vm12, %v1588_v55, %v5835_v63  ;;  %4817 = vmatmul.mubr.msk.f32.gmra.mxu1 %vm194_vm5, %v5424_v23  ;;  %4822 = vmatmul.mubr.msk.f32.gmra.mxu0 %vm194_vm5, %v5434_v26  ;;  %vm1981_vm12 = vcmask 752640  }
 0x2aa   :  { %v1596_v34 = vsel %vm147_vm4, %v1592_v24, 0.0  ;;  %3302 = vrot.lane.b32.xlu0 %v5036_v7, %s5102_s10  ;;  %v1597_v35 = vsel %vm148_vm3, %v1593_v27, 0.0  ;;  %1570 = vmatprep.mubr.f32.mxu0 %v7141_v16  ;;  %v7163_v24 = vld [vmem:[#allocation19_spill] sm:$0xff] }
 0x2ab   :  { %3530 = vperm.xlu1 %5012, %v3520_v21   ;;  %4824 = vmatprep.subr.msk.mxu1 %vm64_vm0, %v1597_v35  ;;  %v7164_v27 = vld [vmem:[#allocation15_spill] sm:$0xff]  ;;  %v7165_v35 = vld [vmem:[#allocation20_spill] sm:$0xff] }
 0x2ac   :  { %v5969_v23 = vpop.permute.xlu1 %2644  ;;  %v1728_v26 = vpop.permute.xlu0 %1727  ;;  %4825 = vmatpush1.msk.msra.mxu1 %vm64_vm0, %v1596_v34  ;;  %1684 = vmatprep.mubr.f32.mxu1 %v7141_v16 }
 0x2ad   :  { %v1732_v29 = vsel %vm7116_vm9, %v7150_v54, %v1728_v26  ;;  %4823 = vmatmul.mubr.msk.f32.gmra.mxu0 %vm194_vm5, %v7151_v58  ;;  %4826 = vmatmul.mubr.msk.f32.vlgmr.msra.gmra.mxu1 %vm194_vm5, %v7152_v60  ;;  %v1733_v59 = vsel %vm7116_vm9, %v1728_v26, %v5851_v10  ;;  %vm1849_vm9 = vcmask 760832   ;;  %v7166_v26 = vld [vmem:[#allocation25_spill] sm:$0xff] }
 0x2ae   :  { %4830 = vmatprep.subr.msk.mxu0 %vm64_vm0, %v1733_v59  ;;  %1690 = vmatprep.mubr.f32.mxu1 %v7141_v16  ;;  %v7167_v60 = vld [vmem:[#allocation21_spill] sm:$0xff]  ;;  %v7168_v59 = vld [vmem:[#allocation27_spill] sm:$0xff] }
 0x2af   :  { %3525 = vperm.xlu1 %5012, %v3519_v41   ;;  %4831 = vmatpush1.msk.msra.mxu0 %vm64_vm0, %v1732_v29 }
 0x2b0   :  { %v5987_v62 = vpop.permute.xlu0 %2629  ;;  %1810 = vmatprep.mubr.f32.mxu0 %v7141_v16 }
 0x2b1   :  { %v2112_v18 = vpop.permute.xlu1 %2111  ;;  %4827 = vmatmul.mubr.msk.f32.gmra.mxu1 %vm194_vm5, %v7153_v9  ;;  %4832 = vmatmul.mubr.msk.f32.vlgmr.msra.gmra.mxu0 %vm194_vm5, %v7154_v39 }
 0x2b2   :  { %1696 = vmatprep.mubr.f32.mxu1 %v7141_v16  ;;  %1816 = vmatprep.mubr.f32.mxu0 %v7141_v16 }
 0x2b3   :  { %3557 = vperm.xlu1 %5012, %v3551_v61  }
 0x2b4   :  { %v5999_v63 = vpop.permute.xlu0 %2761 }
 0x2b5   :  { %v2244_v10 = vpop.permute.xlu1 %2243  ;;  %4828 = vmatmul.mubr.msk.f32.gmra.mxu1 %vm194_vm5, %v7155_v2  ;;  %4833 = vmatmul.mubr.msk.f32.gmra.mxu0 %vm194_vm5, %v7156_v1  ;;  %v7169_v1 = vld [vmem:[#allocation22_spill] sm:$0xff] }
 0x2b6   :  { %1702 = vmatprep.mubr.f32.mxu1 %v7141_v16  ;;  %1822 = vmatprep.mubr.f32.mxu0 %v7141_v16 }
 0x2b8   :  { %v1846_v12 = vpop.permute.xlu0 %1845 }
 0x2b9   :  { %v6007_v4 = vpop.permute.xlu1 %2646  ;;  %v1850_v25 = vsel %vm1849_vm9, %v7157_v3, %v1846_v12  ;;  %v1851_v32 = vsel %vm1849_vm9, %v1846_v12, %v5910_v13  ;;  %4829 = vmatmul.mubr.msk.f32.gmra.mxu1 %vm194_vm5, %v7158_v6  ;;  %4834 = vmatmul.mubr.msk.f32.gmra.mxu0 %vm194_vm5, %v7159_v5  ;;  %vm2113_vm9 = vcmask 654336   ;;  %v7170_v12 = vld [vmem:[#allocation26_spill] sm:$0xff] }
 0x2ba   :  { %v1854_v17 = vsel %vm149_vm10, %v1850_v25, 0.0  ;;  %v1855_v49 = vsel %vm150_vm11, %v1851_v32, 0.0  ;;  %1828 = vmatprep.mubr.f32.mxu0 %v7141_v16  ;;  %1942 = vmatprep.mubr.f32.mxu1 %v7141_v16  ;;  %v7171_v32 = vld [vmem:[#allocation28_spill] sm:$0xff] }
 0x2bb   :  { %4836 = vmatprep.subr.msk.mxu1 %vm64_vm0, %v1855_v49 }
 0x2bc   :  { %v1978_v45 = vpop.permute.xlu0 %1977  ;;  %4837 = vmatpush1.msk.msra.mxu1 %vm64_vm0, %v1854_v17 }
 0x2bd   :  { %v6023_v36 = vpop.permute.xlu1 %2648  ;;  %v1982_v13 = vsel %vm1981_vm12, %v7160_v30, %v1978_v45  ;;  %v1983_v51 = vsel %vm1981_vm12, %v1978_v45, %v5929_v53  ;;  %4835 = vmatmul.mubr.msk.f32.gmra.mxu0 %vm194_vm5, %v7161_v50  ;;  %4838 = vmatmul.mubr.msk.f32.vlgmr.msra.gmra.mxu1 %vm194_vm5, %v7162_v20  ;;  %vm2245_vm12 = vcmask 646144  }
 0x2be   :  { %v1986_v22 = vsel %vm151_vm13, %v1982_v13, 0.0  ;;  %v1987_v55 = vsel %vm152_vm14, %v1983_v51, 0.0  ;;  %1948 = vmatprep.mubr.f32.mxu1 %v7141_v16  ;;  %2074 = vmatprep.mubr.f32.mxu0 %v7141_v16 }
 0x2bf   :  { %4842 = vmatprep.subr.msk.mxu0 %vm64_vm0, %v1987_v55 }
 0x2c0   :  { %v6038_v21 = vpop.permute.xlu0 %2774  ;;  %4843 = vmatpush1.msk.msra.mxu0 %vm64_vm0, %v1986_v22 }
 0x2c1   :  { %v2384_v53 = vpop.permute.xlu1 %2383  ;;  %4839 = vmatmul.mubr.msk.f32.gmra.mxu1 %vm194_vm5, %v7163_v24  ;;  %4844 = vmatmul.mubr.msk.f32.vlgmr.msra.gmra.mxu0 %vm194_vm5, %v7164_v27 }
 0x2c2   :  { %1954 = vmatprep.mubr.f32.mxu1 %v7141_v16  ;;  %2080 = vmatprep.mubr.f32.mxu0 %v7141_v16 }
 0x2c4   :  { %v6047_v34 = vpop.permute.xlu0 %2776 }
 0x2c5   :  { %v2502_v7 = vpop.permute.xlu1 %2501  ;;  %4840 = vmatmul.mubr.msk.f32.gmra.mxu1 %vm194_vm5, %v7165_v35  ;;  %4845 = vmatmul.mubr.msk.f32.gmra.mxu0 %vm194_vm5, %v7166_v26 }
 0x2c6   :  { %1960 = vmatprep.mubr.f32.mxu1 %v7141_v16  ;;  %2086 = vmatprep.mubr.f32.mxu0 %v7141_v16 }
 0x2c8   :  { %v2110_v41 = vpop.permute.xlu0 %2109 }
 0x2c9   :  { %v6055_v54 = vpop.permute.xlu1 %2780  ;;  %v2114_v29 = vsel %vm2113_vm9, %v5640_v28, %v2110_v41  ;;  %v2115_v58 = vsel %vm2113_vm9, %v2110_v41, %v2112_v18  ;;  %4841 = vmatmul.mubr.msk.f32.gmra.mxu1 %vm194_vm5, %v7167_v60  ;;  %4846 = vmatmul.mubr.msk.f32.gmra.mxu0 %vm194_vm5, %v7168_v59  ;;  %vm2385_vm9 = vcmask 637952  }
 0x2ca   :  { %v2118_v61 = vsel %vm145_vm7, %v2114_v29, 0.0  ;;  %v2119_v9 = vsel %vm146_vm6, %v2115_v58, 0.0  ;;  %2092 = vmatprep.mubr.f32.mxu0 %v7141_v16  ;;  %2206 = vmatprep.mubr.f32.mxu1 %v7141_v16 }
 0x2cb   :  { %4848 = vmatprep.subr.msk.mxu1 %vm64_vm0, %v2119_v9 }
 0x2cc   :  { %v2242_v28 = vpop.permute.xlu0 %2241  ;;  %4849 = vmatpush1.msk.msra.mxu1 %vm64_vm0, %v2118_v61 }
 0x2cd   :  { %v6070_v18 = vpop.permute.xlu1 %3033  ;;  %v2246_v39 = vsel %vm2245_vm12, %v5651_v38, %v2242_v28  ;;  %v2247_v2 = vsel %vm2245_vm12, %v2242_v28, %v2244_v10  ;;  %4847 = vmatmul.mubr.msk.f32.gmra.mxu0 %vm194_vm5, %v7169_v1  ;;  %4850 = vmatmul.mubr.msk.f32.vlgmr.msra.gmra.mxu1 %vm194_vm5, %v7170_v12  ;;  %vm2503_vm12 = vcmask 629760  }
 0x2ce   :  { %v2250_v3 = vsel %vm147_vm4, %v2246_v39, 0.0  ;;  %v2251_v25 = vsel %vm148_vm3, %v2247_v2, 0.0  ;;  %2212 = vmatprep.mubr.f32.mxu1 %v7141_v16  ;;  %2338 = vmatprep.mubr.f32.mxu0 %v7141_v16 }
 0x2cf   :  { %4854 = vmatprep.subr.msk.mxu0 %vm64_vm0, %v2251_v25 }
 0x2d0   :  { %v6084_v38 = vpop.permute.xlu0 %2778  ;;  %4855 = vmatpush1.msk.msra.mxu0 %vm64_vm0, %v2250_v3 }
 0x2d1   :  { %v2634_v10 = vpop.permute.xlu1 %2633  ;;  %4851 = vmatmul.mubr.msk.f32.gmra.mxu1 %vm194_vm5, %v7171_v32  ;;  %4856 = vmatmul.mubr.msk.f32.vlgmr.msra.gmra.mxu0 %vm194_vm5, %v5700_v46 }
 0x2d2   :  { %2218 = vmatprep.mubr.f32.mxu1 %v7141_v16  ;;  %2344 = vmatprep.mubr.f32.mxu0 %v7141_v16 }
 0x2d4   :  { %v6093_v6 = vpop.permute.xlu0 %2893 }
 0x2d5   :  { %v2766_v5 = vpop.permute.xlu1 %2765  ;;  %4852 = vmatmul.mubr.msk.f32.gmra.mxu1 %vm194_vm5, %v5662_v43  ;;  %4857 = vmatmul.mubr.msk.f32.gmra.mxu0 %vm194_vm5, %v5715_v42 }
 0x2d6   :  { %2224 = vmatprep.mubr.f32.mxu1 %v7141_v16  ;;  %2350 = vmatprep.mubr.f32.mxu0 %v7141_v16 }
 0x2d8   :  { %v2382_v17 = vpop.permute.xlu0 %2381 }
 0x2d9   :  { %v6101_v46 = vpop.permute.xlu1 %2908  ;;  %v2386_v49 = vsel %vm2385_vm9, %v5727_v48, %v2382_v17  ;;  %4853 = vmatmul.mubr.msk.f32.gmra.mxu1 %vm194_vm5, %v5679_v44  ;;  %4858 = vmatmul.mubr.msk.f32.gmra.mxu0 %vm194_vm5, %v5771_v56  ;;  %v2387_v43 = vsel %vm2385_vm9, %v2382_v17, %v2384_v53  ;;  %vm2635_vm9 = vcmask 621568  }
 0x2da   :  { %4860 = vmatprep.subr.msk.mxu1 %vm64_vm0, %v2387_v43  ;;  %2356 = vmatprep.mubr.f32.mxu0 %v7141_v16 }
 0x2db   :  { %4861 = vmatpush1.msk.msra.mxu1 %vm64_vm0, %v2386_v49  ;;  %2464 = vmatprep.mubr.f32.mxu1 %v7141_v16 }
 0x2dc   :  { %v2500_v42 = vpop.permute.xlu0 %2499 }
 0x2dd   :  { %v2504_v45 = vsel %vm2503_vm12, %v5837_v33, %v2500_v42  ;;  %v2505_v48 = vsel %vm2503_vm12, %v2500_v42, %v2502_v7  ;;  %4859 = vmatmul.mubr.msk.f32.gmra.mxu0 %vm194_vm5, %v5787_v15  ;;  %4862 = vmatmul.mubr.msk.f32.vlgmr.msra.gmra.mxu1 %vm194_vm5, %v5747_v52  ;;  %v6117_v44 = vpop.permute.xlu1 %2910  ;;  %v3417_v52 = vld [vmem:[%s7106_s4 + $0x10] sm:$0xff]  ;;  %vm2767_vm12 = vcmask 523264  }
 0x2de   :  { %v2508_v56 = vsel %vm149_vm10, %v2504_v45, 0.0  ;;  %v2509_v30 = vsel %vm150_vm11, %v2505_v48, 0.0  ;;  %2470 = vmatprep.mubr.f32.mxu1 %v7141_v16  ;;  %2596 = vmatprep.mubr.f32.mxu0 %v7141_v16 }
 0x2df   :  { %4866 = vmatprep.subr.msk.mxu0 %vm64_vm0, %v2509_v30  ;;  %3431 = vperm.xlu0 %5013, %v3417_v52  }
 0x2e0   :  { %v6126_v33 = vpop.permute.xlu0 %2906  ;;  %4867 = vmatpush1.msk.msra.mxu0 %vm64_vm0, %v2508_v56 }
 0x2e1   :  { %4863 = vmatmul.mubr.msk.f32.gmra.mxu1 %vm194_vm5, %v5799_v57  ;;  %4868 = vmatmul.mubr.msk.f32.vlgmr.msra.gmra.mxu0 %vm194_vm5, %v5853_v0  ;;  %v2898_v15 = vpop.permute.xlu1 %2897 }
 0x2e2   :  { %2476 = vmatprep.mubr.f32.mxu1 %v7141_v16  ;;  %2602 = vmatprep.mubr.f32.mxu0 %v7141_v16 }
 0x2e4   :  { %v6138_v13 = vpop.permute.xlu0 %3025 }
 0x2e5   :  { %4864 = vmatmul.mubr.msk.f32.gmra.mxu1 %vm194_vm5, %v5815_v8  ;;  %4869 = vmatmul.mubr.msk.f32.gmra.mxu0 %vm194_vm5, %v5912_v19  ;;  %v3038_v50 = vpop.permute.xlu1 %3037 }
 0x2e6   :  { %2482 = vmatprep.mubr.f32.mxu1 %v7141_v16  ;;  %2608 = vmatprep.mubr.f32.mxu0 %v7141_v16 }
 0x2e8   :  { %v2632_v57 = vpop.permute.xlu0 %2631 }
 0x2e9   :  { %v2636_v0 = vsel %vm2635_vm9, %v5987_v62, %v2632_v57  ;;  %v2637_v51 = vsel %vm2635_vm9, %v2632_v57, %v2634_v10  ;;  %4865 = vmatmul.mubr.msk.f32.gmra.mxu1 %vm194_vm5, %v5866_v11  ;;  %4870 = vmatmul.mubr.msk.f32.gmra.mxu0 %vm194_vm5, %v5931_v40  ;;  %vm3157_vm9 = vcmask 498688  }
 0x2ea   :  { %v2640_v8 = vsel %vm151_vm13, %v2636_v0, 0.0  ;;  %v2641_v19 = vsel %vm152_vm14, %v2637_v51, 0.0  ;;  %2614 = vmatprep.mubr.f32.mxu0 %v7141_v16  ;;  %2728 = vmatprep.mubr.f32.mxu1 %v7141_v16 }
 0x2eb   :  { %4872 = vmatprep.subr.msk.mxu1 %vm64_vm0, %v2641_v19 }
 0x2ec   :  { %v2764_v62 = vpop.permute.xlu0 %2763  ;;  %4873 = vmatpush1.msk.msra.mxu1 %vm64_vm0, %v2640_v8 }
 0x2ed   :  { %v2768_v11 = vsel %vm2767_vm12, %v5999_v63, %v2764_v62  ;;  %v2769_v40 = vsel %vm2767_vm12, %v2764_v62, %v2766_v5  ;;  %4871 = vmatmul.mubr.msk.f32.gmra.mxu0 %vm194_vm5, %v5885_v47  ;;  %4874 = vmatmul.mubr.msk.f32.vlgmr.msra.gmra.mxu1 %vm194_vm5, %v5946_v37  ;;  %v6171_v63 = vpop.permute.xlu1 %2912  ;;  %vm3289_vm12 = vcmask 490496  }
 0x2ee   :  { %v2772_v20 = vsel %vm145_vm7, %v2768_v11, 0.0  ;;  %v2773_v22 = vsel %vm146_vm6, %v2769_v40, 0.0  ;;  %2734 = vmatprep.mubr.f32.mxu1 %v7141_v16  ;;  %2860 = vmatprep.mubr.f32.mxu0 %v7141_v16  ;;  %vm2899_vm6 = vcmask 515072   ;;  %vm3039_vm7 = vcmask 506880  }
 0x2ef   :  { %4878 = vmatprep.subr.msk.mxu0 %vm64_vm0, %v2773_v22  ;;  %v3521_v22 = vld [vmem:[%s7107_s5 + $0x10] sm:$0xff] }
 0x2f0   :  { %v3028_v55 = vpop.permute.xlu0 %3027  ;;  %4879 = vmatpush1.msk.msra.mxu0 %vm64_vm0, %v2772_v20  ;;  %3535 = vperm.xlu0 %5013, %v3521_v22  }
 0x2f1   :  { %4875 = vmatmul.mubr.msk.f32.gmra.mxu1 %vm194_vm5, %v5969_v23  ;;  %4880 = vmatmul.mubr.msk.f32.vlgmr.msra.gmra.mxu0 %vm194_vm5, %v6038_v21  ;;  %v6184_v37 = vpop.permute.xlu1 %3031 }
 0x2f2   :  { %2740 = vmatprep.mubr.f32.mxu1 %v7141_v16  ;;  %2866 = vmatprep.mubr.f32.mxu0 %v7141_v16 }
 0x2f4   :  { %v3030_v47 = vpop.permute.xlu0 %3029 }
 0x2f5   :  { %4876 = vmatmul.mubr.msk.f32.gmra.mxu1 %vm194_vm5, %v6007_v4  ;;  %4881 = vmatmul.mubr.msk.f32.gmra.mxu0 %vm194_vm5, %v6047_v34  ;;  %v3156_v27 = vpop.permute.xlu1 %3155 }
 0x2f6   :  { %2746 = vmatprep.mubr.f32.mxu1 %v7141_v16  ;;  %2872 = vmatprep.mubr.f32.mxu0 %v7141_v16 }
 0x2f8   :  { %v2896_v23 = vpop.permute.xlu0 %2895 }
 0x2f9   :  { %v2900_v21 = vsel %vm2899_vm6, %v6093_v6, %v2896_v23  ;;  %v2901_v53 = vsel %vm2899_vm6, %v2896_v23, %v2898_v15  ;;  %4877 = vmatmul.mubr.msk.f32.gmra.mxu1 %vm194_vm5, %v6023_v36  ;;  %4882 = vmatmul.mubr.msk.f32.gmra.mxu0 %vm194_vm5, %v6084_v38  ;;  %v3553_v23 = vld [vmem:[%s7108_s6 + $0x10] sm:$0xff] }
 0x2fa   :  { %v2904_v4 = vsel %vm147_vm4, %v2900_v21, 0.0  ;;  %v2905_v24 = vsel %vm148_vm3, %v2901_v53, 0.0  ;;  %2878 = vmatprep.mubr.f32.mxu0 %v7141_v16  ;;  %2992 = vmatprep.mubr.f32.mxu1 %v7141_v16 }
 0x2fb   :  { %4884 = vmatprep.subr.msk.mxu1 %vm64_vm0, %v2905_v24  ;;  %3567 = vperm.xlu0 %5013, %v3553_v23  }
 0x2fc   :  { %v3036_v34 = vpop.permute.xlu0 %3035  ;;  %4885 = vmatpush1.msk.msra.mxu1 %vm64_vm0, %v2904_v4 }
 0x2fd   :  { %v3040_v36 = vsel %vm3039_vm7, %v6070_v18, %v3036_v34  ;;  %v275_v7 = vpop.f32.mrf.mxu0  ;;  %v293_v35 = vpop.f32.mrf.mxu1  ;;  %4883 = vmatmul.mubr.msk.f32.gmra.mxu0 %vm194_vm5, %v6055_v54  ;;  %4886 = vmatmul.mubr.msk.f32.vlgmr.msra.gmra.mxu1 %vm194_vm5, %v6126_v33  ;;  %v3041_v26 = vsel %vm3039_vm7, %v3036_v34, %v3038_v50  ;;  %vm7218_vm7 = vcmask 777216  }
 0x2fe   :  { %4890 = vmatprep.subr.msk.mxu0 %vm64_vm0, %v3041_v26  ;;  %2998 = vmatprep.mubr.f32.mxu1 %v7141_v16  ;;  %v3288_v54 = vpop.permute.xlu1 %3287 }
 0x2ff   :  { %v277_v41 = vpop.f32.mrf.mxu0  ;;  %v295_v29 = vpop.f32.mrf.mxu1  ;;  %4891 = vmatpush1.msk.msra.mxu0 %vm64_vm0, %v3040_v36  ;;  %3118 = vmatprep.mubr.f32.mxu0 %v7141_v16 }
 0x300   :  { %v3152_v58 = vpop.permute.xlu0 %3151 }
 0x301   :  { %v281_v60 = vpop.f32.mrf.mxu0  ;;  %v378_v59 = vpop.f32.mrf.mxu1  ;;  %4887 = vmatmul.mubr.msk.f32.gmra.mxu1 %vm194_vm5, %v6101_v46  ;;  %4892 = vmatmul.mubr.msk.f32.vlgmr.msra.gmra.mxu0 %vm194_vm5, %v6138_v13 }
 0x302   :  { %v6214_v61 = vadd.f32 %v378_v59, %v275_v7  ;;  %3004 = vmatprep.mubr.f32.mxu1 %v7141_v16  ;;  %3124 = vmatprep.mubr.f32.mxu0 %v7141_v16  ;;  %v3165_v1 = vpop.permute.xlu1 %3164 }
 0x303   :  { %v283_v9 = vpop.f32.mrf.mxu0  ;;  %v380_v28 = vpop.f32.mrf.mxu1 }
 0x304   :  { %v6218_v18 = vadd.f32 %v380_v28, %v277_v41  ;;  %v3284_v39 = vpop.permute.xlu0 %3283 }
 0x305   :  { %v384_v2 = vpop.f32.mrf.mxu1  ;;  %4888 = vmatmul.mubr.msk.f32.gmra.mxu1 %vm194_vm5, %v6117_v44  ;;  %4893 = vmatmul.mubr.msk.f32.gmra.mxu0 %vm194_vm5, %v3028_v55  ;;  %v287_v3 = vpop.f32.mrf.mxu0 }
 0x306   :  { %v6223_v12 = vadd.f32 %v384_v2, %v281_v60  ;;  %3010 = vmatprep.mubr.f32.mxu1 %v7141_v16  ;;  %3130 = vmatprep.mubr.f32.mxu0 %v7141_v16  ;;  %v3167_v45 = vpop.permute.xlu1 %3166 }
 0x307   :  { %v386_v25 = vpop.f32.mrf.mxu1  ;;  %v289_v43 = vpop.f32.mrf.mxu0 }
 0x308   :  { %v6227_v38 = vadd.f32 %v386_v25, %v283_v9  ;;  %v3154_v10 = vpop.permute.xlu0 %3153 }
 0x309   :  { %v3158_v32 = vsel %vm3157_vm9, %v3152_v58, %v3154_v10  ;;  %v3159_v6 = vsel %vm3157_vm9, %v3154_v10, %v3156_v27  ;;  %v390_v5 = vpop.f32.mrf.mxu1  ;;  %4889 = vmatmul.mubr.msk.f32.gmra.mxu1 %vm194_vm5, %v6171_v63  ;;  %4894 = vmatmul.mubr.msk.f32.gmra.mxu0 %vm194_vm5, %v3030_v47  ;;  %v3552_v27 = vld [vmem:[%s7108_s6 + $0x8] sm:$0xff]  ;;  %vm7220_vm9 = vmmov %vm7218_vm7 }
 0x30a   :  { %v3162_v17 = vsel %vm149_vm10, %v3158_v32, 0.0  ;;  %v391_v46 = vadd.f32 %v390_v5, %v287_v3  ;;  %v3163_v49 = vsel %vm150_vm11, %v3159_v6, 0.0  ;;  %3136 = vmatprep.mubr.f32.mxu0 %v7141_v16  ;;  %3250 = vmatprep.mubr.f32.mxu1 %v7141_v16  ;;  %v3169_v50 = vpop.permute.xlu1 %3168 }
 0x30b   :  { %v392_v42 = vpop.f32.mrf.mxu1  ;;  %4896 = vmatprep.subr.msk.mxu1 %vm64_vm0, %v3163_v49  ;;  %3562 = vperm.xlu0 %5013, %v3552_v27  }
 0x30c   :  { %v393_v48 = vadd.f32 %v392_v42, %v289_v43  ;;  %v3286_v44 = vpop.permute.xlu0 %3285  ;;  %4897 = vmatpush1.msk.msra.mxu1 %vm64_vm0, %v3162_v17  ;;  %v3640_v17 = vld [vmem:[%s7109_s7] sm:$0xff] }
 0x30d   :  { %v3290_v56 = vsel %vm3289_vm12, %v3284_v39, %v3286_v44  ;;  %v3291_v30 = vsel %vm3289_vm12, %v3286_v44, %v3288_v54  ;;  %v396_v33 = vpop.f32.mrf.mxu1  ;;  %4895 = vmatmul.mubr.msk.f32.gmra.mxu0 %vm194_vm5, %v6184_v37  ;;  %4898 = vmatmul.mubr.msk.f32.vlgmr.msra.gmra.mxu1 %vm194_vm5, %v3165_v1 }
 0x30e   :  { %v3294_v52 = vsel %vm151_vm13, %v3290_v56, 0.0  ;;  %v397_v15 = vadd.f32 %v396_v33, %v293_v35  ;;  %v3295_v13 = vsel %vm152_vm14, %v3291_v30, 0.0  ;;  %3256 = vmatprep.mubr.f32.mxu1 %v7141_v16  ;;  %3382 = vmatprep.mubr.f32.mxu0 %v7141_v16  ;;  %v3171_v19 = vpop.permute.xlu1 %3170  ;;  %vm7214_vm14 = vcmask 785408  }
 0x30f   :  { %v398_v57 = vpop.f32.mrf.mxu1  ;;  %4902 = vmatprep.subr.msk.mxu0 %vm64_vm0, %v3295_v13  ;;  %3642 = vrot.lane.b32.xlu0 %v3640_v17, %s5068_s26  ;;  %vm7216_vm6 = vmmov %vm7214_vm14 }
 0x310   :  { %v399_v0 = vadd.f32 %v398_v57, %v295_v29  ;;  %v3297_v51 = vpop.permute.xlu0 %3296  ;;  %4903 = vmatpush1.msk.msra.mxu0 %vm64_vm0, %v3294_v52  ;;  %4012 = vrot.lane.b32.xlu1 %v3640_v17, %s5102_s10  ;;  %vm3607_vm0 = vcmask 138240  }
 0x311   :  { %4899 = vmatmul.mubr.msk.f32.gmra.mxu1 %vm194_vm5, %v3167_v45  ;;  %4904 = vmatmul.mubr.msk.f32.vlgmr.msra.gmra.mxu0 %vm194_vm5, %v3297_v51 }
 0x312   :  { %3262 = vmatprep.mubr.f32.mxu1 %v7141_v16  ;;  %3388 = vmatprep.mubr.f32.mxu0 %v7141_v16 }
 0x313   :  { %3887 = vrot.lane.b32.xlu0 %v3640_v17, %s5089_s25 }
 0x314   :  { %v3299_v8 = vpop.permute.xlu0 %3298 }
 0x315   :  { %4900 = vmatmul.mubr.msk.f32.gmra.mxu1 %vm194_vm5, %v3169_v50  ;;  %4905 = vmatmul.mubr.msk.f32.gmra.mxu0 %vm194_vm5, %v3299_v8 }
 0x316   :  { %3268 = vmatprep.mubr.f32.mxu1 %v7141_v16  ;;  %3394 = vmatprep.mubr.f32.mxu0 %v7141_v16 }
 0x318   :  { %v3301_v62 = vpop.permute.xlu0 %3300 }
 0x319   :  { %4901 = vmatmul.mubr.msk.f32.gmra.mxu1 %vm194_vm5, %v3171_v19  ;;  %4906 = vmatmul.mubr.msk.f32.gmra.mxu0 %vm194_vm5, %v3301_v62 }
 0x31a   :  { %3400 = vmatprep.mubr.f32.mxu0 %v7141_v16  ;;  %3759 = vmatprep.mubr.f32.mxu1 %v7141_v16 }
 0x31c   :  { %v3303_v11 = vpop.permute.xlu0 %3302 }
 0x31d   :  { %4907 = vmatmul.mubr.msk.f32.gmra.mxu0 %vm194_vm5, %v3303_v11  ;;  %vm7212_vm5 = vcmask 900096  }
 0x31e   :  { %3955 = vmatprep.mubr.f32.mxu0 %v7141_v16  ;;  %vm7213_vm13 = vmmov %vm7212_vm5 }
 0x31f   :  { %vm7222_vm12 = vmmov %vm7212_vm5 }
 0x320   :  { %v496_v40 = vpop.f32.mrf.mxu0 }
 0x321   :  { %v519_v20 = vadd.f32 %v496_v40, %v6214_v61 }
 0x322   :  { %v498_v63 = vpop.f32.mrf.mxu0 }
 0x323   :  { %v520_v55 = vadd.f32 %v498_v63, %v6218_v18 }
 0x324   :  { %v502_v47 = vpop.f32.mrf.mxu0 }
 0x325   :  { %v521_v37 = vadd.f32 %v502_v47, %v6223_v12 }
 0x326   :  { %v504_v21 = vpop.f32.mrf.mxu0 }
 0x327   :  { %v522_v53 = vadd.f32 %v504_v21, %v6227_v38 }
 0x328   :  { %v508_v4 = vpop.f32.mrf.mxu0 }
 0x329   :  { %v523_v24 = vadd.f32 %v508_v4, %v391_v46 }
 0x32a   :  { %v510_v34 = vpop.f32.mrf.mxu0 }
 0x32b   :  { %v524_v36 = vadd.f32 %v510_v34, %v393_v48 }
 0x32c   :  { %v514_v7 = vpop.f32.mrf.mxu0 }
 0x32d   :  { %v525_v35 = vadd.f32 %v514_v7, %v397_v15  ;;  %v632_v26 = vpop.f32.mrf.mxu1 }
 0x32e   :  { %v655_v41 = vadd.f32 %v632_v26, %v519_v20  ;;  %v516_v29 = vpop.f32.mrf.mxu0 }
 0x32f   :  { %v526_v58 = vadd.f32 %v516_v29, %v399_v0  ;;  %v634_v60 = vpop.f32.mrf.mxu1 }
 0x330   :  { %v656_v59 = vadd.f32 %v634_v60, %v520_v55 }
 0x331   :  { %v638_v54 = vpop.f32.mrf.mxu1  ;;  %v768_v61 = vpop.f32.mrf.mxu0 }
 0x332   :  { %v657_v9 = vadd.f32 %v638_v54, %v521_v37  ;;  %v791_v28 = vadd.f32 %v768_v61, %v655_v41 }
 0x333   :  { %v640_v18 = vpop.f32.mrf.mxu1  ;;  %v770_v39 = vpop.f32.mrf.mxu0 }
 0x334   :  { %v658_v2 = vadd.f32 %v640_v18, %v522_v53  ;;  %v792_v1 = vadd.f32 %v770_v39, %v656_v59 }
 0x335   :  { %v644_v12 = vpop.f32.mrf.mxu1  ;;  %v774_v3 = vpop.f32.mrf.mxu0 }
 0x336   :  { %v659_v25 = vadd.f32 %v644_v12, %v523_v24  ;;  %v793_v38 = vadd.f32 %v774_v3, %v657_v9 }
 0x337   :  { %v646_v10 = vpop.f32.mrf.mxu1  ;;  %v776_v32 = vpop.f32.mrf.mxu0 }
 0x338   :  { %v660_v6 = vadd.f32 %v646_v10, %v524_v36  ;;  %v794_v5 = vadd.f32 %v776_v32, %v658_v2 }
 0x339   :  { %v650_v46 = vpop.f32.mrf.mxu1  ;;  %v780_v49 = vpop.f32.mrf.mxu0 }
 0x33a   :  { %v661_v43 = vadd.f32 %v650_v46, %v525_v35  ;;  %v795_v42 = vadd.f32 %v780_v49, %v659_v25 }
 0x33b   :  { %v652_v45 = vpop.f32.mrf.mxu1  ;;  %v782_v48 = vpop.f32.mrf.mxu0 }
 0x33c   :  { %v662_v44 = vadd.f32 %v652_v45, %v526_v58  ;;  %v796_v56 = vadd.f32 %v782_v48, %v660_v6 }
 0x33d   :  { %v786_v30 = vpop.f32.mrf.mxu0  ;;  %v900_v33 = vpop.f32.mrf.mxu1 }
 0x33e   :  { %v797_v52 = vadd.f32 %v786_v30, %v661_v43  ;;  %v923_v15 = vadd.f32 %v900_v33, %v791_v28 }
 0x33f   :  { %v788_v13 = vpop.f32.mrf.mxu0  ;;  %v902_v57 = vpop.f32.mrf.mxu1 }
 0x340   :  { %v798_v0 = vadd.f32 %v788_v13, %v662_v44  ;;  %v924_v51 = vadd.f32 %v902_v57, %v792_v1 }
 0x341   :  { %v906_v50 = vpop.f32.mrf.mxu1  ;;  %v1032_v8 = vpop.f32.mrf.mxu0 }
 0x342   :  { %v925_v19 = vadd.f32 %v906_v50, %v793_v38  ;;  %v1055_v62 = vadd.f32 %v1032_v8, %v923_v15 }
 0x343   :  { %v908_v11 = vpop.f32.mrf.mxu1  ;;  %v1034_v40 = vpop.f32.mrf.mxu0 }
 0x344   :  { %v926_v20 = vadd.f32 %v908_v11, %v794_v5  ;;  %v1056_v22 = vadd.f32 %v1034_v40, %v924_v51 }
 0x345   :  { %v912_v63 = vpop.f32.mrf.mxu1  ;;  %v1038_v55 = vpop.f32.mrf.mxu0 }
 0x346   :  { %v927_v47 = vadd.f32 %v912_v63, %v795_v42  ;;  %v1057_v37 = vadd.f32 %v1038_v55, %v925_v19 }
 0x347   :  { %v914_v23 = vpop.f32.mrf.mxu1  ;;  %v1040_v21 = vpop.f32.mrf.mxu0 }
 0x348   :  { %v928_v53 = vadd.f32 %v914_v23, %v796_v56  ;;  %v1058_v4 = vadd.f32 %v1040_v21, %v926_v20 }
 0x349   :  { %v918_v24 = vpop.f32.mrf.mxu1  ;;  %v1044_v27 = vpop.f32.mrf.mxu0 }
 0x34a   :  { %v929_v34 = vadd.f32 %v918_v24, %v797_v52  ;;  %v1059_v36 = vadd.f32 %v1044_v27, %v927_v47 }
 0x34b   :  { %v920_v7 = vpop.f32.mrf.mxu1  ;;  %v1046_v35 = vpop.f32.mrf.mxu0 }
 0x34c   :  { %v930_v26 = vadd.f32 %v920_v7, %v798_v0  ;;  %v1060_v41 = vadd.f32 %v1046_v35, %v928_v53 }
 0x34d   :  { %v1050_v29 = vpop.f32.mrf.mxu0  ;;  %v1158_v58 = vpop.f32.mrf.mxu1 }
 0x34e   :  { %v1061_v60 = vadd.f32 %v1050_v29, %v929_v34  ;;  %v1181_v59 = vadd.f32 %v1158_v58, %v1055_v62 }
 0x34f   :  { %v1052_v54 = vpop.f32.mrf.mxu0  ;;  %v1160_v61 = vpop.f32.mrf.mxu1 }
 0x350   :  { %v1062_v9 = vadd.f32 %v1052_v54, %v930_v26  ;;  %v1182_v28 = vadd.f32 %v1160_v61, %v1056_v22 }
 0x351   :  { %v1164_v18 = vpop.f32.mrf.mxu1  ;;  %v1290_v39 = vpop.f32.mrf.mxu0 }
 0x352   :  { %v1183_v2 = vadd.f32 %v1164_v18, %v1057_v37  ;;  %v1313_v1 = vadd.f32 %v1290_v39, %v1181_v59 }
 0x353   :  { %v1166_v12 = vpop.f32.mrf.mxu1  ;;  %v1292_v3 = vpop.f32.mrf.mxu0 }
 0x354   :  { %v1184_v25 = vadd.f32 %v1166_v12, %v1058_v4  ;;  %v1314_v38 = vadd.f32 %v1292_v3, %v1182_v28 }
 0x355   :  { %v1170_v10 = vpop.f32.mrf.mxu1  ;;  %v1296_v32 = vpop.f32.mrf.mxu0 }
 0x356   :  { %v1185_v6 = vadd.f32 %v1170_v10, %v1059_v36  ;;  %v1315_v5 = vadd.f32 %v1296_v32, %v1183_v2 }
 0x357   :  { %v1172_v17 = vpop.f32.mrf.mxu1  ;;  %v1298_v46 = vpop.f32.mrf.mxu0 }
 0x358   :  { %v1186_v49 = vadd.f32 %v1172_v17, %v1060_v41  ;;  %v1316_v43 = vadd.f32 %v1298_v46, %v1184_v25 }
 0x359   :  { %v1176_v42 = vpop.f32.mrf.mxu1  ;;  %v1302_v45 = vpop.f32.mrf.mxu0 }
 0x35a   :  { %v1187_v48 = vadd.f32 %v1176_v42, %v1061_v60  ;;  %v1317_v44 = vadd.f32 %v1302_v45, %v1185_v6 }
 0x35b   :  { %v1178_v56 = vpop.f32.mrf.mxu1  ;;  %v1304_v30 = vpop.f32.mrf.mxu0 }
 0x35c   :  { %v1188_v33 = vadd.f32 %v1178_v56, %v1062_v9  ;;  %v1318_v52 = vadd.f32 %v1304_v30, %v1186_v49 }
 0x35d   :  { %v1308_v15 = vpop.f32.mrf.mxu0  ;;  %v1422_v13 = vpop.f32.mrf.mxu1 }
 0x35e   :  { %v1319_v57 = vadd.f32 %v1308_v15, %v1187_v48  ;;  %v1445_v0 = vadd.f32 %v1422_v13, %v1313_v1 }
 0x35f   :  { %v1310_v51 = vpop.f32.mrf.mxu0  ;;  %v1424_v50 = vpop.f32.mrf.mxu1 }
 0x360   :  { %v1320_v8 = vadd.f32 %v1310_v51, %v1188_v33  ;;  %v1446_v19 = vadd.f32 %v1424_v50, %v1314_v38 }
 0x361   :  { %v1428_v62 = vpop.f32.mrf.mxu1  ;;  %v1554_v11 = vpop.f32.mrf.mxu0 }
 0x362   :  { %v1447_v40 = vadd.f32 %v1428_v62, %v1315_v5  ;;  %v1577_v20 = vadd.f32 %v1554_v11, %v1445_v0 }
 0x363   :  { %v1430_v22 = vpop.f32.mrf.mxu1  ;;  %v1556_v63 = vpop.f32.mrf.mxu0 }
 0x364   :  { %v1448_v55 = vadd.f32 %v1430_v22, %v1316_v43  ;;  %v1578_v47 = vadd.f32 %v1556_v63, %v1446_v19 }
 0x365   :  { %v1434_v37 = vpop.f32.mrf.mxu1  ;;  %v1560_v23 = vpop.f32.mrf.mxu0 }
 0x366   :  { %v1449_v21 = vadd.f32 %v1434_v37, %v1317_v44  ;;  %v1579_v53 = vadd.f32 %v1560_v23, %v1447_v40 }
 0x367   :  { %v1436_v4 = vpop.f32.mrf.mxu1  ;;  %v1562_v24 = vpop.f32.mrf.mxu0 }
 0x368   :  { %v1450_v27 = vadd.f32 %v1436_v4, %v1318_v52  ;;  %v1580_v34 = vadd.f32 %v1562_v24, %v1448_v55 }
 0x369   :  { %v1440_v36 = vpop.f32.mrf.mxu1  ;;  %v1566_v7 = vpop.f32.mrf.mxu0 }
 0x36a   :  { %v1451_v35 = vadd.f32 %v1440_v36, %v1319_v57  ;;  %v1581_v26 = vadd.f32 %v1566_v7, %v1449_v21 }
 0x36b   :  { %v1442_v41 = vpop.f32.mrf.mxu1  ;;  %v1568_v29 = vpop.f32.mrf.mxu0 }
 0x36c   :  { %v1452_v58 = vadd.f32 %v1442_v41, %v1320_v8  ;;  %v1582_v60 = vadd.f32 %v1568_v29, %v1450_v27 }
 0x36d   :  { %v1572_v59 = vpop.f32.mrf.mxu0  ;;  %v1686_v54 = vpop.f32.mrf.mxu1 }
 0x36e   :  { %v1583_v61 = vadd.f32 %v1572_v59, %v1451_v35  ;;  %v1709_v9 = vadd.f32 %v1686_v54, %v1577_v20 }
 0x36f   :  { %v1574_v28 = vpop.f32.mrf.mxu0  ;;  %v1688_v18 = vpop.f32.mrf.mxu1 }
 0x370   :  { %v1584_v39 = vadd.f32 %v1574_v28, %v1452_v58  ;;  %v1710_v2 = vadd.f32 %v1688_v18, %v1578_v47 }
 0x371   :  { %v1692_v1 = vpop.f32.mrf.mxu1  ;;  %v1812_v12 = vpop.f32.mrf.mxu0 }
 0x372   :  { %v1711_v3 = vadd.f32 %v1692_v1, %v1579_v53  ;;  %v6284_v25 = vadd.f32 %v1812_v12, %v1709_v9 }
 0x373   :  { %v1694_v38 = vpop.f32.mrf.mxu1  ;;  %v1814_v10 = vpop.f32.mrf.mxu0 }
 0x374   :  { %v1712_v32 = vadd.f32 %v1694_v38, %v1580_v34  ;;  %v6286_v6 = vadd.f32 %v1814_v10, %v1710_v2 }
 0x375   :  { %v1698_v5 = vpop.f32.mrf.mxu1  ;;  %v1818_v17 = vpop.f32.mrf.mxu0 }
 0x376   :  { %v1713_v46 = vadd.f32 %v1698_v5, %v1581_v26  ;;  %v6288_v49 = vadd.f32 %v1818_v17, %v1711_v3 }
 0x377   :  { %v1700_v43 = vpop.f32.mrf.mxu1  ;;  %v1820_v42 = vpop.f32.mrf.mxu0 }
 0x378   :  { %v1714_v45 = vadd.f32 %v1700_v43, %v1582_v60  ;;  %v6290_v48 = vadd.f32 %v1820_v42, %v1712_v32 }
 0x379   :  { %v1704_v44 = vpop.f32.mrf.mxu1  ;;  %v1824_v56 = vpop.f32.mrf.mxu0 }
 0x37a   :  { %v1715_v30 = vadd.f32 %v1704_v44, %v1583_v61  ;;  %v6292_v33 = vadd.f32 %v1824_v56, %v1713_v46 }
 0x37b   :  { %v1706_v52 = vpop.f32.mrf.mxu1  ;;  %v1826_v15 = vpop.f32.mrf.mxu0 }
 0x37c   :  { %v1716_v13 = vadd.f32 %v1706_v52, %v1584_v39  ;;  %v6294_v57 = vadd.f32 %v1826_v15, %v1714_v45 }
 0x37d   :  { %v1830_v0 = vpop.f32.mrf.mxu0  ;;  %v6296_v51 = vpop.f32.mrf.mxu1 }
 0x37e   :  { %v6298_v50 = vadd.f32 %v1830_v0, %v1715_v30 }
 0x37f   :  { %v1832_v8 = vpop.f32.mrf.mxu0  ;;  %v6300_v19 = vpop.f32.mrf.mxu1 }
 0x380   :  { %v6302_v62 = vadd.f32 %v1832_v8, %v1716_v13 }
 0x381   :  { %v6304_v11 = vpop.f32.mrf.mxu1  ;;  %v6306_v40 = vpop.f32.mrf.mxu0 }
 0x383   :  { %v6308_v20 = vpop.f32.mrf.mxu1  ;;  %v6310_v22 = vpop.f32.mrf.mxu0 }
 0x385   :  { %v6312_v63 = vpop.f32.mrf.mxu1  ;;  %v6314_v55 = vpop.f32.mrf.mxu0 }
 0x387   :  { %v6316_v47 = vpop.f32.mrf.mxu1  ;;  %v6318_v37 = vpop.f32.mrf.mxu0 }
 0x389   :  { %v6320_v23 = vpop.f32.mrf.mxu1  ;;  %v6322_v21 = vpop.f32.mrf.mxu0 }
 0x38b   :  { %v6324_v53 = vpop.f32.mrf.mxu1  ;;  %v6326_v4 = vpop.f32.mrf.mxu0 }
 0x38d   :  { %v6328_v24 = vpop.f32.mrf.mxu0  ;;  %v2208_v27 = vpop.f32.mrf.mxu1 }
 0x38f   :  { %v6330_v34 = vpop.f32.mrf.mxu0  ;;  %v2210_v36 = vpop.f32.mrf.mxu1 }
 0x391   :  { %v6332_v7 = vpop.f32.mrf.mxu1  ;;  %v2340_v35 = vpop.f32.mrf.mxu0 }
 0x393   :  { %v6334_v26 = vpop.f32.mrf.mxu1  ;;  %v2342_v41 = vpop.f32.mrf.mxu0 }
 0x395   :  { %v6336_v29 = vpop.f32.mrf.mxu1  ;;  %v6338_v58 = vpop.f32.mrf.mxu0 }
 0x397   :  { %v6340_v60 = vpop.f32.mrf.mxu1  ;;  %v6342_v59 = vpop.f32.mrf.mxu0 }
 0x399   :  { %v6344_v54 = vpop.f32.mrf.mxu1  ;;  %v6346_v61 = vpop.f32.mrf.mxu0 }
 0x39b   :  { %v6348_v9 = vpop.f32.mrf.mxu1  ;;  %v6350_v28 = vpop.f32.mrf.mxu0 }
 0x39d   :  { %v6352_v18 = vpop.f32.mrf.mxu0  ;;  %v2466_v39 = vpop.f32.mrf.mxu1 }
 0x39f   :  { %v6354_v2 = vpop.f32.mrf.mxu0  ;;  %v2468_v1 = vpop.f32.mrf.mxu1 }
 0x3a0   :  { %7172 = vst [vmem:[#allocation16_spill] sm:$0xff] %v6354_v2 }
 0x3a1   :  { %v6356_v12 = vpop.f32.mrf.mxu1  ;;  %v2598_v3 = vpop.f32.mrf.mxu0 }
 0x3a3   :  { %v6358_v38 = vpop.f32.mrf.mxu1  ;;  %v6360_v10 = vpop.f32.mrf.mxu0 }
 0x3a5   :  { %v6362_v32 = vpop.f32.mrf.mxu1  ;;  %v6364_v5 = vpop.f32.mrf.mxu0 }
 0x3a7   :  { %v6366_v17 = vpop.f32.mrf.mxu1  ;;  %v6368_v46 = vpop.f32.mrf.mxu0 }
 0x3a8   :  { %7173 = vst [vmem:[#allocation5_spill] sm:$0xff] %v6366_v17 }
 0x3a9   :  { %v6370_v43 = vpop.f32.mrf.mxu1  ;;  %v6372_v42 = vpop.f32.mrf.mxu0 }
 0x3aa   :  { %7174 = vst [vmem:[#allocation7_spill] sm:$0xff] %v6370_v43  ;;  %7175 = vst [vmem:[#allocation6_spill] sm:$0xff] %v6372_v42 }
 0x3ab   :  { %v6374_v45 = vpop.f32.mrf.mxu1  ;;  %v6376_v44 = vpop.f32.mrf.mxu0 }
 0x3ac   :  { %7176 = vst [vmem:[#allocation9_spill] sm:$0xff] %v6374_v45  ;;  %7177 = vst [vmem:[#allocation8_spill] sm:$0xff] %v6376_v44 }
 0x3ad   :  { %v6378_v56 = vpop.f32.mrf.mxu0  ;;  %v2730_v30 = vpop.f32.mrf.mxu1 }
 0x3ae   :  { %7178 = vst [vmem:[#allocation11_spill] sm:$0xff] %v6378_v56 }
 0x3af   :  { %v6380_v52 = vpop.f32.mrf.mxu0  ;;  %v2732_v15 = vpop.f32.mrf.mxu1 }
 0x3b0   :  { %7179 = vst [vmem:[#allocation23_spill] sm:$0xff] %v6380_v52 }
 0x3b1   :  { %v6382_v13 = vpop.f32.mrf.mxu1  ;;  %v2862_v0 = vpop.f32.mrf.mxu0 }
 0x3b3   :  { %v6384_v8 = vpop.f32.mrf.mxu1  ;;  %v6386_v16 = vpop.f32.mrf.mxu0 }
 0x3b4   :  { %7180 = vst [vmem:[#allocation10_spill] sm:$0xff] %v6384_v8  ;;  %v1967_v8 = vadd.f32 %v6296_v51, %v6284_v25  ;;  %v1970_v51 = vadd.f32 %v6308_v20, %v6290_v48 }
 0x3b5   :  { %v6388_v14 = vpop.f32.mrf.mxu1  ;;  %v6390_v31 = vpop.f32.mrf.mxu0 }
 0x3b6   :  { %7181 = vst [vmem:[#allocation13_spill] sm:$0xff] %v6388_v14  ;;  %7182 = vst [vmem:[#allocation24_spill] sm:$0xff] %v6390_v31  ;;  %v1968_v31 = vadd.f32 %v6300_v19, %v6286_v6 }
 0x3b7   :  { %v6392_v45 = vpop.f32.mrf.mxu1  ;;  %v6394_v44 = vpop.f32.mrf.mxu0 }
 0x3b8   :  { %7183 = vst [vmem:[#allocation12_spill] sm:$0xff] %v6392_v45  ;;  %7184 = vst [vmem:[#allocation14_spill] sm:$0xff] %v6394_v44  ;;  %v2099_v45 = vadd.f32 %v6306_v40, %v1967_v8  ;;  %v1971_v8 = vadd.f32 %v6312_v63, %v6292_v33 }
 0x3b9   :  { %v6396_v56 = vpop.f32.mrf.mxu1  ;;  %v6398_v43 = vpop.f32.mrf.mxu0 }
 0x3ba   :  { %7185 = vst [vmem:[#allocation19_spill] sm:$0xff] %v6396_v56  ;;  %7186 = vst [vmem:[#allocation15_spill] sm:$0xff] %v6398_v43  ;;  %v2231_v43 = vadd.f32 %v2208_v27, %v2099_v45  ;;  %v1972_v27 = vadd.f32 %v6316_v47, %v6294_v57  ;;  %v2103_v48 = vadd.f32 %v6322_v21, %v1971_v8  ;;  %v6446_v21 = vpop.permute.xlu1 %3436 }
 0x3bb   :  { %v6400_v52 = vpop.f32.mrf.mxu1  ;;  %v6402_v2 = vpop.f32.mrf.mxu0 }
 0x3bc   :  { %7187 = vst [vmem:[#allocation20_spill] sm:$0xff] %v6400_v52  ;;  %7188 = vst [vmem:[#allocation25_spill] sm:$0xff] %v6402_v2  ;;  %v1969_v52 = vadd.f32 %v6304_v11, %v6288_v49  ;;  %v2100_v2 = vadd.f32 %v6310_v22, %v1968_v31  ;;  %v2363_v40 = vadd.f32 %v2340_v35, %v2231_v43 }
 0x3bd   :  { %v6406_v42 = vpop.f32.mrf.mxu0  ;;  %v2994_v14 = vpop.f32.mrf.mxu1  ;;  %v2102_v49 = vadd.f32 %v6318_v37, %v1970_v51  ;;  %v1973_v37 = vadd.f32 %v6320_v23, %v6298_v50  ;;  %v1974_v50 = vadd.f32 %v6324_v53, %v6302_v62  ;;  %v7192_v51 = vld [vmem:[#allocation6_spill] sm:$0xff] }
 0x3be   :  { %7189 = vst [vmem:[#allocation21_spill] sm:$0xff] %v6406_v42  ;;  %v2101_v6 = vadd.f32 %v6314_v55, %v1969_v52  ;;  %v2232_v19 = vadd.f32 %v2210_v36, %v2100_v2  ;;  %v2489_v22 = vadd.f32 %v2466_v39, %v2363_v40  ;;  %v7193_v40 = vld [vmem:[#allocation10_spill] sm:$0xff] }
 0x3bf   :  { %v6411_v44 = vpop.f32.mrf.mxu0  ;;  %v6413_v56 = vpop.f32.mrf.mxu1  ;;  %v2234_v33 = vadd.f32 %v6334_v26, %v2102_v49  ;;  %v2105_v23 = vadd.f32 %v6328_v24, %v1973_v37  ;;  %v7194_v49 = vld [vmem:[#allocation24_spill] sm:$0xff] }
 0x3c0   :  { %7190 = vst [vmem:[#allocation27_spill] sm:$0xff] %v6411_v44  ;;  %v2233_v31 = vadd.f32 %v6332_v7, %v2101_v6  ;;  %v2364_v11 = vadd.f32 %v2342_v41, %v2232_v19  ;;  %v2621_v35 = vadd.f32 %v2598_v3, %v2489_v22  ;;  %v2104_v7 = vadd.f32 %v6326_v4, %v1972_v27  ;;  %v3427_v19 = vpop.permute.xlu1 %3426  ;;  %v7197_v22 = vld [vmem:[#allocation8_spill] sm:$0xff]  ;;  %v7198_v27 = vld [vmem:[#allocation13_spill] sm:$0xff] }
 0x3c1   :  { %v6418_v17 = vpop.f32.mrf.mxu1  ;;  %v3120_v25 = vpop.f32.mrf.mxu0  ;;  %v2235_v41 = vadd.f32 %v6336_v29, %v2103_v48  ;;  %v2366_v39 = vadd.f32 %v6342_v59, %v2234_v33 }
 0x3c2   :  { %v2365_v63 = vadd.f32 %v6338_v58, %v2233_v31  ;;  %v2490_v36 = vadd.f32 %v2468_v1, %v2364_v11  ;;  %v2753_v2 = vadd.f32 %v2730_v30, %v2621_v35  ;;  %v2236_v4 = vadd.f32 %v6340_v60, %v2104_v7  ;;  %v7196_v11 = vld [vmem:[#allocation7_spill] sm:$0xff] }
 0x3c3   :  { %v6425_v44 = vpop.f32.mrf.mxu1  ;;  %v3122_v42 = vpop.f32.mrf.mxu0  ;;  %v2367_v29 = vadd.f32 %v6346_v61, %v2235_v41  ;;  %v2492_v43 = vadd.f32 %v6358_v38, %v2366_v39  ;;  %v2237_v30 = vadd.f32 %v6344_v54, %v2105_v23  ;;  %v7200_v39 = vld [vmem:[#allocation9_spill] sm:$0xff] }
 0x3c4   :  { %v2491_v26 = vadd.f32 %v6356_v12, %v2365_v63  ;;  %v2622_v58 = vadd.f32 %v6360_v10, %v2490_v36  ;;  %v2885_v45 = vadd.f32 %v2862_v0, %v2753_v2  ;;  %v2106_v10 = vadd.f32 %v6330_v34, %v1974_v50  ;;  %v7191_v0 = vld [vmem:[#allocation5_spill] sm:$0xff]  ;;  %v7199_v36 = vld [vmem:[#allocation14_spill] sm:$0xff]  ;;  %v7203_v50 = vld [vmem:[#allocation15_spill] sm:$0xff] }
 0x3c5   :  { %v6432_v20 = vpop.f32.mrf.mxu1  ;;  %v6434_v55 = vpop.f32.mrf.mxu0  ;;  %v2368_v62 = vadd.f32 %v6350_v28, %v2236_v4  ;;  %v2493_v53 = vadd.f32 %v6362_v32, %v2367_v29  ;;  %v2624_v61 = vadd.f32 %v6368_v46, %v2492_v43  ;;  %v2369_v34 = vadd.f32 %v6352_v18, %v2237_v30 }
 0x3c6   :  { %v2623_v59 = vadd.f32 %v6364_v5, %v2491_v26  ;;  %v2754_v12 = vadd.f32 %v2732_v15, %v2622_v58  ;;  %v3017_v5 = vadd.f32 %v2994_v14, %v2885_v45  ;;  %v2238_v15 = vadd.f32 %v6348_v9, %v2106_v10  ;;  %v7202_v58 = vld [vmem:[#allocation12_spill] sm:$0xff]  ;;  %v7204_v10 = vld [vmem:[#allocation23_spill] sm:$0xff] }
 0x3c7   :  { %v6442_v57 = vpop.f32.mrf.mxu1  ;;  %v6444_v47 = vpop.f32.mrf.mxu0  ;;  %v2494_v54 = vadd.f32 %v7191_v0, %v2368_v62  ;;  %v2625_v28 = vadd.f32 %v7192_v51, %v2493_v53  ;;  %v2756_v8 = vadd.f32 %v7193_v40, %v2624_v61  ;;  %v2495_v9 = vadd.f32 %v7196_v11, %v2369_v34  ;;  %v7206_v62 = vld [vmem:[#allocation25_spill] sm:$0xff] }
 0x3c8   :  { %v2755_v52 = vadd.f32 %v6382_v13, %v2623_v59  ;;  %v2886_v38 = vadd.f32 %v6386_v16, %v2754_v12  ;;  %v3143_v31 = vadd.f32 %v3120_v25, %v3017_v5  ;;  %v7195_v16 = vld [vmem:[#allocation16_spill] sm:$0xff] }
 0x3c9   :  { %v6456_v1 = vpop.f32.mrf.mxu1  ;;  %v3132_v3 = vpop.f32.mrf.mxu0  ;;  %v2370_v14 = vadd.f32 %v7195_v16, %v2238_v15  ;;  %v2626_v18 = vadd.f32 %v7197_v22, %v2494_v54  ;;  %v2757_v48 = vadd.f32 %v7198_v27, %v2625_v28  ;;  %v2888_v35 = vadd.f32 %v7199_v36, %v2756_v8 }
 0x3ca   :  { %v2887_v46 = vadd.f32 %v7194_v49, %v2755_v52  ;;  %v3018_v13 = vadd.f32 %v6413_v56, %v2886_v38  ;;  %v7201_v56 = vld [vmem:[#allocation11_spill] sm:$0xff]  ;;  %v3422_v38 = vpop.permute.xlu1 %3421 }
 0x3cb   :  { %v6464_v24 = vpop.f32.mrf.mxu1  ;;  %v3134_v60 = vpop.f32.mrf.mxu0  ;;  %v2496_v26 = vadd.f32 %v7200_v39, %v2370_v14  ;;  %v2627_v25 = vadd.f32 %v7201_v56, %v2495_v9  ;;  %v2758_v2 = vadd.f32 %v7202_v58, %v2626_v18  ;;  %v2889_v23 = vadd.f32 %v7203_v50, %v2757_v48 }
 0x3cc   :  { %v3019_v37 = vadd.f32 %v6418_v17, %v2887_v46  ;;  %v3144_v7 = vadd.f32 %v3122_v42, %v3018_v13  ;;  %v3020_v43 = vadd.f32 %v6425_v44, %v2888_v35  ;;  %v7205_v42 = vld [vmem:[#allocation19_spill] sm:$0xff]  ;;  %v7207_v44 = vld [vmem:[#allocation20_spill] sm:$0xff]  ;;  %v3432_v48 = vpop.permute.xlu0 %3431 }
 0x3cd   :  { %v3138_v6 = vpop.f32.mrf.mxu0  ;;  %v3252_v32 = vpop.f32.mrf.mxu1  ;;  %v2628_v17 = vadd.f32 %v7204_v10, %v2496_v26  ;;  %v2759_v30 = vadd.f32 %v7205_v42, %v2627_v25  ;;  %v2890_v53 = vadd.f32 %v7206_v62, %v2758_v2  ;;  %v3021_v5 = vadd.f32 %v6432_v20, %v2889_v23  ;;  %v7209_v20 = vld [vmem:[#allocation27_spill] sm:$0xff] }
 0x3ce   :  { %v3275_v41 = vadd.f32 %v3252_v32, %v3143_v31  ;;  %v3145_v59 = vadd.f32 %v6434_v55, %v3019_v37  ;;  %v3146_v15 = vadd.f32 %v6444_v47, %v3020_v43  ;;  %v7208_v55 = vld [vmem:[#allocation21_spill] sm:$0xff] }
 0x3cf   :  { %v3140_v33 = vpop.f32.mrf.mxu0  ;;  %v3254_v63 = vpop.f32.mrf.mxu1  ;;  %v2760_v54 = vadd.f32 %v7207_v44, %v2628_v17  ;;  %v2891_v51 = vadd.f32 %v7208_v55, %v2759_v30  ;;  %v3022_v28 = vadd.f32 %v6442_v57, %v2890_v53  ;;  %v3147_v49 = vadd.f32 %v3132_v3, %v3021_v5  ;;  %v6510_v53 = vld [vmem:[%s7109_s7 + $0x8] sm:$0xff] }
 0x3d0   :  { %v3276_v12 = vadd.f32 %v3254_v63, %v3144_v7 }
 0x3d1   :  { %v3258_v4 = vpop.f32.mrf.mxu1  ;;  %v3384_v29 = vpop.f32.mrf.mxu0  ;;  %v2892_v16 = vadd.f32 %v7209_v20, %v2760_v54  ;;  %v3023_v47 = vadd.f32 %v6456_v1, %v2891_v51  ;;  %v3148_v14 = vadd.f32 %v3134_v60, %v3022_v28 }
 0x3d2   :  { %v3407_v45 = vadd.f32 %v3384_v29, %v3275_v41  ;;  %v3277_v34 = vadd.f32 %v3258_v4, %v3145_v59 }
 0x3d3   :  { %v3260_v61 = vpop.f32.mrf.mxu1  ;;  %v3386_v52 = vpop.f32.mrf.mxu0  ;;  %v3024_v63 = vadd.f32 %v6464_v24, %v2892_v16  ;;  %v3149_v37 = vadd.f32 %v3138_v6, %v3023_v47 }
 0x3d4   :  { %v3408_v0 = vadd.f32 %v3386_v52, %v3276_v12  ;;  %v6496_v32 = vadd.f32 %v3422_v38, %v3407_v45  ;;  %v3278_v46 = vadd.f32 %v3260_v61, %v3146_v15  ;;  %v6516_v61 = vpop.permute.xlu1 %3540 }
 0x3d5   :  { %v3264_v40 = vpop.f32.mrf.mxu1  ;;  %v3390_v8 = vpop.f32.mrf.mxu0  ;;  %v3150_v1 = vadd.f32 %v3140_v33, %v3024_v63 }
 0x3d6   :  { %v6498_v13 = vadd.f32 %v3422_v38, %v3408_v0  ;;  %v3409_v31 = vadd.f32 %v3390_v8, %v3277_v34  ;;  %v3279_v18 = vadd.f32 %v3264_v40, %v3147_v49  ;;  %v3447_v3 = vmax.f32 %v6496_v32, 0.0 }
 0x3d7   :  { %v3266_v11 = vpop.f32.mrf.mxu1  ;;  %v3392_v9 = vpop.f32.mrf.mxu0 }
 0x3d8   :  { %v3448_v22 = vmax.f32 %v6498_v13, 0.0  ;;  %v3441_v57 = vadd.f32 %v3427_v19, %v3409_v31  ;;  %v3410_v27 = vadd.f32 %v3392_v9, %v3278_v46  ;;  %v3280_v7 = vadd.f32 %v3266_v11, %v3148_v14  ;;  %v6520_v52 = vpop.permute.xlu1 %3572 }
 0x3d9   :  { %v3270_v36 = vpop.f32.mrf.mxu1  ;;  %v3396_v35 = vpop.f32.mrf.mxu0 }
 0x3da   :  { %v3442_v41 = vadd.f32 %v3427_v19, %v3410_v27  ;;  %v3411_v39 = vadd.f32 %v3396_v35, %v3279_v18  ;;  %v3449_v60 = vmax.f32 %v3441_v57, 0.0  ;;  %v3455_v25 = vadd.f32 %v3448_v22, %v3447_v3 }
 0x3db   :  { %v3272_v26 = vpop.f32.mrf.mxu1  ;;  %v3398_v56 = vpop.f32.mrf.mxu0  ;;  %v3281_v2 = vadd.f32 %v3270_v36, %v3149_v37 }
 0x3dc   :  { %v3450_v58 = vmax.f32 %v3442_v41, 0.0  ;;  %v3443_v50 = vadd.f32 %v3432_v48, %v3411_v39  ;;  %v3412_v23 = vadd.f32 %v3398_v56, %v3280_v7  ;;  %3456 = vadd.xlane.f32.xlu0 %v3455_v25  ;;  %v3282_v24 = vadd.f32 %v3272_v26, %v3150_v1  ;;  %v6524_v5 = vpop.permute.xlu1 %3530 }
 0x3dd   :  { %v3402_v4 = vpop.f32.mrf.mxu0 }
 0x3de   :  { %v3444_v29 = vadd.f32 %v3432_v48, %v3412_v23  ;;  %v3413_v43 = vadd.f32 %v3402_v4, %v3281_v2  ;;  %v3458_v59 = vadd.f32 %v3450_v58, %v3449_v60  ;;  %v3451_v6 = vmax.f32 %v3443_v50, 0.0 }
 0x3df   :  { %v3404_v12 = vpop.f32.mrf.mxu0 }
 0x3e0   :  { %v3452_v45 = vmax.f32 %v3444_v29, 0.0  ;;  %v3445_v19 = vadd.f32 %v6446_v21, %v3413_v43  ;;  %v3414_v33 = vadd.f32 %v3404_v12, %v3282_v24  ;;  %3459 = vadd.xlane.f32.xlu0 %v3458_v59  ;;  %v3526_v0 = vpop.permute.xlu1 %3525 }
 0x3e2   :  { %v3446_v10 = vadd.f32 %v6446_v21, %v3414_v33  ;;  %v3461_v17 = vadd.f32 %v3452_v45, %v3451_v6  ;;  %v3453_v42 = vmax.f32 %v3445_v19, 0.0  ;;  %v6518_v21 = vpop.permute.xlu0 %3535 }
 0x3e4   :  { %v3454_v30 = vmax.f32 %v3446_v10, 0.0  ;;  %3462 = vadd.xlane.f32.xlu1 %v3461_v17  ;;  %v3558_v54 = vpop.permute.xlu1 %3557 }
 0x3e6   :  { %v3464_v62 = vadd.f32 %v3454_v30, %v3453_v42  ;;  %v6522_v38 = vpop.permute.xlu0 %3567 }
 0x3e8   :  { %3465 = vadd.xlane.f32.xlu0 %v3464_v62  ;;  %v6532_v28 = vpop.permute.xlu1 %4012 }
 0x3ea   :  { %v6526_v15 = vpop.permute.xlu0 %3562 }
 0x3ee   :  { %v6528_v34 = vpop.permute.xlu0 %3642 }
 0x3f2   :  { %v6530_v44 = vpop.permute.xlu0 %3887 }
 0x3f5   :  { %4379 = vrot.lane.b32.xlu1 %v6510_v53, %s5089_s25  ;;  %s5103_s25 = smov 17  }
 0x3fe   :  { %4254 = vrot.lane.b32.xlu0 %v6510_v53, %s5068_s26 }
 0x465   :  { %v3457_v55 = vpop.xlane.xlu0 %3456 }
 0x466   :  { %v3467_v51 = vmul.f32 0.00390625, %v3457_v55 }
 0x468   :  { %v3471_v32 = vsub.f32 %v3447_v3, %v3467_v51  ;;  %v3472_v40 = vsub.f32 %v3448_v22, %v3467_v51 }
 0x469   :  { %v3460_v8 = vpop.xlane.xlu0 %3459 }
 0x46a   :  { %v3479_v49 = vmul.f32 %v3471_v32, %v3471_v32  ;;  %v3480_v46 = vmul.f32 %v3472_v40, %v3472_v40  ;;  %v3468_v13 = vmul.f32 0.00390625, %v3460_v8 }
 0x46c   :  { %v3473_v31 = vsub.f32 %v3449_v60, %v3468_v13  ;;  %v3474_v20 = vsub.f32 %v3450_v58, %v3468_v13  ;;  %v3487_v47 = vadd.f32 %v3480_v46, %v3479_v49 }
 0x46d   :  { %v3463_v16 = vpop.xlane.xlu1 %3462 }
 0x46e   :  { %v3469_v14 = vmul.f32 0.00390625, %v3463_v16  ;;  %v3481_v11 = vmul.f32 %v3473_v31, %v3473_v31  ;;  %v3482_v9 = vmul.f32 %v3474_v20, %v3474_v20  ;;  %3488 = vadd.xlane.f32.xlu0 %v3487_v47 }
 0x470   :  { %v3475_v18 = vsub.f32 %v3451_v6, %v3469_v14  ;;  %v3476_v57 = vsub.f32 %v3452_v45, %v3469_v14  ;;  %v3490_v48 = vadd.f32 %v3482_v9, %v3481_v11 }
 0x471   :  { %v3466_v27 = vpop.xlane.xlu0 %3465  ;;  %v6536_v60 = vpop.permute.xlu1 %4379 }
 0x472   :  { %v3483_v63 = vmul.f32 %v3475_v18, %v3475_v18  ;;  %v3484_v36 = vmul.f32 %v3476_v57, %v3476_v57  ;;  %v3470_v3 = vmul.f32 0.00390625, %v3466_v27  ;;  %3491 = vadd.xlane.f32.xlu1 %v3490_v48  ;;  %7211 = vst [vmem:[#allocation26_spill] sm:$0xff] %v6536_v60 }
 0x474   :  { %v3477_v22 = vsub.f32 %v3453_v42, %v3470_v3  ;;  %v3478_v35 = vsub.f32 %v3454_v30, %v3470_v3  ;;  %v3493_v37 = vadd.f32 %v3484_v36, %v3483_v63 }
 0x475   :  { %v6534_v1 = vpop.permute.xlu0 %4254 }
 0x476   :  { %v3485_v7 = vmul.f32 %v3477_v22, %v3477_v22  ;;  %v3486_v41 = vmul.f32 %v3478_v35, %v3478_v35  ;;  %3494 = vadd.xlane.f32.xlu0 %v3493_v37  ;;  %7210 = vst [vmem:[#allocation22_spill] sm:$0xff] %v6534_v1 }
 0x478   :  { %v3496_v39 = vadd.f32 %v3486_v41, %v3485_v7 }
 0x47a   :  { %3497 = vadd.xlane.f32.xlu1 %v3496_v39 }
 0x4f7   :  { %v3489_v26 = vpop.xlane.xlu0 %3488 }
 0x4f8   :  { %v3499_v56 = vmul.f32 0.00390625, %v3489_v26 }
 0x4fa   :  { %v3503_v25 = vadd.f32 1e-05, %v3499_v56 }
 0x4fb   :  { %v3492_v58 = vpop.xlane.xlu1 %3491 }
 0x4fc   :  { %5017 = vrsqrt.f32 %v3503_v25  ;;  %v3500_v2 = vmul.f32 0.00390625, %v3492_v58 }
 0x4fe   :  { %v3504_v50 = vadd.f32 1e-05, %v3500_v2 }
 0x4ff   :  { %v3495_v23 = vpop.xlane.xlu0 %3494 }
 0x500   :  { %v3501_v4 = vmul.f32 0.00390625, %v3495_v23  ;;  %5019 = vrsqrt.f32 %v3504_v50 }
 0x502   :  { %v3505_v24 = vadd.f32 1e-05, %v3501_v4 }
 0x503   :  { %v3498_v29 = vpop.xlane.xlu1 %3497 }
 0x504   :  { %5021 = vrsqrt.f32 %v3505_v24  ;;  %v3502_v43 = vmul.f32 0.00390625, %v3498_v29 }
 0x506   :  { %v3506_v59 = vadd.f32 1e-05, %v3502_v43 }
 0x508   :  { %5023 = vrsqrt.f32 %v3506_v59 }
 0x509   :  { %v5018_v12 = vpop.eup %5017 }
 0x50a   :  { %v3512_v6 = vmul.f32 %v5018_v12, %v3472_v40  ;;  %v3511_v45 = vmul.f32 %v5018_v12, %v3471_v32 }
 0x50c   :  { %v3544_v19 = vmul.f32 %v3526_v0, %v3512_v6  ;;  %v3543_v33 = vmul.f32 %v3526_v0, %v3511_v45 }
 0x50d   :  { %v5020_v10 = vpop.eup %5019 }
 0x50e   :  { %v3576_v17 = vadd.f32 %v3558_v54, %v3544_v19  ;;  %v3575_v42 = vadd.f32 %v3558_v54, %v3543_v33  ;;  %v3514_v30 = vmul.f32 %v5020_v10, %v3474_v20  ;;  %v3513_v62 = vmul.f32 %v5020_v10, %v3473_v31 }
 0x510   :  { %3593 = vrot.lane.b32.xlu1 %v3576_v17, %s5103_s25  ;;  %3591 = vrot.lane.b32.xlu0 %v3575_v42, %s5103_s25  ;;  %v3546_v51 = vmul.f32 %v6524_v5, %v3514_v30  ;;  %v3545_v8 = vmul.f32 %v6524_v5, %v3513_v62 }
 0x511   :  { %v5022_v55 = vpop.eup %5021 }
 0x512   :  { %v3516_v49 = vmul.f32 %v5022_v55, %v3476_v57  ;;  %v3515_v46 = vmul.f32 %v5022_v55, %v3475_v18  ;;  %v3578_v40 = vadd.f32 %v6526_v15, %v3546_v51  ;;  %v3577_v32 = vadd.f32 %v6526_v15, %v3545_v8 }
 0x514   :  { %v3548_v0 = vmul.f32 %v6518_v21, %v3516_v49  ;;  %v3547_v54 = vmul.f32 %v6518_v21, %v3515_v46  ;;  %3597 = vrot.lane.b32.xlu1 %v3578_v40, %s5103_s25  ;;  %3595 = vrot.lane.b32.xlu0 %v3577_v32, %s5103_s25 }
 0x515   :  { %v5024_v13 = vpop.eup %5023 }
 0x516   :  { %v3580_v31 = vadd.f32 %v6522_v38, %v3548_v0  ;;  %v3579_v20 = vadd.f32 %v6522_v38, %v3547_v54  ;;  %v3518_v16 = vmul.f32 %v5024_v13, %v3478_v35  ;;  %v3517_v47 = vmul.f32 %v5024_v13, %v3477_v22 }
 0x518   :  { %v3550_v5 = vmul.f32 %v6516_v61, %v3518_v16  ;;  %v3549_v14 = vmul.f32 %v6516_v61, %v3517_v47  ;;  %3601 = vrot.lane.b32.xlu1 %v3580_v31, %s5103_s25  ;;  %3599 = vrot.lane.b32.xlu0 %v3579_v20, %s5103_s25 }
 0x51a   :  { %v3582_v15 = vadd.f32 %v6520_v52, %v3550_v5  ;;  %v3581_v11 = vadd.f32 %v6520_v52, %v3549_v14 }
 0x51c   :  { %3605 = vrot.lane.b32.xlu1 %v3582_v15, %s5103_s25  ;;  %3603 = vrot.lane.b32.xlu0 %v3581_v11, %s5103_s25 }
 0x582   :  { %v3594_v21 = vpop.permute.xlu1 %3593  ;;  %v3592_v9 = vpop.permute.xlu0 %3591 }
 0x583   :  { %v6551_v18 = vsel %vm3607_vm0, %v3594_v21, 0.0  ;;  %v6554_v38 = vsel %vm3607_vm0, %v3592_v9, %v3594_v21  ;;  %v6561_v61 = vsel %vm3607_vm0, 0.0, %v3592_v9 }
 0x584   :  { %3656 = vrot.lane.b32.xlu0 %v6551_v18, %s5078_s0  ;;  %3654 = vrot.lane.b32.xlu1 %v6554_v38, %s5078_s0 }
 0x586   :  { %v3598_v52 = vpop.permute.xlu1 %3597  ;;  %v3596_v27 = vpop.permute.xlu0 %3595 }
 0x587   :  { %v3629_v57 = vsel %vm3607_vm0, %v3598_v52, 0.0  ;;  %v6604_v48 = vsel %vm3607_vm0, %v3596_v27, %v3598_v52  ;;  %v6611_v63 = vsel %vm3607_vm0, 0.0, %v3596_v27 }
 0x588   :  { %3841 = vrot.lane.b32.xlu0 %v6554_v38, %s5077_s14  ;;  %3652 = vrot.lane.b32.xlu1 %v6561_v61, %s5078_s0 }
 0x58a   :  { %v3602_v36 = vpop.permute.xlu1 %3601  ;;  %v3600_v3 = vpop.permute.xlu0 %3599 }
 0x58b   :  { %v6647_v22 = vsel %vm3607_vm0, %v3600_v3, %v3602_v36  ;;  %v3630_v35 = vsel %vm3607_vm0, %v3602_v36, 0.0  ;;  %v6655_v37 = vsel %vm3607_vm0, 0.0, %v3600_v3 }
 0x58c   :  { %3839 = vrot.lane.b32.xlu0 %v6561_v61, %s5077_s14  ;;  %3843 = vrot.lane.b32.xlu1 %v6551_v18, %s5077_s14 }
 0x58e   :  { %v3606_v7 = vpop.permute.xlu1 %3605  ;;  %v3604_v41 = vpop.permute.xlu0 %3603 }
 0x58f   :  { %v3631_v10 = vsel %vm3607_vm0, %v3606_v7, 0.0  ;;  %v6719_v62 = vsel %vm3607_vm0, %v3604_v41, %v3606_v7  ;;  %v6732_v46 = vsel %vm3607_vm0, 0.0, %v3604_v41  ;;  %vm7223_vm0 = vmmov %vm7212_vm5 }
 0x590   :  { %3968 = vrot.lane.b32.xlu0 %v6551_v18, %s5064_s23  ;;  %3966 = vrot.lane.b32.xlu1 %v6554_v38, %s5064_s23 }
 0x594   :  { %4094 = vrot.lane.b32.xlu0 %v6551_v18, %s5083_s18  ;;  %3964 = vrot.lane.b32.xlu1 %v6561_v61, %s5064_s23 }
 0x598   :  { %4208 = vrot.lane.b32.xlu0 %v6554_v38, %s5080_s17  ;;  %4092 = vrot.lane.b32.xlu1 %v6554_v38, %s5083_s18 }
 0x59c   :  { %4206 = vrot.lane.b32.xlu0 %v6561_v61, %s5080_s17  ;;  %4090 = vrot.lane.b32.xlu1 %v6561_v61, %s5083_s18 }
 0x5a0   :  { %4333 = vrot.lane.b32.xlu0 %v6554_v38, %s5068_s26  ;;  %4210 = vrot.lane.b32.xlu1 %v6551_v18, %s5080_s17 }
 0x5a4   :  { %4331 = vrot.lane.b32.xlu0 %v6561_v61, %s5068_s26  ;;  %4335 = vrot.lane.b32.xlu1 %v6551_v18, %s5068_s26 }
 0x5a8   :  { %4460 = vrot.lane.b32.xlu0 %v6554_v38, %s5085_s19  ;;  %4462 = vrot.lane.b32.xlu1 %v6551_v18, %s5085_s19 }
 0x5ac   :  { %4458 = vrot.lane.b32.xlu0 %v6561_v61, %s5085_s19  ;;  %3662 = vrot.lane.b32.xlu1 %v3629_v57, %s5078_s0 }
 0x5b0   :  { %3847 = vrot.lane.b32.xlu1 %v6604_v48, %s5077_s14  ;;  %3660 = vrot.lane.b32.xlu0 %v6604_v48, %s5078_s0 }
 0x5b4   :  { %3845 = vrot.lane.b32.xlu1 %v6611_v63, %s5077_s14  ;;  %3658 = vrot.lane.b32.xlu0 %v6611_v63, %s5078_s0 }
 0x5b8   :  { %3972 = vrot.lane.b32.xlu1 %v6604_v48, %s5064_s23  ;;  %3849 = vrot.lane.b32.xlu0 %v3629_v57, %s5077_s14 }
 0x5bc   :  { %3970 = vrot.lane.b32.xlu1 %v6611_v63, %s5064_s23  ;;  %3974 = vrot.lane.b32.xlu0 %v3629_v57, %s5064_s23 }
 0x5c0   :  { %4098 = vrot.lane.b32.xlu1 %v6604_v48, %s5083_s18  ;;  %4100 = vrot.lane.b32.xlu0 %v3629_v57, %s5083_s18 }
 0x5c4   :  { %4216 = vrot.lane.b32.xlu1 %v3629_v57, %s5080_s17  ;;  %4096 = vrot.lane.b32.xlu0 %v6611_v63, %s5083_s18 }
 0x5c8   :  { %4341 = vrot.lane.b32.xlu1 %v3629_v57, %s5068_s26  ;;  %4214 = vrot.lane.b32.xlu0 %v6604_v48, %s5080_s17 }
 0x5cc   :  { %4337 = vrot.lane.b32.xlu1 %v6611_v63, %s5068_s26  ;;  %4212 = vrot.lane.b32.xlu0 %v6611_v63, %s5080_s17 }
 0x5d0   :  { %4468 = vrot.lane.b32.xlu1 %v3629_v57, %s5085_s19  ;;  %4339 = vrot.lane.b32.xlu0 %v6604_v48, %s5068_s26 }
 0x5d4   :  { %4583 = vrot.lane.b32.xlu1 %v3629_v57, %s5082_s1  ;;  %4466 = vrot.lane.b32.xlu0 %v6604_v48, %s5085_s19 }
 0x5d8   :  { %4579 = vrot.lane.b32.xlu1 %v6611_v63, %s5082_s1  ;;  %4464 = vrot.lane.b32.xlu0 %v6611_v63, %s5085_s19 }
 0x5dc   :  { %4581 = vrot.lane.b32.xlu0 %v6604_v48, %s5082_s1  ;;  %3666 = vrot.lane.b32.xlu1 %v6647_v22, %s5078_s0 }
 0x5e0   :  { %3668 = vrot.lane.b32.xlu0 %v3630_v35, %s5078_s0  ;;  %3664 = vrot.lane.b32.xlu1 %v6655_v37, %s5078_s0 }
 0x5e4   :  { %3853 = vrot.lane.b32.xlu0 %v6647_v22, %s5077_s14  ;;  %3855 = vrot.lane.b32.xlu1 %v3630_v35, %s5077_s14 }
 0x5e8   :  { %3851 = vrot.lane.b32.xlu0 %v6655_v37, %s5077_s14  ;;  %3980 = vrot.lane.b32.xlu1 %v3630_v35, %s5064_s23 }
 0x5ec   :  { %3978 = vrot.lane.b32.xlu0 %v6647_v22, %s5064_s23  ;;  %4104 = vrot.lane.b32.xlu1 %v6647_v22, %s5083_s18 }
 0x5f0   :  { %3976 = vrot.lane.b32.xlu0 %v6655_v37, %s5064_s23  ;;  %4222 = vrot.lane.b32.xlu1 %v3630_v35, %s5080_s17 }
 0x5f4   :  { %4106 = vrot.lane.b32.xlu0 %v3630_v35, %s5083_s18  ;;  %4347 = vrot.lane.b32.xlu1 %v3630_v35, %s5068_s26 }
 0x5f6   :  { %v3655_v39 = vpop.permute.xlu1 %3654  ;;  %v3657_v26 = vpop.permute.xlu0 %3656 }
 0x5f7   :  { %v6676_v56 = vsel %vm175_vm2, %v3655_v39, %v3657_v26 }
 0x5f8   :  { %4102 = vrot.lane.b32.xlu0 %v6655_v37, %s5083_s18  ;;  %4343 = vrot.lane.b32.xlu1 %v6655_v37, %s5068_s26 }
 0x5fa   :  { %v3653_v25 = vpop.permute.xlu1 %3652  ;;  %v3842_v58 = vpop.permute.xlu0 %3841 }
 0x5fb   :  { %v6683_v2 = vsel %vm175_vm2, %v3653_v25, %v3655_v39 }
 0x5fc   :  { %4220 = vrot.lane.b32.xlu0 %v6647_v22, %s5080_s17  ;;  %4472 = vrot.lane.b32.xlu1 %v6647_v22, %s5085_s19 }
 0x5fe   :  { %v3844_v50 = vpop.permute.xlu1 %3843  ;;  %v3840_v23 = vpop.permute.xlu0 %3839 }
 0x5ff   :  { %v6690_v4 = vsel %vm415_vm8, %v3842_v58, %v3844_v50  ;;  %v6693_v24 = vsel %vm415_vm8, %v3840_v23, %v3842_v58 }
 0x600   :  { %4218 = vrot.lane.b32.xlu0 %v6655_v37, %s5080_s17  ;;  %4470 = vrot.lane.b32.xlu1 %v6655_v37, %s5085_s19 }
 0x602   :  { %v3967_v29 = vpop.permute.xlu1 %3966  ;;  %v3969_v43 = vpop.permute.xlu0 %3968 }
 0x603   :  { %v6700_v59 = vsel %vm805_vm15, %v3967_v29, %v3969_v43 }
 0x604   :  { %4345 = vrot.lane.b32.xlu0 %v6647_v22, %s5068_s26  ;;  %4589 = vrot.lane.b32.xlu1 %v3630_v35, %s5082_s1 }
 0x606   :  { %v3965_v12 = vpop.permute.xlu1 %3964  ;;  %v4095_v6 = vpop.permute.xlu0 %4094 }
 0x607   :  { %v6706_v45 = vsel %vm805_vm15, %v3965_v12, %v3967_v29 }
 0x608   :  { %4474 = vrot.lane.b32.xlu0 %v3630_v35, %s5085_s19  ;;  %4585 = vrot.lane.b32.xlu1 %v6655_v37, %s5082_s1 }
 0x60a   :  { %v4093_v19 = vpop.permute.xlu1 %4092  ;;  %v4209_v33 = vpop.permute.xlu0 %4208 }
 0x60b   :  { %v6713_v17 = vsel %vm937_vm1, %v4093_v19, %v4095_v6 }
 0x60c   :  { %4587 = vrot.lane.b32.xlu0 %v6647_v22, %s5082_s1  ;;  %3674 = vrot.lane.b32.xlu1 %v3631_v10, %s5078_s0 }
 0x60e   :  { %v4091_v42 = vpop.permute.xlu1 %4090  ;;  %v4207_v30 = vpop.permute.xlu0 %4206 }
 0x60f   :  { %v6722_v55 = vsel %vm937_vm1, %v4091_v42, %v4093_v19  ;;  %v6725_v51 = vsel %vm7212_vm5, %v4207_v30, %v4209_v33  ;;  %v4698_v30 = vld [vmem:[%s7110_s8] sm:$0xff]  ;;  %vm7224_vm5 = vmmov %vm7216_vm6 }
 0x610   :  { %3859 = vrot.lane.b32.xlu1 %v6719_v62, %s5077_s14  ;;  %3672 = vrot.lane.b32.xlu0 %v6719_v62, %s5078_s0 }
 0x612   :  { %v4211_v8 = vpop.permute.xlu1 %4210  ;;  %v4334_v49 = vpop.permute.xlu0 %4333 }
 0x613   :  { %v6735_v40 = vsel %vm7213_vm13, %v4209_v33, %v4211_v8  ;;  %vm7225_vm13 = vmmov %vm7224_vm5 }
 0x614   :  { %3857 = vrot.lane.b32.xlu1 %v6732_v46, %s5077_s14  ;;  %3670 = vrot.lane.b32.xlu0 %v6732_v46, %s5078_s0 }
 0x616   :  { %v4336_v32 = vpop.permute.xlu1 %4335  ;;  %v4332_v0 = vpop.permute.xlu0 %4331 }
 0x617   :  { %v6742_v54 = vsel %vm7214_vm14, %v4334_v49, %v4336_v32  ;;  %v6745_v13 = vsel %vm7216_vm6, %v4332_v0, %v4334_v49  ;;  %vm7226_vm14 = vmmov %vm7218_vm7 }
 0x618   :  { %7215 = vst [vmem:[#allocation28_spill] sm:$0xff] %v6742_v54  ;;  %7217 = vst [vmem:[#allocation5_spill] sm:$0xff] %v6745_v13  ;;  %3986 = vrot.lane.b32.xlu1 %v3631_v10, %s5064_s23  ;;  %3861 = vrot.lane.b32.xlu0 %v3631_v10, %s5077_s14 }
 0x619   :  { %vm7228_vm6 = vmmov %vm7218_vm7 }
 0x61a   :  { %v4463_v31 = vpop.permute.xlu1 %4462  ;;  %v4461_v20 = vpop.permute.xlu0 %4460 }
 0x61b   :  { %v6750_v16 = vsel %vm7218_vm7, %v4461_v20, %v4463_v31  ;;  %vm7230_vm7 = vcmask 769024  }
 0x61c   :  { %7219 = vst [vmem:[#allocation6_spill] sm:$0xff] %v6750_v16  ;;  %3982 = vrot.lane.b32.xlu1 %v6732_v46, %s5064_s23  ;;  %3984 = vrot.lane.b32.xlu0 %v6719_v62, %s5064_s23 }
 0x61e   :  { %v3663_v47 = vpop.permute.xlu1 %3662  ;;  %v4459_v5 = vpop.permute.xlu0 %4458 }
 0x61f   :  { %v6757_v14 = vsel %vm7220_vm9, %v4459_v5, %v4461_v20  ;;  %vm7232_vm9 = vmmov %vm7230_vm7 }
 0x620   :  { %7221 = vst [vmem:[#allocation10_spill] sm:$0xff] %v6757_v14  ;;  %4112 = vrot.lane.b32.xlu1 %v3631_v10, %s5083_s18  ;;  %4110 = vrot.lane.b32.xlu0 %v6719_v62, %s5083_s18 }
 0x622   :  { %v3848_v15 = vpop.permute.xlu1 %3847  ;;  %v3661_v11 = vpop.permute.xlu0 %3660 }
 0x623   :  { %v6763_v21 = vsel %vm175_vm2, %v3661_v11, %v3663_v47 }
 0x624   :  { %4108 = vrot.lane.b32.xlu1 %v6732_v46, %s5083_s18  ;;  %4228 = vrot.lane.b32.xlu0 %v3631_v10, %s5080_s17 }
 0x626   :  { %v3846_v9 = vpop.permute.xlu1 %3845  ;;  %v3659_v52 = vpop.permute.xlu0 %3658 }
 0x627   :  { %v6769_v57 = vsel %vm415_vm8, %v3846_v9, %v3848_v15  ;;  %v6772_v27 = vsel %vm175_vm2, %v3659_v52, %v3661_v11 }
 0x628   :  { %4226 = vrot.lane.b32.xlu1 %v6719_v62, %s5080_s17  ;;  %4224 = vrot.lane.b32.xlu0 %v6732_v46, %s5080_s17 }
 0x62a   :  { %v3973_v36 = vpop.permute.xlu1 %3972  ;;  %v3850_v3 = vpop.permute.xlu0 %3849 }
 0x62b   :  { %v6779_v35 = vsel %vm415_vm8, %v3848_v15, %v3850_v3 }
 0x62c   :  { %4353 = vrot.lane.b32.xlu1 %v3631_v10, %s5068_s26  ;;  %4351 = vrot.lane.b32.xlu0 %v6719_v62, %s5068_s26 }
 0x62e   :  { %v3971_v7 = vpop.permute.xlu1 %3970  ;;  %v3975_v41 = vpop.permute.xlu0 %3974 }
 0x62f   :  { %v6785_v39 = vsel %vm805_vm15, %v3971_v7, %v3973_v36  ;;  %v6788_v26 = vsel %vm805_vm15, %v3973_v36, %v3975_v41 }
 0x630   :  { %4349 = vrot.lane.b32.xlu1 %v6732_v46, %s5068_s26  ;;  %4478 = vrot.lane.b32.xlu0 %v6719_v62, %s5085_s19 }
 0x632   :  { %v4099_v25 = vpop.permute.xlu1 %4098  ;;  %v4101_v58 = vpop.permute.xlu0 %4100 }
 0x633   :  { %v6795_v50 = vsel %vm937_vm1, %v4099_v25, %v4101_v58 }
 0x634   :  { %4480 = vrot.lane.b32.xlu1 %v3631_v10, %s5085_s19  ;;  %4595 = vrot.lane.b32.xlu0 %v3631_v10, %s5082_s1 }
 0x636   :  { %v4217_v23 = vpop.permute.xlu1 %4216  ;;  %v4097_v29 = vpop.permute.xlu0 %4096 }
 0x637   :  { %v6800_v43 = vsel %vm937_vm1, %v4097_v29, %v4099_v25 }
 0x638   :  { %4476 = vrot.lane.b32.xlu1 %v6732_v46, %s5085_s19  ;;  %4591 = vrot.lane.b32.xlu0 %v6732_v46, %s5082_s1 }
 0x63a   :  { %v4342_v12 = vpop.permute.xlu1 %4341  ;;  %v4215_v6 = vpop.permute.xlu0 %4214 }
 0x63b   :  { %v6807_v19 = vsel %vm7222_vm12, %v4215_v6, %v4217_v23  ;;  %vm3692_vm12 = vcmask 261120  }
 0x63c   :  { %4593 = vrot.lane.b32.xlu1 %v6719_v62, %s5082_s1  ;;  %4575 = vrot.lane.b32.xlu0 %v6554_v38, %s5082_s1 }
 0x63e   :  { %v4338_v33 = vpop.permute.xlu1 %4337  ;;  %v4213_v10 = vpop.permute.xlu0 %4212 }
 0x63f   :  { %v6814_v42 = vsel %vm7223_vm0, %v4213_v10, %v4215_v6 }
 0x640   :  { %4577 = vrot.lane.b32.xlu1 %v6551_v18, %s5082_s1  ;;  %4456 = vrot.lane.b32.xlu0 %v6510_v53, %s5102_s10 }
 0x642   :  { %v4469_v8 = vpop.permute.xlu1 %4468  ;;  %v4340_v49 = vpop.permute.xlu0 %4339 }
 0x643   :  { %v6824_v32 = vsel %vm7224_vm5, %v4338_v33, %v4340_v49  ;;  %v6827_v0 = vsel %vm7225_vm13, %v4340_v49, %v4342_v12 }
 0x644   :  { %4573 = vrot.lane.b32.xlu1 %v6561_v61, %s5082_s1  ;;  %4701 = vperm.xlu0 %5013, %v4698_v30  }
 0x646   :  { %v4584_v18 = vpop.permute.xlu1 %4583  ;;  %v4467_v31 = vpop.permute.xlu0 %4466 }
 0x647   :  { %v6832_v20 = vsel %vm7226_vm14, %v4467_v31, %v4469_v8 }
 0x648   :  { %7227 = vst [vmem:[#allocation24_spill] sm:$0xff] %v6832_v20 }
 0x64a   :  { %v4580_v47 = vpop.permute.xlu1 %4579  ;;  %v4465_v5 = vpop.permute.xlu0 %4464 }
 0x64b   :  { %v6835_v15 = vsel %vm7228_vm6, %v4465_v5, %v4467_v31 }
 0x64c   :  { %7229 = vst [vmem:[#allocation16_spill] sm:$0xff] %v6835_v15 }
 0x64e   :  { %v3667_v11 = vpop.permute.xlu1 %3666  ;;  %v4582_v9 = vpop.permute.xlu0 %4581 }
 0x64f   :  { %v6838_v52 = vsel %vm7230_vm7, %v4580_v47, %v4582_v9  ;;  %v6841_v36 = vsel %vm7232_vm9, %v4582_v9, %v4584_v18  ;;  %vm7252_vm7 = vmmov %vm7228_vm6 }
 0x650   :  { %7231 = vst [vmem:[#allocation7_spill] sm:$0xff] %v6838_v52  ;;  %7233 = vst [vmem:[#allocation8_spill] sm:$0xff] %v6841_v36 }
 0x651   :  { %vm7257_vm9 = vmmov %vm7228_vm6 }
 0x652   :  { %v3665_v3 = vpop.permute.xlu1 %3664  ;;  %v3669_v7 = vpop.permute.xlu0 %3668 }
 0x653   :  { %v3680_v1 = vsel %vm175_vm2, %v3665_v3, %v3667_v11 }
 0x656   :  { %v3856_v41 = vpop.permute.xlu1 %3855  ;;  %v3854_v25 = vpop.permute.xlu0 %3853 }
 0x65a   :  { %v6843_v58 = vpop.permute.xlu1 %3980  ;;  %v3852_v23 = vpop.permute.xlu0 %3851 }
 0x65e   :  { %v6845_v29 = vpop.permute.xlu1 %4104  ;;  %v6847_v12 = vpop.permute.xlu0 %3978 }
 0x662   :  { %v6849_v6 = vpop.permute.xlu1 %4222  ;;  %v6851_v33 = vpop.permute.xlu0 %3976 }
 0x666   :  { %v6853_v10 = vpop.permute.xlu1 %4347  ;;  %v6855_v30 = vpop.permute.xlu0 %4106 }
 0x66a   :  { %v6857_v8 = vpop.permute.xlu1 %4343  ;;  %v6859_v49 = vpop.permute.xlu0 %4102 }
 0x66e   :  { %v6861_v18 = vpop.permute.xlu1 %4472  ;;  %v6863_v31 = vpop.permute.xlu0 %4220 }
 0x66f   :  { %7234 = vst [vmem:[#allocation13_spill] sm:$0xff] %v6861_v18 }
 0x672   :  { %v6865_v47 = vpop.permute.xlu1 %4470  ;;  %v6867_v5 = vpop.permute.xlu0 %4218 }
 0x673   :  { %7235 = vst [vmem:[#allocation14_spill] sm:$0xff] %v6865_v47 }
 0x676   :  { %v6869_v9 = vpop.permute.xlu1 %4589  ;;  %v6871_v52 = vpop.permute.xlu0 %4345  ;;  %v7256_v3 = vld [vmem:[#allocation13_spill] sm:$0xff] }
 0x677   :  { %7236 = vst [vmem:[#allocation9_spill] sm:$0xff] %v6869_v9  ;;  %v3681_v9 = vsel %vm175_vm2, %v3667_v11, %v3669_v7  ;;  %v7251_v11 = vld [vmem:[#allocation28_spill] sm:$0xff] }
 0x67a   :  { %v6873_v36 = vpop.permute.xlu1 %4585  ;;  %v6875_v14 = vpop.permute.xlu0 %4474 }
 0x67b   :  { %7237 = vst [vmem:[#allocation11_spill] sm:$0xff] %v6873_v36  ;;  %7238 = vst [vmem:[#allocation12_spill] sm:$0xff] %v6875_v14 }
 0x67e   :  { %v3675_v16 = vpop.permute.xlu1 %3674  ;;  %v6877_v15 = vpop.permute.xlu0 %4587 }
 0x67f   :  { %7239 = vst [vmem:[#allocation15_spill] sm:$0xff] %v6877_v15 }
 0x682   :  { %v3860_v20 = vpop.permute.xlu1 %3859  ;;  %v3673_v60 = vpop.permute.xlu0 %3672 }
 0x683   :  { %v3683_v18 = vsel %vm175_vm2, %v3673_v60, %v3675_v16 }
 0x684   :  { %3719 = vmatprep.subr.mxu1 %v3683_v18 }
 0x686   :  { %v3858_v13 = vpop.permute.xlu1 %3857  ;;  %v3671_v47 = vpop.permute.xlu0 %3670 }
 0x687   :  { %v3682_v54 = vsel %vm175_vm2, %v3671_v47, %v3673_v60  ;;  %v3869_v16 = vsel %vm415_vm8, %v3858_v13, %v3860_v20  ;;  %v3868_v60 = vsel %vm415_vm8, %v3854_v25, %v3856_v41  ;;  %vm7243_vm2 = vmmov %vm7224_vm5  ;;  %v7258_v41 = vld [vmem:[#allocation14_spill] sm:$0xff] }
 0x688   :  { %3720 = vmatpush1.msra.mxu1 %v3682_v54  ;;  %vm7247_vm5 = vmmov %vm7243_vm2 }
 0x689   :  { %3721 = vmatprep.subr.mxu1 %v3681_v9  ;;  %vm7248_vm13 = vmmov %vm7243_vm2  ;;  %v7270_v9 = vld [vmem:[#allocation10_spill] sm:$0xff] }
 0x68a   :  { %v3987_v36 = vpop.permute.xlu1 %3986  ;;  %3722 = vmatpush1.msra.mxu1 %v3680_v1  ;;  %v3862_v14 = vpop.permute.xlu0 %3861  ;;  %vm7249_vm14 = vmmov %vm7243_vm2 }
 0x68b   :  { %v3870_v15 = vsel %vm415_vm8, %v3860_v20, %v3862_v14  ;;  %3723 = vmatprep.subr.mxu1 %v6763_v21  ;;  %v3867_v14 = vsel %vm415_vm8, %v3852_v23, %v3854_v25  ;;  %vm7244_vm8 = vmmov %vm7223_vm0 }
 0x68c   :  { %3724 = vmatpush1.msra.mxu1 %v6772_v27  ;;  %4918 = vmatprep.subr.msk.mxu0 %vm150_vm11, %v3870_v15 }
 0x68d   :  { %3725 = vmatprep.subr.mxu1 %v6676_v56  ;;  %4919 = vmatpush1.msk.msra.mxu0 %vm149_vm10, %v3869_v16 }
 0x68e   :  { %v3983_v1 = vpop.permute.xlu1 %3982  ;;  %3726 = vmatpush1.msra.mxu1 %v6683_v2  ;;  %4920 = vmatprep.subr.msk.mxu0 %vm150_vm11, %v3868_v60  ;;  %v3985_v13 = vpop.permute.xlu0 %3984  ;;  %v7271_v60 = vld [vmem:[#allocation8_spill] sm:$0xff] }
 0x68f   :  { %4908 = vmatmul.mubr.msk.f32.vlgmr.msra.gmra.mxu1 %vm3692_vm12, %v6528_v34  ;;  %4909 = vmatprep.subr.msk.mxu1 %vm148_vm3, %v6719_v62  ;;  %v3992_v62 = vsel %vm805_vm15, %v6851_v33, %v6847_v12  ;;  %v7263_v33 = vld [vmem:[#allocation16_spill] sm:$0xff] }
 0x690   :  { %4921 = vmatpush1.msk.msra.mxu0 %vm149_vm10, %v3867_v14  ;;  %4910 = vmatpush1.msk.msra.mxu1 %vm147_vm4, %v6732_v46  ;;  %v4118_v46 = vsel %vm937_vm1, %v6859_v49, %v6845_v29  ;;  %v7267_v49 = vld [vmem:[#allocation6_spill] sm:$0xff] }
 0x691   :  { %4922 = vmatprep.subr.msk.mxu0 %vm150_vm11, %v6779_v35  ;;  %4911 = vmatprep.subr.msk.mxu1 %vm148_vm3, %v6647_v22 }
 0x692   :  { %4923 = vmatpush1.msk.msra.mxu0 %vm149_vm10, %v6769_v57  ;;  %v4113_v34 = vpop.permute.xlu1 %4112  ;;  %4912 = vmatpush1.msk.msra.mxu1 %vm147_vm4, %v6655_v37  ;;  %v4111_v56 = vpop.permute.xlu0 %4110 }
 0x693   :  { %4924 = vmatprep.subr.msk.mxu0 %vm150_vm11, %v6690_v4  ;;  %4913 = vmatprep.subr.msk.mxu1 %vm148_vm3, %v6604_v48  ;;  %v4121_v22 = vsel %vm937_vm1, %v4111_v56, %v4113_v34  ;;  %v7242_v48 = vmov 0.0   ;;  %v3995_v4 = vsel %vm805_vm15, %v3985_v13, %v3987_v36  ;;  %v7253_v36 = vld [vmem:[#allocation5_spill] sm:$0xff] }
 0x694   :  { %4925 = vmatpush1.msk.msra.mxu0 %vm149_vm10, %v6693_v24  ;;  %4914 = vmatpush1.msk.msra.mxu1 %vm147_vm4, %v6611_v63  ;;  %v3993_v63 = vsel %vm805_vm15, %v6847_v12, %v6843_v58  ;;  %v4621_v34 = vld [vmem:[%s7109_s7 + $0x10] sm:$0xff] }
 0x695   :  { %4926 = vmatmul.mubr.msk.f32.vlgmr.msra.gmra.mxu0 %vm3692_vm12, %v6530_v44  ;;  %4157 = vmatprep.subr.mxu0 %v4121_v22  ;;  %v3994_v44 = vsel %vm805_vm15, %v3983_v1, %v3985_v13  ;;  %vm7245_vm15 = vmmov %vm7223_vm0  ;;  %v7273_v13 = vld [vmem:[#allocation7_spill] sm:$0xff] }
 0x696   :  { %4915 = vmatprep.subr.msk.mxu1 %vm148_vm3, %v6554_v38  ;;  %v4109_v37 = vpop.permute.xlu1 %4108  ;;  %3832 = vmatprep.mubr.f32.mxu1 %v7242_v48  ;;  %v4229_v2 = vpop.permute.xlu0 %4228  ;;  %v5037_v38 = vld [vmem:[%s7109_s7] sm:$0xff]  ;;  %s5104_s7 = smov [#allocation2]  }
 0x697   :  { %v4120_v24 = vsel %vm937_vm1, %v4109_v37, %v4111_v56  ;;  %4916 = vmatpush1.msk.msra.mxu1 %vm147_vm4, %v6561_v61  ;;  %4197 = vmatprep.mubr.f32.mxu0 %v7242_v48  ;;  %v4119_v61 = vsel %vm937_vm1, %v6845_v29, %v6855_v30  ;;  %vm7246_vm1 = vmmov %vm7223_vm0  ;;  %v7265_v30 = vld [vmem:[#allocation15_spill] sm:$0xff]  ;;  %s4750_s1 = sshll.u32 %s5104_s7, 4  ;;  %s4751_s1 = int_to_ptr.vmem [resolvable:$true] %s4750_s1 }
 0x698   :  { %4917 = vmatmul.mubr.msk.f32.vlgmr.msra.gmra.mxu1 %vm3692_vm12, %v5037_v38  ;;  %4927 = vmatprep.subr.msk.mxu1 %vm148_vm3, %v3995_v4  ;;  %s5038_s18 = scalar_lea.vmem %s4751_s1, 256  ;;  %p5043_p1 = scmp.lt.s32.totalorder %s4751_s1, %s4751_s1 }
 0x699   :  { %4928 = vmatpush1.msk.msra.mxu1 %vm147_vm4, %v3994_v44  ;;  %4158 = vmatpush1.msra.mxu0 %v4120_v24  ;;  %p5039_p0 = scmp.ne.s32.totalorder %s4751_s1, %s5038_s18  ;;  %p5044_p2 = scmp.lt.s32.totalorder %s5038_s18, %s5038_s18 }
 0x69a   :  { %4929 = vmatprep.subr.msk.mxu1 %vm148_vm3, %v3993_v63  ;;  %4159 = vmatprep.subr.mxu0 %v4119_v61  ;;  %v4227_v21 = vpop.permute.xlu1 %4226  ;;  %v4225_v57 = vpop.permute.xlu0 %4224 }
 0x69b   :  { %4930 = vmatpush1.msk.msra.mxu1 %vm147_vm4, %v3992_v62  ;;  %4160 = vmatpush1.msra.mxu0 %v4118_v46  ;;  %p5045_p3 = por %p5044_p2, %p5043_p1 }
 0x69c   :  { %4931 = vmatprep.subr.msk.mxu1 %vm148_vm3, %v6788_v26  ;;  %4161 = vmatprep.subr.mxu0 %v6795_v50 }
 0x69d   :  { %4932 = vmatpush1.msk.msra.mxu1 %vm147_vm4, %v6785_v39  ;;  %4162 = vmatpush1.msra.mxu0 %v6800_v43  ;;  %v4237_v39 = vsel %vm7244_vm8, %v4227_v21, %v4229_v2  ;;  %v4360_v43 = vsel %vm7248_vm13, %v6871_v52, %v6853_v10  ;;  %v7264_v10 = vld [vmem:[#allocation9_spill] sm:$0xff]  ;;  %p5046_p4 = pnand %p5045_p3, %p5039_p0 }
 0x69e   :  { %4933 = vmatprep.subr.msk.mxu1 %vm148_vm3, %v6700_v59  ;;  %4163 = vmatprep.subr.mxu0 %v6713_v17  ;;  %v4354_v27 = vpop.permute.xlu1 %4353  ;;  %v4352_v35 = vpop.permute.xlu0 %4351  ;;  %v4236_v59 = vsel %vm7245_vm15, %v4225_v57, %v4227_v21 }
 0x69f   :  { %4934 = vmatpush1.msk.msra.mxu1 %vm147_vm4, %v6706_v45  ;;  %4080 = vmatprep.mubr.f32.mxu1 %v7242_v48  ;;  %v4362_v26 = vsel %vm7243_vm2, %v4352_v35, %v4354_v27  ;;  %v4235_v45 = vsel %vm7246_vm1, %v6863_v31, %v6849_v6  ;;  %v7262_v6 = vld [vmem:[#allocation24_spill] sm:$0xff] }
 0x6a0   :  { %4164 = vmatpush1.msra.mxu0 %v6722_v55  ;;  %4935 = vmatmul.mubr.msk.f32.vlgmr.msra.gmra.mxu1 %vm3692_vm12, %v6532_v28  ;;  %v4234_v55 = vsel %vm7223_vm0, %v6867_v5, %v6863_v31  ;;  %v7268_v31 = vld [vmem:[#allocation11_spill] sm:$0xff] }
 0x6a1   :  { %4937 = vmatprep.subr.msk.mxu1 %vm150_vm11, %v4237_v39  ;;  %4946 = vmatprep.subr.msk.mxu0 %vm148_vm3, %v4362_v26 }
 0x6a2   :  { %4938 = vmatpush1.msk.msra.mxu1 %vm149_vm10, %v4236_v59  ;;  %4936 = vmatmul.mubr.msk.f32.vlgmr.msra.gmra.mxu0 %vm3692_vm12, %v6510_v53  ;;  %v4350_v17 = vpop.permute.xlu1 %4349  ;;  %v4479_v28 = vpop.permute.xlu0 %4478  ;;  %v4359_v53 = vsel %vm7249_vm14, %v6857_v8, %v6871_v52 }
 0x6a3   :  { %4939 = vmatprep.subr.msk.mxu1 %vm150_vm11, %v4235_v45  ;;  %v4361_v50 = vsel %vm7247_vm5, %v4350_v17, %v4352_v35  ;;  %4322 = vmatprep.mubr.f32.mxu1 %v7242_v48 }
 0x6a4   :  { %4940 = vmatpush1.msk.msra.mxu1 %vm149_vm10, %v4234_v55  ;;  %4947 = vmatpush1.msk.msra.mxu0 %vm147_vm4, %v4361_v50 }
 0x6a5   :  { %4941 = vmatprep.subr.msk.mxu1 %vm150_vm11, %v6807_v19  ;;  %4948 = vmatprep.subr.msk.mxu0 %vm148_vm3, %v4360_v43 }
 0x6a6   :  { %4942 = vmatpush1.msk.msra.mxu1 %vm149_vm10, %v6814_v42  ;;  %v4481_v20 = vpop.permute.xlu1 %4480  ;;  %4949 = vmatpush1.msk.msra.mxu0 %vm147_vm4, %v4359_v53  ;;  %v4596_v15 = vpop.permute.xlu0 %4595  ;;  %v7250_v42 = vld [vmem:[#allocation22_spill] sm:$0xff] }
 0x6a7   :  { %4943 = vmatprep.subr.msk.mxu1 %vm150_vm11, %v6735_v40  ;;  %4950 = vmatprep.subr.msk.mxu0 %vm148_vm3, %v6827_v0  ;;  %v4489_v19 = vsel %vm7228_vm6, %v4479_v28, %v4481_v20 }
 0x6a8   :  { %4944 = vmatpush1.msk.msra.mxu1 %vm149_vm10, %v6725_v51  ;;  %4951 = vmatpush1.msk.msra.mxu0 %vm147_vm4, %v6824_v32  ;;  %v7254_v51 = vld [vmem:[#allocation26_spill] sm:$0xff]  ;;  %v7255_v32 = vld [vmem:[#allocation12_spill] sm:$0xff] }
 0x6a9   :  { %4945 = vmatmul.mubr.msk.f32.vlgmr.msra.gmra.mxu1 %vm3692_vm12, %v7250_v42  ;;  %4524 = vmatprep.subr.mxu1 %v4489_v19  ;;  %v4487_v7 = vsel %vm7257_vm9, %v7256_v3, %v7255_v32 }
 0x6aa   :  { %4952 = vmatprep.subr.msk.mxu0 %vm148_vm3, %v7251_v11  ;;  %v4477_v40 = vpop.permute.xlu1 %4476  ;;  %4447 = vmatprep.mubr.f32.mxu0 %v7242_v48  ;;  %v4592_v0 = vpop.permute.xlu0 %4591  ;;  %vm7259_vm3 = vmmov %vm7228_vm6 }
 0x6ab   :  { %v4488_v52 = vsel %vm7252_vm7, %v4477_v40, %v4479_v28  ;;  %4953 = vmatpush1.msk.msra.mxu0 %vm147_vm4, %v7253_v36  ;;  %4564 = vmatprep.mubr.f32.mxu1 %v7242_v48  ;;  %v4486_v25 = vsel %vm7259_vm3, %v7258_v41, %v7256_v3  ;;  %vm7260_vm4 = vcmask 769024  }
 0x6ac   :  { %4954 = vmatmul.mubr.msk.f32.vlgmr.msra.gmra.mxu0 %vm3692_vm12, %v7254_v51  ;;  %4525 = vmatpush1.msra.mxu1 %v4488_v52  ;;  %vm7261_vm2 = vmmov %vm7260_vm4 }
 0x6ad   :  { %4526 = vmatprep.subr.mxu1 %v4487_v7  ;;  %4689 = vmatprep.mubr.f32.mxu0 %v7242_v48  ;;  %vm7266_vm8 = vmmov %vm7261_vm2 }
 0x6ae   :  { %v4594_v58 = vpop.permute.xlu1 %4593  ;;  %4527 = vmatpush1.msra.mxu1 %v4486_v25  ;;  %v4576_v23 = vpop.permute.xlu0 %4575  ;;  %v4602_v8 = vsel %vm7266_vm8, %v7265_v30, %v7264_v10  ;;  %vm7269_vm15 = vmmov %vm7261_vm2 }
 0x6af   :  { %v4603_v29 = vsel %vm7260_vm4, %v4592_v0, %v4594_v58  ;;  %v4604_v12 = vsel %vm7261_vm2, %v4594_v58, %v4596_v15  ;;  %4528 = vmatprep.subr.mxu1 %v7262_v6  ;;  %v4601_v47 = vsel %vm7269_vm15, %v7268_v31, %v7265_v30  ;;  %vm7272_vm1 = vmmov %vm7261_vm2 }
 0x6b0   :  { %4529 = vmatpush1.msra.mxu1 %v7263_v33  ;;  %4956 = vmatprep.subr.msk.mxu0 %vm150_vm11, %v4604_v12  ;;  %vm7274_vm0 = vmmov %vm7272_vm1 }
 0x6b1   :  { %4530 = vmatprep.subr.mxu1 %v7267_v49  ;;  %4957 = vmatpush1.msk.msra.mxu0 %vm149_vm10, %v4603_v29 }
 0x6b2   :  { %v4578_v5 = vpop.permute.xlu1 %4577  ;;  %4531 = vmatpush1.msra.mxu1 %v7270_v9  ;;  %4958 = vmatprep.subr.msk.mxu0 %vm150_vm11, %v4602_v8  ;;  %v4457_v16 = vpop.permute.xlu0 %4456 }
 0x6b3   :  { %4955 = vmatmul.mubr.msk.f32.vlgmr.msra.gmra.mxu1 %vm3692_vm12, %v4457_v16  ;;  %4959 = vmatpush1.msk.msra.mxu0 %vm149_vm10, %v4601_v47  ;;  %v4598_v1 = vsel %vm7272_vm1, %v4576_v23, %v4578_v5 }
 0x6b4   :  { %4960 = vmatprep.subr.msk.mxu0 %vm150_vm11, %v7271_v60 }
 0x6b5   :  { %4961 = vmatpush1.msk.msra.mxu0 %vm149_vm10, %v7273_v13 }
 0x6b6   :  { %v4574_v14 = vpop.permute.xlu1 %4573  ;;  %4962 = vmatprep.subr.msk.mxu0 %vm150_vm11, %v4598_v1 }
 0x6b7   :  { %v4597_v56 = vsel %vm7274_vm0, %v4574_v14, %v4576_v23 }
 0x6b8   :  { %4963 = vmatpush1.msk.msra.mxu0 %vm149_vm10, %v4597_v56 }
 0x6b9   :  { %4964 = vmatmul.mubr.msk.f32.vlgmr.msra.gmra.mxu0 %vm3692_vm12, %v4621_v34 }
 0x6bf   :  { %v4702_v11 = vpop.permute.xlu0 %4701 }
 0x74f   :  { %v3761_v22 = vpop.f32.mrf.mxu1 }
 0x751   :  { %v3763_v37 = vpop.f32.mrf.mxu1 }
 0x755   :  { %v3957_v2 = vpop.f32.mrf.mxu0 }
 0x757   :  { %v3959_v18 = vpop.f32.mrf.mxu0 }
 0x758   :  { %v3834_v48 = vpop.f32.mrf.mxu1 }
 0x759   :  { %v3835_v44 = vadd.f32 %v3834_v48, %v3761_v22 }
 0x75a   :  { %v3836_v4 = vpop.f32.mrf.mxu1 }
 0x75b   :  { %v3837_v38 = vadd.f32 %v3836_v4, %v3763_v37  ;;  %v3962_v62 = vadd.f32 %v3957_v2, %v3835_v44 }
 0x75d   :  { %v3963_v57 = vadd.f32 %v3959_v18, %v3837_v38 }
 0x760   :  { %v4082_v24 = vpop.f32.mrf.mxu1 }
 0x761   :  { %v4087_v21 = vadd.f32 %v4082_v24, %v3962_v62 }
 0x762   :  { %v4084_v63 = vpop.f32.mrf.mxu1  ;;  %v4199_v61 = vpop.f32.mrf.mxu0 }
 0x763   :  { %v4088_v54 = vadd.f32 %v4084_v63, %v3963_v57  ;;  %v4204_v39 = vadd.f32 %v4199_v61, %v4087_v21 }
 0x764   :  { %v4201_v27 = vpop.f32.mrf.mxu0 }
 0x765   :  { %v4205_v45 = vadd.f32 %v4201_v27, %v4088_v54 }
 0x769   :  { %v4324_v46 = vpop.f32.mrf.mxu1 }
 0x76a   :  { %v4329_v17 = vadd.f32 %v4324_v46, %v4204_v39 }
 0x76b   :  { %v4326_v35 = vpop.f32.mrf.mxu1 }
 0x76c   :  { %v4449_v26 = vpop.f32.mrf.mxu0  ;;  %v4330_v55 = vadd.f32 %v4326_v35, %v4205_v45 }
 0x76d   :  { %v4454_v50 = vadd.f32 %v4449_v26, %v4329_v17 }
 0x76e   :  { %v4451_v28 = vpop.f32.mrf.mxu0 }
 0x76f   :  { %v4455_v53 = vadd.f32 %v4451_v28, %v4330_v55 }
 0x773   :  { %v4566_v59 = vpop.f32.mrf.mxu1 }
 0x774   :  { %v4571_v20 = vadd.f32 %v4566_v59, %v4454_v50 }
 0x775   :  { %v4568_v43 = vpop.f32.mrf.mxu1 }
 0x776   :  { %v4572_v19 = vadd.f32 %v4568_v43, %v4455_v53 }
 0x779   :  { %v4691_v15 = vpop.f32.mrf.mxu0 }
 0x77a   :  { %v4696_v42 = vadd.f32 %v4691_v15, %v4571_v20 }
 0x77b   :  { %v4693_v40 = vpop.f32.mrf.mxu0 }
 0x77c   :  { %v4704_v0 = vadd.f32 %v4702_v11, %v4696_v42  ;;  %v4697_v52 = vadd.f32 %v4693_v40, %v4572_v19 }
 0x77e   :  { %v4706_v36 = vmax.f32 %v4704_v0, 0.0  ;;  %v4705_v51 = vadd.f32 %v4702_v11, %v4697_v52 }
 0x780   :  { %v4708_v32 = vrot.slane %v4706_v36, 4  ;;  %v4707_v3 = vmax.f32 %v4705_v51, 0.0 }
 0x782   :  { %v4709_v7 = vmax.f32 %v4706_v36, %v4708_v32  ;;  %v4714_v41 = vrot.slane %v4707_v3, 4 }
 0x784   :  { %v4710_v25 = vrot.slane %v4709_v7, 2  ;;  %v4715_v58 = vmax.f32 %v4707_v3, %v4714_v41 }
 0x786   :  { %v4711_v23 = vmax.f32 %v4709_v7, %v4710_v25  ;;  %v4716_v29 = vrot.slane %v4715_v58, 2 }
 0x788   :  { %v4712_v12 = vrot.slane %v4711_v23, 1  ;;  %v4717_v6 = vmax.f32 %v4715_v58, %v4716_v29 }
 0x78a   :  { %v4713_v33 = vmax.f32 %v4711_v23, %v4712_v12  ;;  %v4718_v10 = vrot.slane %v4717_v6, 1 }
 0x78c   :  { %v4720_v30 = vsub.f32 %v4706_v36, %v4713_v33  ;;  %v4719_v8 = vmax.f32 %v4717_v6, %v4718_v10 }
 0x78e   :  { %v4722_v49 = vmul.f32 1.442695, %v4720_v30  ;;  %v4721_v31 = vsub.f32 %v4707_v3, %v4719_v8 }
 0x790   :  { %5025 = vpow2.f32 %v4722_v49  ;;  %v4724_v47 = vmul.f32 1.442695, %v4721_v31 }
 0x792   :  { %5027 = vpow2.f32 %v4724_v47 }
 0x79d   :  { %v5026_v5 = vpop.eup %5025 }
 0x79e   :  { %v4726_v9 = vrot.slane %v5026_v5, 4 }
 0x79f   :  { %v5028_v16 = vpop.eup %5027 }
 0x7a0   :  { %v4727_v60 = vadd.f32 %v5026_v5, %v4726_v9  ;;  %v4732_v1 = vrot.slane %v5028_v16, 4 }
 0x7a2   :  { %v4728_v13 = vrot.slane %v4727_v60, 2  ;;  %v4733_v14 = vadd.f32 %v5028_v16, %v4732_v1 }
 0x7a4   :  { %v4729_v34 = vadd.f32 %v4728_v13, %v4727_v60  ;;  %v4734_v56 = vrot.slane %v4733_v14, 2 }
 0x7a6   :  { %v4730_v22 = vrot.slane %v4729_v34, 1  ;;  %v4735_v37 = vadd.f32 %v4734_v56, %v4733_v14 }
 0x7a8   :  { %v4731_v48 = vadd.f32 %v4730_v22, %v4729_v34  ;;  %v4736_v2 = vrot.slane %v4735_v37, 1 }
 0x7aa   :  { %v4737_v4 = vadd.f32 %v4736_v2, %v4735_v37  ;;  %5029 = vrcp.f32 %v4731_v48 }
 0x7ac   :  { %5031 = vrcp.f32 %v4737_v4 }
 0x7b7   :  { %v5030_v24 = vpop.eup %5029 }
 0x7b8   :  { %v4740_v44 = vmul.f32 %v5030_v24, %v5026_v5 }
 0x7b9   :  { %v5032_v18 = vpop.eup %5031 }
 0x7ba   :  { %v4741_v38 = vmul.f32 %v5032_v18, %v5028_v16  ;;  %4742 = vst [vmem:[#allocation2] sm:$0xff] %v4740_v44 }
 0x7bc   :  { %4743 = vst [vmem:[#allocation2 + $0x8] sm:$0xff] %v4741_v38 }
 0x7bd   :  { %5049 = shalt.err (!%p5046_p4)
}
 0x7be   :  { %4753 = dma.vmem_to_hbm [thread:$0]  %s4751_s1, 256, %s7111_s9, [#allocation3]  }
 0x7bf   :  { %5058 = dma.done.wait [#allocation3], 256  }
 0x7c0   :  { %5059 = vsyncadd [#allocation3], 4294967040 }
 0x7c1   :  { %4757 = vsyncpa [#allocation3], 1 }

</bundles_post_ra>
